<compile_context>
chip_gen: v6e
topology: v6e:2x2x1
jax: 0.10.0
libtpu: 0.0.40
codegen_flags: <defaults>
</compile_context>

<pallas_src>
import functools

import jax
import jax.numpy as jnp
from jax import lax
from jax.experimental import pallas as pl
from jax.experimental.pallas import tpu as pltpu


def _round_up(n, m):
    return (n + m - 1) // m * m


# ---------------------------------------------------------------------------
# Kernel
# ---------------------------------------------------------------------------
def actor_critic_kernel(x_ref, w1_ref, b1_ref, w23_ref, b23_ref, out_ref,
                        acc_ref, *, num_actions):
    k = pl.program_id(1)

    @pl.when(k == 0)
    def _():
        acc_ref[...] = jnp.zeros_like(acc_ref)

    # fc1 partial sum: bf16 operands, f32 MXU accumulation.
    acc_ref[...] += jnp.dot(
        x_ref[...].astype(jnp.bfloat16), w1_ref[...],
        preferred_element_type=jnp.float32)

    @pl.when(k == pl.num_programs(1) - 1)
    def _():
        h = acc_ref[...] + b1_ref[...]
        # ELU(alpha=1): x if x > 0 else exp(x) - 1   (overflow-safe exp)
        h = jnp.where(h > 0, h, jnp.exp(jnp.minimum(h, 0.0)) - 1.0)

        # Fused actor+critic head: one lane-dense matmul over (HID, 128-pad).
        y = jnp.dot(h.astype(w23_ref.dtype), w23_ref[...],
                    preferred_element_type=jnp.float32) + b23_ref[...]

        col = lax.broadcasted_iota(jnp.int32, y.shape, dimension=1)
        is_action = col < num_actions

        # Softmax over the action columns only; exact normalization
        # (exp -> EUP, row reduce -> XLU, divide -> VPU: all off the MXU path).
        logits = jnp.where(is_action, y, -jnp.inf)
        m = jnp.max(logits, axis=-1, keepdims=True)
        e = jnp.exp(logits - m)                       # masked cols -> 0
        probs = e / jnp.sum(e, axis=-1, keepdims=True)

        # Single lane-dense store: cols [0, A) = probs, col A = critic value,
        # cols > A = zero-weight padding.
        out_ref[...] = jnp.where(is_action, probs, y)


# ---------------------------------------------------------------------------
# One-time weight preparation (hoisted out of the forward path)
# ---------------------------------------------------------------------------
def prepare_params(params):
    """Fuse actor/critic heads and cast weights once; reuse across calls."""
    w1, b1, w2, b2, w3, b3 = params           # torch-equivalent (in, out) layout
    K, HID = w1.shape
    A = w2.shape[1]
    HEAD_N = _round_up(A + 1, 128)             # lane-dense fused head width

    w23 = jnp.zeros((HID, HEAD_N), jnp.float32)
    w23 = w23.at[:, :A].set(w2).at[:, A:A + 1].set(w3.reshape(HID, 1))
    b23 = jnp.zeros((1, HEAD_N), jnp.float32)
    b23 = b23.at[:, :A].set(b2.reshape(1, A)).at[:, A:A + 1].set(b3.reshape(1, 1))

    return dict(
        w1=w1.astype(jnp.bfloat16),            # streamed bf16, f32 accumulation
        b1=b1.reshape(1, HID).astype(jnp.float32),
        w23=w23.astype(jnp.bfloat16),
        b23=b23,
        num_actions=A,
    )


# ---------------------------------------------------------------------------
# Tiling heuristics (sweepable via explicit tile_b / tile_k arguments)
# ---------------------------------------------------------------------------
_VMEM_BUDGET = 40 * 1024 * 1024   # conservative: leaves headroom on v7x (64 MiB)


def _pick_tile_k(K):
    if K <= 4096:
        return K                               # W1 stays VMEM-resident
    for cand in (4096, 2048, 1024, 512, 256, 128):
        if K % cand == 0:
            return cand
    # TODO(synk): pad K at prepare time when the flatten size has no 128-multiple divisor.
    return K


def _estimate_vmem(tile_b, tile_k, hid, head_n, w1_resident):
    x_bytes = 2 * tile_b * tile_k * 4                       # f32 x tile, 2 bufs
    w1_bytes = (1 if w1_resident else 2) * tile_k * hid * 2  # bf16 W1 tile
    head_bytes = hid * head_n * 2 + head_n * 4 + hid * 4     # W23 / b23 / b1
    out_bytes = 2 * tile_b * head_n * 4
    acc_bytes = tile_b * hid * 4
    tmp_bytes = tile_b * hid * 4 + tile_b * head_n * 4       # h / y temporaries
    return x_bytes + w1_bytes + head_bytes + out_bytes + acc_bytes + tmp_bytes


def _pick_tile_b(B, tile_k, K, hid, head_n):
    if B <= 16:
        tile_b = 16
    else:
        # Big tiles amortize the ~0.35us per-grid-step overhead; keep >= 2
        # batch programs so v7x can shard the batch across both TensorCores.
        tile_b = min(1024, _round_up(pl.cdiv(B, 2), 16))
    w1_resident = tile_k == K
    while tile_b > 16 and _estimate_vmem(tile_b, tile_k, hid, head_n,
                                         w1_resident) > _VMEM_BUDGET:
        tile_b = max(16, _round_up(tile_b // 2, 16))
    return tile_b


# ---------------------------------------------------------------------------
# Forward wrapper
# ---------------------------------------------------------------------------
def actor_critic_forward(x_nchw, prepared, *, tile_b=None, tile_k=None):
    """x_nchw: (B, C, H, W) float32.  Returns (action_probs (B,A), value (B,1))."""
    w1, b1 = prepared["w1"], prepared["b1"]
    w23, b23 = prepared["w23"], prepared["b23"]
    A = prepared["num_actions"]
    K, HID = w1.shape
    HEAD_N = w23.shape[1]

    B = x_nchw.shape[0]
    x2d = x_nchw.reshape(B, -1).astype(jnp.float32)   # nn.Flatten; streamed f32
    assert x2d.shape[1] == K

    if tile_k is None:
        tile_k = _pick_tile_k(K)
    if tile_b is None:
        tile_b = _pick_tile_b(B, tile_k, K, HID, HEAD_N)

    nb = pl.cdiv(B, tile_b)                    # ragged last tile handled by
    nk = pl.cdiv(K, tile_k)                    # masked partial blocks
    w1_resident = nk == 1

    vmem_limit = int(min(
        64 * 1024 * 1024,
        max(32 * 1024 * 1024,
            round(1.5 * _estimate_vmem(tile_b, tile_k, HID, HEAD_N,
                                       w1_resident)))))

    kernel = functools.partial(actor_critic_kernel, num_actions=A)

    def build(single_buffer_resident):
        resident = ({"pipeline_mode": pl.Buffered(1)}
                    if single_buffer_resident else {})
        w1_mode = resident if w1_resident else {}
        in_specs = [
            pl.BlockSpec((tile_b, tile_k), lambda i, k: (i, k)),            # x
            pl.BlockSpec((tile_k, HID), lambda i, k: (k, 0), **w1_mode),    # W1
            pl.BlockSpec((1, HID), lambda i, k: (0, 0), **resident),        # b1
            pl.BlockSpec((HID, HEAD_N), lambda i, k: (0, 0), **resident),   # W2|W3
            pl.BlockSpec((1, HEAD_N), lambda i, k: (0, 0), **resident),     # b2|b3
        ]
        return pl.pallas_call(
            kernel,
            out_shape=jax.ShapeDtypeStruct((B, HEAD_N), jnp.float32),
            grid=(nb, nk),
            in_specs=in_specs,
            out_specs=pl.BlockSpec((tile_b, HEAD_N), lambda i, k: (i, 0)),
            scratch_shapes=[pltpu.VMEM((tile_b, HID), jnp.float32)],
            compiler_params=pltpu.CompilerParams(
                dimension_semantics=("parallel", "arbitrary"),
                vmem_limit_bytes=vmem_limit),
        )

    try:
        out = build(True)(x2d, w1, b1, w23, b23)
    except Exception:
        # Fallback for JAX versions where pallas_call rejects pl.Buffered(1)
        # on resident blocks: identical kernel, default double buffering.
        out = build(False)(x2d, w1, b1, w23, b23)

    probs = out[:, :A]
    value = out[:, A:A + 1]
    return probs, value


# ---------------------------------------------------------------------------
# Synthetic init + pure-JAX reference
# ---------------------------------------------------------------------------
def init_params(key, in_features, hidden, action_space):
    """Deterministic synthetic init; weights stored as (in, out)."""
    k1, k2, k3, k4, k5, k6 = jax.random.split(key, 6)
    s1 = 1.0 / jnp.sqrt(in_features)
    s2 = 1.0 / jnp.sqrt(hidden)
    w1 = jax.random.uniform(k1, (in_features, hidden), jnp.float32, -s1, s1)
    b1 = jax.random.uniform(k2, (1, hidden), jnp.float32, -s1, s1)
    w2 = jax.random.uniform(k3, (hidden, action_space), jnp.float32, -s2, s2)
    b2 = jax.random.uniform(k4, (1, action_space), jnp.float32, -s2, s2)
    w3 = jax.random.uniform(k5, (hidden, 1), jnp.float32, -s2, s2)
    b3 = jax.random.uniform(k6, (1, 1), jnp.float32, -s2, s2)
    return w1, b1, w2, b2, w3, b3


def _reference_forward(x_nchw, params):
    """Pure-JAX f32 reference of the torch module."""
    w1, b1, w2, b2, w3, b3 = params
    x = x_nchw.reshape(x_nchw.shape[0], -1)
    h = x @ w1 + b1.reshape(1, -1)
    h = jnp.where(h > 0, h, jnp.exp(jnp.minimum(h, 0.0)) - 1.0)
    probs = jax.nn.softmax(h @ w2 + b2.reshape(1, -1), axis=-1)
    value = h @ w3 + b3.reshape(1, -1)
    return probs, value


def _check(probs, value, x, params, action_space):
    B = x.shape[0]
    assert probs.shape == (B, action_space)
    assert value.shape == (B, 1)
    assert bool(jnp.all(jnp.isfinite(probs))) and bool(jnp.all(jnp.isfinite(value)))
    assert bool(jnp.all(jnp.abs(jnp.sum(probs, axis=-1) - 1.0) < 1e-3))
    ref_probs, ref_value = _reference_forward(x, params)
    assert bool(jnp.max(jnp.abs(probs - ref_probs)) < 5e-2)
    assert bool(jnp.max(jnp.abs(value - ref_value)) < 1e-1)


if __name__ == "__main__":
    key = jax.random.PRNGKey(0)
    kx, kp, kx2 = jax.random.split(key, 3)

    # Module-consistent small shapes: input_shape=(4, 16, 16), batch=2, 8 actions.
    B, C, H, W = 2, 4, 16, 16
    action_space = 8
    hidden = 512
    in_features = C * H * W                 # np.prod(input_shape)

    params = init_params(kp, in_features, hidden, action_space)
    prepared = prepare_params(params)       # one-time weight prep (hoisted)

    # Tiny-batch path (single grid step, ragged block).
    x = jax.random.normal(kx, (B, C, H, W), jnp.float32)
    probs, value = actor_critic_forward(x, prepared)
    jax.block_until_ready((probs, value))
    _check(probs, value, x, params, action_space)

    # Multi-program batch path (2 batch tiles, ragged last tile).
    B2 = 40
    x2 = jax.random.normal(kx2, (B2, C, H, W), jnp.float32)
    probs2, value2 = actor_critic_forward(x2, prepared)
    jax.block_until_ready((probs2, value2))
    _check(probs2, value2, x2, params, action_space)

    print("KERNEL_OK")
</pallas_src>

<mosaic_0001>
module attributes {stable_mosaic.version = 11 : i64} {
  func.func @actor_critic_kernel(%arg0: i32, %arg1: i32, %arg2: memref<16x1024xf32, #tpu.memory_space<vmem>>, %arg3: memref<1024x512xbf16, #tpu.memory_space<vmem>>, %arg4: memref<1x512xf32, #tpu.memory_space<vmem>>, %arg5: memref<512x128xbf16, #tpu.memory_space<vmem>>, %arg6: memref<1x128xf32, #tpu.memory_space<vmem>>, %arg7: memref<16x128xf32, #tpu.memory_space<vmem>>, %arg8: memref<16x512xf32, #tpu.memory_space<vmem>>) attributes {dimension_semantics = [#tpu.dimension_semantics<parallel>, #tpu.dimension_semantics<arbitrary>], iteration_bounds = array<i64: 1, 1>, scalar_prefetch = 0 : i64, scratch_operands = 1 : i64, tpu.core_type = #tpu.core_type<tc>, window_params = [{transform_indices = @transform_0, window_bounds = array<i64: 16, 1024>}, {pipeline_mode = #tpu.pipeline_mode<synchronous>, transform_indices = @transform_1, window_bounds = array<i64: 1024, 512>}, {pipeline_mode = #tpu.pipeline_mode<synchronous>, transform_indices = @transform_2, window_bounds = array<i64: 1, 512>}, {pipeline_mode = #tpu.pipeline_mode<synchronous>, transform_indices = @transform_3, window_bounds = array<i64: 512, 128>}, {pipeline_mode = #tpu.pipeline_mode<synchronous>, transform_indices = @transform_4, window_bounds = array<i64: 1, 128>}, {transform_indices = @transform_5, window_bounds = array<i64: 16, 128>}]} {
    %c0_i32 = arith.constant 0 : i32
    %0 = arith.cmpi eq, %arg1, %c0_i32 : i32
    %1 = arith.extui %0 : i1 to i32
    %c0_i32_0 = arith.constant 0 : i32
    %2 = arith.cmpi ne, %1, %c0_i32_0 : i32
    scf.if %2 {
      %cst_10 = arith.constant 0.000000e+00 : f32
      %13 = vector.broadcast %cst_10 : f32 to vector<16x512xf32>
      %c0_11 = arith.constant 0 : index
      %c0_12 = arith.constant 0 : index
      %14 = vector.load %arg8[%c0_11, %c0_12] : memref<16x512xf32, #tpu.memory_space<vmem>>, vector<16x512xf32>
      tpu.vector_store %arg8[%c0_11, %c0_12], %13 {strides = array<i32>} : memref<16x512xf32, #tpu.memory_space<vmem>>, vector<16x512xf32>,
    } else {
    }
    %c0 = arith.constant 0 : index
    %c0_1 = arith.constant 0 : index
    %3 = vector.load %arg8[%c0, %c0_1] : memref<16x512xf32, #tpu.memory_space<vmem>>, vector<16x512xf32>
    %c0_2 = arith.constant 0 : index
    %c0_3 = arith.constant 0 : index
    %4 = vector.load %arg2[%c0_2, %c0_3] : memref<16x1024xf32, #tpu.memory_space<vmem>>, vector<16x1024xf32>
    %5 = arith.truncf %4 : vector<16x1024xf32> to vector<16x1024xbf16>
    %c0_4 = arith.constant 0 : index
    %c0_5 = arith.constant 0 : index
    %6 = vector.load %arg3[%c0_4, %c0_5] : memref<1024x512xbf16, #tpu.memory_space<vmem>>, vector<1024x512xbf16>
    %cst = arith.constant dense<0.000000e+00> : vector<16x512xf32>
    %7 = tpu.matmul %5, %6, %cst {dimension_numbers = #tpu.dot_dimension_numbers<[1], [0], [0], [1], [0, 0, 1, 1], [], []>} : vector<16x1024xbf16>, vector<1024x512xbf16>, vector<16x512xf32> -> vector<16x512xf32>
    %8 = arith.addf %3, %7 : vector<16x512xf32>
    %c0_6 = arith.constant 0 : index
    %c0_7 = arith.constant 0 : index
    %9 = vector.load %arg8[%c0_6, %c0_7] : memref<16x512xf32, #tpu.memory_space<vmem>>, vector<16x512xf32>
    tpu.vector_store %arg8[%c0_6, %c0_7], %8 {strides = array<i32>} : memref<16x512xf32, #tpu.memory_space<vmem>>, vector<16x512xf32>,
    %c0_i32_8 = arith.constant 0 : i32
    %10 = arith.cmpi eq, %arg1, %c0_i32_8 : i32
    %11 = arith.extui %10 : i1 to i32
    %c0_i32_9 = arith.constant 0 : i32
    %12 = arith.cmpi ne, %11, %c0_i32_9 : i32
    scf.if %12 {
      %c0_10 = arith.constant 0 : index
      %c0_11 = arith.constant 0 : index
      %13 = vector.load %arg8[%c0_10, %c0_11] : memref<16x512xf32, #tpu.memory_space<vmem>>, vector<16x512xf32>
      %c0_12 = arith.constant 0 : index
      %c0_13 = arith.constant 0 : index
      %14 = vector.load %arg4[%c0_12, %c0_13] : memref<1x512xf32, #tpu.memory_space<vmem>>, vector<1x512xf32>
      %15 = vector.broadcast %14 : vector<1x512xf32> to vector<16x512xf32>
      %16 = arith.addf %13, %15 : vector<16x512xf32>
      %cst_14 = arith.constant 0.000000e+00 : f32
      %17 = vector.broadcast %cst_14 : f32 to vector<16x512xf32>
      %18 = arith.cmpf ogt, %16, %17 : vector<16x512xf32>
      %cst_15 = arith.constant 0.000000e+00 : f32
      %19 = vector.broadcast %cst_15 : f32 to vector<16x512xf32>
      %20 = arith.minimumf %16, %19 : vector<16x512xf32>
      %21 = math.exp %20 : vector<16x512xf32>
      %cst_16 = arith.constant 1.000000e+00 : f32
      %22 = vector.broadcast %cst_16 : f32 to vector<16x512xf32>
      %23 = arith.subf %21, %22 : vector<16x512xf32>
      %24 = arith.select %18, %16, %23 : vector<16x512xi1>, vector<16x512xf32>
      %25 = arith.truncf %24 : vector<16x512xf32> to vector<16x512xbf16>
      %c0_17 = arith.constant 0 : index
      %c0_18 = arith.constant 0 : index
      %26 = vector.load %arg5[%c0_17, %c0_18] : memref<512x128xbf16, #tpu.memory_space<vmem>>, vector<512x128xbf16>
      %cst_19 = arith.constant dense<0.000000e+00> : vector<16x128xf32>
      %27 = tpu.matmul %25, %26, %cst_19 {dimension_numbers = #tpu.dot_dimension_numbers<[1], [0], [0], [1], [0, 0, 1, 1], [], []>} : vector<16x512xbf16>, vector<512x128xbf16>, vector<16x128xf32> -> vector<16x128xf32>
      %c0_20 = arith.constant 0 : index
      %c0_21 = arith.constant 0 : index
      %28 = vector.load %arg6[%c0_20, %c0_21] : memref<1x128xf32, #tpu.memory_space<vmem>>, vector<1x128xf32>
      %29 = vector.broadcast %28 : vector<1x128xf32> to vector<16x128xf32>
      %30 = arith.addf %27, %29 : vector<16x128xf32>
      %31 = tpu.iota {dimensions = array<i32: 1>} : vector<16x128xi32>
      %c8_i32 = arith.constant 8 : i32
      %32 = vector.broadcast %c8_i32 : i32 to vector<16x128xi32>
      %33 = arith.cmpi slt, %31, %32 : vector<16x128xi32>
      %cst_22 = arith.constant 0xFF800000 : f32
      %34 = vector.broadcast %cst_22 : f32 to vector<16x128xf32>
      %35 = arith.select %33, %30, %34 : vector<16x128xi1>, vector<16x128xf32>
      %cst_23 = arith.constant dense<0xFF800000> : vector<16xf32>
      %36 = vector.multi_reduction <maximumf>, %35, %cst_23 [1] : vector<16x128xf32> to vector<16xf32>
      %37 = vector.shape_cast %36 : vector<16xf32> to vector<16x1xf32>
      %38 = vector.broadcast %37 : vector<16x1xf32> to vector<16x128xf32>
      %39 = arith.subf %35, %38 : vector<16x128xf32>
      %40 = math.exp %39 : vector<16x128xf32>
      %cst_24 = arith.constant dense<0.000000e+00> : vector<16xf32>
      %41 = vector.multi_reduction <add>, %40, %cst_24 [1] : vector<16x128xf32> to vector<16xf32>
      %42 = vector.shape_cast %41 : vector<16xf32> to vector<16x1xf32>
      %43 = vector.broadcast %42 : vector<16x1xf32> to vector<16x128xf32>
      %44 = arith.divf %40, %43 : vector<16x128xf32>
      %45 = arith.select %33, %44, %30 : vector<16x128xi1>, vector<16x128xf32>
      %c0_25 = arith.constant 0 : index
      %c0_26 = arith.constant 0 : index
      %46 = vector.load %arg7[%c0_25, %c0_26] : memref<16x128xf32, #tpu.memory_space<vmem>>, vector<16x128xf32>
      tpu.vector_store %arg7[%c0_25, %c0_26], %45 {strides = array<i32>} : memref<16x128xf32, #tpu.memory_space<vmem>>, vector<16x128xf32>,
    } else {
    }
    return
  }
  func.func @transform_0(%arg0: i32, %arg1: i32) -> (i32, i32) {
    %c0_i32 = arith.constant 0 : i32
    return %arg0, %arg1 : i32, i32
  }
  func.func @transform_1(%arg0: i32, %arg1: i32) -> (i32, i32) {
    %c0_i32 = arith.constant 0 : i32
    %c0_i32_0 = arith.constant 0 : i32
    return %arg1, %c0_i32 : i32, i32
  }
  func.func @transform_2(%arg0: i32, %arg1: i32) -> (i32, i32) {
    %c0_i32 = arith.constant 0 : i32
    %c0_i32_0 = arith.constant 0 : i32
    %c0_i32_1 = arith.constant 0 : i32
    return %c0_i32, %c0_i32_0 : i32, i32
  }
  func.func @transform_3(%arg0: i32, %arg1: i32) -> (i32, i32) {
    %c0_i32 = arith.constant 0 : i32
    %c0_i32_0 = arith.constant 0 : i32
    %c0_i32_1 = arith.constant 0 : i32
    return %c0_i32, %c0_i32_0 : i32, i32
  }
  func.func @transform_4(%arg0: i32, %arg1: i32) -> (i32, i32) {
    %c0_i32 = arith.constant 0 : i32
    %c0_i32_0 = arith.constant 0 : i32
    %c0_i32_1 = arith.constant 0 : i32
    return %c0_i32, %c0_i32_0 : i32, i32
  }
  func.func @transform_5(%arg0: i32, %arg1: i32) -> (i32, i32) {
    %c0_i32 = arith.constant 0 : i32
    %c0_i32_0 = arith.constant 0 : i32
    return %arg0, %c0_i32 : i32, i32
  }
}

module attributes {stable_mosaic.version = 11 : i64} {
  func.func @actor_critic_kernel(%arg0: i32, %arg1: i32, %arg2: memref<16x1024xf32, #tpu.memory_space<vmem>>, %arg3: memref<1024x512xbf16, #tpu.memory_space<vmem>>, %arg4: memref<1x512xf32, #tpu.memory_space<vmem>>, %arg5: memref<512x128xbf16, #tpu.memory_space<vmem>>, %arg6: memref<1x128xf32, #tpu.memory_space<vmem>>, %arg7: memref<16x128xf32, #tpu.memory_space<vmem>>, %arg8: memref<16x512xf32, #tpu.memory_space<vmem>>) attributes {dimension_semantics = [#tpu.dimension_semantics<parallel>, #tpu.dimension_semantics<arbitrary>], iteration_bounds = array<i64: 1, 1>, scalar_prefetch = 0 : i64, scratch_operands = 1 : i64, tpu.core_type = #tpu.core_type<tc>, window_params = [{transform_indices = @transform_0, window_bounds = array<i64: 16, 1024>}, {transform_indices = @transform_1, window_bounds = array<i64: 1024, 512>}, {pipeline_mode = #tpu.pipeline_mode<synchronous>, transform_indices = @transform_2, window_bounds = array<i64: 1, 512>}, {pipeline_mode = #tpu.pipeline_mode<synchronous>, transform_indices = @transform_3, window_bounds = array<i64: 512, 128>}, {pipeline_mode = #tpu.pipeline_mode<synchronous>, transform_indices = @transform_4, window_bounds = array<i64: 1, 128>}, {transform_indices = @transform_5, window_bounds = array<i64: 16, 128>}]} {
    %c0_i32 = arith.constant 0 : i32
    %0 = arith.cmpi eq, %arg1, %c0_i32 : i32
    %1 = arith.extui %0 : i1 to i32
    %c0_i32_0 = arith.constant 0 : i32
    %2 = arith.cmpi ne, %1, %c0_i32_0 : i32
    scf.if %2 {
      %cst_10 = arith.constant 0.000000e+00 : f32
      %13 = vector.broadcast %cst_10 : f32 to vector<16x512xf32>
      %c0_11 = arith.constant 0 : index
      %c0_12 = arith.constant 0 : index
      %14 = vector.load %arg8[%c0_11, %c0_12] : memref<16x512xf32, #tpu.memory_space<vmem>>, vector<16x512xf32>
      tpu.vector_store %arg8[%c0_11, %c0_12], %13 {strides = array<i32>} : memref<16x512xf32, #tpu.memory_space<vmem>>, vector<16x512xf32>,
    } else {
    }
    %c0 = arith.constant 0 : index
    %c0_1 = arith.constant 0 : index
    %3 = vector.load %arg8[%c0, %c0_1] : memref<16x512xf32, #tpu.memory_space<vmem>>, vector<16x512xf32>
    %c0_2 = arith.constant 0 : index
    %c0_3 = arith.constant 0 : index
    %4 = vector.load %arg2[%c0_2, %c0_3] : memref<16x1024xf32, #tpu.memory_space<vmem>>, vector<16x1024xf32>
    %5 = arith.truncf %4 : vector<16x1024xf32> to vector<16x1024xbf16>
    %c0_4 = arith.constant 0 : index
    %c0_5 = arith.constant 0 : index
    %6 = vector.load %arg3[%c0_4, %c0_5] : memref<1024x512xbf16, #tpu.memory_space<vmem>>, vector<1024x512xbf16>
    %cst = arith.constant dense<0.000000e+00> : vector<16x512xf32>
    %7 = tpu.matmul %5, %6, %cst {dimension_numbers = #tpu.dot_dimension_numbers<[1], [0], [0], [1], [0, 0, 1, 1], [], []>} : vector<16x1024xbf16>, vector<1024x512xbf16>, vector<16x512xf32> -> vector<16x512xf32>
    %8 = arith.addf %3, %7 : vector<16x512xf32>
    %c0_6 = arith.constant 0 : index
    %c0_7 = arith.constant 0 : index
    %9 = vector.load %arg8[%c0_6, %c0_7] : memref<16x512xf32, #tpu.memory_space<vmem>>, vector<16x512xf32>
    tpu.vector_store %arg8[%c0_6, %c0_7], %8 {strides = array<i32>} : memref<16x512xf32, #tpu.memory_space<vmem>>, vector<16x512xf32>,
    %c0_i32_8 = arith.constant 0 : i32
    %10 = arith.cmpi eq, %arg1, %c0_i32_8 : i32
    %11 = arith.extui %10 : i1 to i32
    %c0_i32_9 = arith.constant 0 : i32
    %12 = arith.cmpi ne, %11, %c0_i32_9 : i32
    scf.if %12 {
      %c0_10 = arith.constant 0 : index
      %c0_11 = arith.constant 0 : index
      %13 = vector.load %arg8[%c0_10, %c0_11] : memref<16x512xf32, #tpu.memory_space<vmem>>, vector<16x512xf32>
      %c0_12 = arith.constant 0 : index
      %c0_13 = arith.constant 0 : index
      %14 = vector.load %arg4[%c0_12, %c0_13] : memref<1x512xf32, #tpu.memory_space<vmem>>, vector<1x512xf32>
      %15 = vector.broadcast %14 : vector<1x512xf32> to vector<16x512xf32>
      %16 = arith.addf %13, %15 : vector<16x512xf32>
      %cst_14 = arith.constant 0.000000e+00 : f32
      %17 = vector.broadcast %cst_14 : f32 to vector<16x512xf32>
      %18 = arith.cmpf ogt, %16, %17 : vector<16x512xf32>
      %cst_15 = arith.constant 0.000000e+00 : f32
      %19 = vector.broadcast %cst_15 : f32 to vector<16x512xf32>
      %20 = arith.minimumf %16, %19 : vector<16x512xf32>
      %21 = math.exp %20 : vector<16x512xf32>
      %cst_16 = arith.constant 1.000000e+00 : f32
      %22 = vector.broadcast %cst_16 : f32 to vector<16x512xf32>
      %23 = arith.subf %21, %22 : vector<16x512xf32>
      %24 = arith.select %18, %16, %23 : vector<16x512xi1>, vector<16x512xf32>
      %25 = arith.truncf %24 : vector<16x512xf32> to vector<16x512xbf16>
      %c0_17 = arith.constant 0 : index
      %c0_18 = arith.constant 0 : index
      %26 = vector.load %arg5[%c0_17, %c0_18] : memref<512x128xbf16, #tpu.memory_space<vmem>>, vector<512x128xbf16>
      %cst_19 = arith.constant dense<0.000000e+00> : vector<16x128xf32>
      %27 = tpu.matmul %25, %26, %cst_19 {dimension_numbers = #tpu.dot_dimension_numbers<[1], [0], [0], [1], [0, 0, 1, 1], [], []>} : vector<16x512xbf16>, vector<512x128xbf16>, vector<16x128xf32> -> vector<16x128xf32>
      %c0_20 = arith.constant 0 : index
      %c0_21 = arith.constant 0 : index
      %28 = vector.load %arg6[%c0_20, %c0_21] : memref<1x128xf32, #tpu.memory_space<vmem>>, vector<1x128xf32>
      %29 = vector.broadcast %28 : vector<1x128xf32> to vector<16x128xf32>
      %30 = arith.addf %27, %29 : vector<16x128xf32>
      %31 = tpu.iota {dimensions = array<i32: 1>} : vector<16x128xi32>
      %c8_i32 = arith.constant 8 : i32
      %32 = vector.broadcast %c8_i32 : i32 to vector<16x128xi32>
      %33 = arith.cmpi slt, %31, %32 : vector<16x128xi32>
      %cst_22 = arith.constant 0xFF800000 : f32
      %34 = vector.broadcast %cst_22 : f32 to vector<16x128xf32>
      %35 = arith.select %33, %30, %34 : vector<16x128xi1>, vector<16x128xf32>
      %cst_23 = arith.constant dense<0xFF800000> : vector<16xf32>
      %36 = vector.multi_reduction <maximumf>, %35, %cst_23 [1] : vector<16x128xf32> to vector<16xf32>
      %37 = vector.shape_cast %36 : vector<16xf32> to vector<16x1xf32>
      %38 = vector.broadcast %37 : vector<16x1xf32> to vector<16x128xf32>
      %39 = arith.subf %35, %38 : vector<16x128xf32>
      %40 = math.exp %39 : vector<16x128xf32>
      %cst_24 = arith.constant dense<0.000000e+00> : vector<16xf32>
      %41 = vector.multi_reduction <add>, %40, %cst_24 [1] : vector<16x128xf32> to vector<16xf32>
      %42 = vector.shape_cast %41 : vector<16xf32> to vector<16x1xf32>
      %43 = vector.broadcast %42 : vector<16x1xf32> to vector<16x128xf32>
      %44 = arith.divf %40, %43 : vector<16x128xf32>
      %45 = arith.select %33, %44, %30 : vector<16x128xi1>, vector<16x128xf32>
      %c0_25 = arith.constant 0 : index
      %c0_26 = arith.constant 0 : index
      %46 = vector.load %arg7[%c0_25, %c0_26] : memref<16x128xf32, #tpu.memory_space<vmem>>, vector<16x128xf32>
      tpu.vector_store %arg7[%c0_25, %c0_26], %45 {strides = array<i32>} : memref<16x128xf32, #tpu.memory_space<vmem>>, vector<16x128xf32>,
    } else {
    }
    return
  }
  func.func @transform_0(%arg0: i32, %arg1: i32) -> (i32, i32) {
    %c0_i32 = arith.constant 0 : i32
    return %arg0, %arg1 : i32, i32
  }
  func.func @transform_1(%arg0: i32, %arg1: i32) -> (i32, i32) {
    %c0_i32 = arith.constant 0 : i32
    %c0_i32_0 = arith.constant 0 : i32
    return %arg1, %c0_i32 : i32, i32
  }
  func.func @transform_2(%arg0: i32, %arg1: i32) -> (i32, i32) {
    %c0_i32 = arith.constant 0 : i32
    %c0_i32_0 = arith.constant 0 : i32
    %c0_i32_1 = arith.constant 0 : i32
    return %c0_i32, %c0_i32_0 : i32, i32
  }
  func.func @transform_3(%arg0: i32, %arg1: i32) -> (i32, i32) {
    %c0_i32 = arith.constant 0 : i32
    %c0_i32_0 = arith.constant 0 : i32
    %c0_i32_1 = arith.constant 0 : i32
    return %c0_i32, %c0_i32_0 : i32, i32
  }
  func.func @transform_4(%arg0: i32, %arg1: i32) -> (i32, i32) {
    %c0_i32 = arith.constant 0 : i32
    %c0_i32_0 = arith.constant 0 : i32
    %c0_i32_1 = arith.constant 0 : i32
    return %c0_i32, %c0_i32_0 : i32, i32
  }
  func.func @transform_5(%arg0: i32, %arg1: i32) -> (i32, i32) {
    %c0_i32 = arith.constant 0 : i32
    %c0_i32_0 = arith.constant 0 : i32
    return %arg0, %c0_i32 : i32, i32
  }
}

</mosaic_0001>

<bundles_post_ra>
// kernel: tpu_custom_call.1
= control target key start
LH: loop header
LB: loop body
LE: loop exit
PB: predicated region body
PF: predicated region fallthrough
CT: control target
= control target key end

     0   :  { %10 = vsyncpa [#allocation4], 0  ;;  %s3766_s0 = inlined_call_operand.hbm [shape: f32[2,1024], index: 0, kind: input, shape index: {}]   ;;  %s3767_s1 = inlined_call_operand.hbm [shape: bf16[1024,512], index: 1, kind: input, shape index: {}]   ;;  %s3768_s2 = inlined_call_operand.hbm [shape: f32[1,512], index: 2, kind: input, shape index: {}]   ;;  %s3769_s3 = inlined_call_operand.hbm [shape: bf16[512,128], index: 3, kind: input, shape index: {}]   ;;  %s3770_s4 = inlined_call_operand.vmem [shape: f32[1,128], index: 4, kind: input, shape index: {}]   ;;  %s3771_s5 = inlined_call_operand.hbm [shape: f32[2,128], index: 5, kind: output, shape index: {}]  }
   0x1   :  { %11 = vsyncpa [#allocation7], 0 }
   0x2   :  { %12 = vsyncpa [#allocation10], 0 }
   0x3   :  { %13 = vsyncpa [#allocation5], 0 }
   0x4   :  { %18 = vsyncadd [#allocation4], 1792  ;;  %s3600_s18 = smov [#allocation6]   ;;  %s3601_s20 = smov [#allocation3]  }
   0x5   :  { %s31_s19 = sshll.u32 %s3600_s18, 4  ;;  %s19_s21 = sshll.u32 %s3601_s20, 4  ;;  %s32_s19 = int_to_ptr.vmem [resolvable:$true] %s31_s19  ;;  %s20_s21 = int_to_ptr.vmem [resolvable:$true] %s19_s21 }
   0x6   :  { %s3500_s22 = scalar_lea.vmem %s32_s19, 32768  ;;  %p3505_p1 = scmp.lt.s32.totalorder %s32_s19, %s32_s19 }
   0x7   :  { %p3501_p0 = scmp.ne.s32.totalorder %s32_s19, %s3500_s22  ;;  %p3506_p2 = scmp.lt.s32.totalorder %s3500_s22, %s3500_s22 }
   0x9   :  { %p3507_p3 = por %p3506_p2, %p3505_p1 }
   0xb   :  { %p3508_p4 = pnand %p3507_p3, %p3501_p0 }
   0xd   :  { %3511 = shalt.err (!%p3508_p4)
}
   0xe   :  { %s3602_s23 = smov 256   ;;  %s3603_s24 = smov 16  }
   0xf   :  { %37 = dma.hbm_to_vmem [thread:$0]  %s3767_s1, 32768, %s32_s19, [#allocation7], %s3602_s23, %s3602_s23, %s3603_s24  }
  0x10   :  { %s3520_s27 = scalar_lea.vmem %s20_s21, 256  ;;  %s3524_s28 = scalar_lea.vmem %s20_s21, 2048 }
  0x11   :  { %p3521_p5 = scmp.ne.s32.totalorder %s20_s21, %s3520_s27  ;;  %p3525_p6 = scmp.lt.s32.totalorder %s20_s21, %s20_s21 }
  0x12   :  { %p3526_p7 = scmp.lt.s32.totalorder %s3524_s28, %s3520_s27 }
  0x14   :  { %p3527_p8 = por %p3526_p7, %p3525_p6 }
  0x16   :  { %p3528_p9 = pnand %p3527_p8, %p3521_p5 }
  0x18   :  { %3531 = shalt.err (!%p3528_p9)
}
  0x19   :  { %25 = dma.hbm_to_vmem [thread:$0]  %s3766_s0, 256, %s20_s21, [#allocation4], %s3602_s23, %s3602_s23, %s3603_s24  }
  0x1a   :  { %s3604_s6 = smov [#allocation8]   ;;  %s3605_s8 = smov [#allocation9]  }
  0x1b   :  { %s44_s7 = sshll.u32 %s3604_s6, 4  ;;  %s53_s9 = sshll.u32 %s3605_s8, 4  ;;  %s45_s7 = int_to_ptr.vmem [resolvable:$true] %s44_s7  ;;  %s54_s9 = int_to_ptr.vmem [resolvable:$true] %s53_s9 }
  0x1c   :  { %s3540_s10 = scalar_lea.vmem %s45_s7, 64  ;;  %p3545_p11 = scmp.lt.s32.totalorder %s45_s7, %s45_s7 }
  0x1d   :  { %p3541_p10 = scmp.ne.s32.totalorder %s45_s7, %s3540_s10  ;;  %p3546_p12 = scmp.lt.s32.totalorder %s3540_s10, %s3540_s10 }
  0x1f   :  { %p3547_p13 = por %p3546_p12, %p3545_p11 }
  0x21   :  { %p3548_p0 = pnand %p3547_p13, %p3541_p10 }
  0x23   :  { %3551 = shalt.err (!%p3548_p0)
}
  0x24   :  { %47 = dma.hbm_to_vmem [thread:$0]  %s3768_s2, 64, %s45_s7, [#allocation7]  }
  0x25   :  { %s3560_s12 = scalar_lea.vmem %s54_s9, 4096  ;;  %p3565_p2 = scmp.lt.s32.totalorder %s54_s9, %s54_s9 }
  0x26   :  { %p3561_p1 = scmp.ne.s32.totalorder %s54_s9, %s3560_s12  ;;  %p3566_p3 = scmp.lt.s32.totalorder %s3560_s12, %s3560_s12 }
  0x28   :  { %p3567_p4 = por %p3566_p3, %p3565_p2 }
  0x2a   :  { %p3568_p5 = pnand %p3567_p4, %p3561_p1 }
  0x2c   :  { %3571 = shalt.err (!%p3568_p5)
}
  0x2d   :  { %s3606_s0 = smov 64   ;;  %s3607_s13 = smov 4  }
  0x2e   :  { %59 = dma.hbm_to_vmem [thread:$0]  %s3769_s3, 4096, %s54_s9, [#allocation10], %s3606_s0, %s3606_s0, %s3607_s13  }
  0x2f   :  { %3592 = dma.done.wait [#allocation4], 2048  }
  0x30   :  { %3593 = vsyncadd [#allocation4], 4294965248 }
  0x31   :  { %3594 = dma.done.wait [#allocation7], 32832  }
  0x32   :  { %3595 = vsyncadd [#allocation7], 4294934464 }
  0x33   :  { %3596 = dma.done.wait [#allocation10], 4096  }
  0x34   :  { %3597 = vsyncadd [#allocation10], 4294963200  ;;  %v3028_v0 = vld [vmem:[#allocation6 + $0xe4] ss:$16 sps:$4 sm:$0xff]   ;;  %v3032_v2 = vld [vmem:[#allocation6 + $0xe0] ss:$16 sps:$4 sm:$0xff]   ;;  %v134_v41 = vlaneseq }
  0x35   :  { %v3030_v1 = vld [vmem:[#allocation6 + $0x2e4] ss:$16 sps:$4 sm:$0xff]   ;;  %1831 = vmatprep.subr.bf16.mxu0 %v3028_v0  ;;  %v3033_v3 = vld [vmem:[#allocation6 + $0x2e0] ss:$16 sps:$4 sm:$0xff]   ;;  %v3608_v39 = vmov 1983009808  }
  0x36   :  { %1874 = vmatprep.subr.bf16.mxu1 %v3030_v1  ;;  %v3034_v4 = vld [vmem:[#allocation6 + $0xc4] ss:$16 sps:$4 sm:$0xff]   ;;  %1832 = vmatpush1.bf16.msra.mxu0 %v3032_v2  ;;  %v3038_v6 = vld [vmem:[#allocation6 + $0xc0] ss:$16 sps:$4 sm:$0xff]   ;;  %v132_v40 = vunpack.c.l.s4 %v3608_v39  ;;  %v3655_v48 = vshrl.u32 %v134_v41, 7 }
  0x37   :  { %1875 = vmatpush1.bf16.msra.mxu1 %v3033_v3  ;;  %v3036_v5 = vld [vmem:[#allocation6 + $0x2c4] ss:$16 sps:$4 sm:$0xff]   ;;  %1833 = vmatprep.subr.bf16.mxu0 %v3034_v4  ;;  %v3039_v7 = vld [vmem:[#allocation6 + $0x2c0] ss:$16 sps:$4 sm:$0xff]  }
  0x38   :  { %1876 = vmatprep.subr.bf16.mxu1 %v3036_v5  ;;  %v3040_v8 = vld [vmem:[#allocation6 + $0xa4] ss:$16 sps:$4 sm:$0xff]   ;;  %v3044_v10 = vld [vmem:[#allocation6 + $0xa0] ss:$16 sps:$4 sm:$0xff]   ;;  %v133_v47 = vunpack.c.0.s8 %v132_v40 }
  0x39   :  { %v3042_v9 = vld [vmem:[#allocation6 + $0x2a4] ss:$16 sps:$4 sm:$0xff]   ;;  %v3045_v11 = vld [vmem:[#allocation6 + $0x2a0] ss:$16 sps:$4 sm:$0xff]  }
  0x3a   :  { %1834 = vmatpush1.bf16.msra.mxu0 %v3038_v6  ;;  %v3046_v12 = vld [vmem:[#allocation6 + $0x84] ss:$16 sps:$4 sm:$0xff]   ;;  %v3050_v14 = vld [vmem:[#allocation6 + $0x80] ss:$16 sps:$4 sm:$0xff]   ;;  %v3658_v55 = vsub.s32 %v133_v47, %v3655_v48 }
  0x3b   :  { %1877 = vmatpush1.bf16.msra.mxu1 %v3039_v7  ;;  %1835 = vmatprep.subr.bf16.mxu0 %v3040_v8  ;;  %v3048_v13 = vld [vmem:[#allocation6 + $0x284] ss:$16 sps:$4 sm:$0xff]   ;;  %v3051_v15 = vld [vmem:[#allocation6 + $0x280] ss:$16 sps:$4 sm:$0xff]  }
  0x3c   :  { %1878 = vmatprep.subr.bf16.mxu1 %v3042_v9  ;;  %v3052_v16 = vld [vmem:[#allocation6 + $0x64] ss:$16 sps:$4 sm:$0xff]   ;;  %v3056_v18 = vld [vmem:[#allocation6 + $0x60] ss:$16 sps:$4 sm:$0xff]  }
  0x3d   :  { %v3054_v17 = vld [vmem:[#allocation6 + $0x264] ss:$16 sps:$4 sm:$0xff]   ;;  %v3057_v19 = vld [vmem:[#allocation6 + $0x260] ss:$16 sps:$4 sm:$0xff]  }
  0x3e   :  { %1836 = vmatpush1.bf16.msra.mxu0 %v3044_v10  ;;  %v3058_v20 = vld [vmem:[#allocation6 + $0x44] ss:$16 sps:$4 sm:$0xff]   ;;  %v3062_v22 = vld [vmem:[#allocation6 + $0x40] ss:$16 sps:$4 sm:$0xff]  }
  0x3f   :  { %1879 = vmatpush1.bf16.msra.mxu1 %v3045_v11  ;;  %1837 = vmatprep.subr.bf16.mxu0 %v3046_v12  ;;  %v3060_v21 = vld [vmem:[#allocation6 + $0x244] ss:$16 sps:$4 sm:$0xff]   ;;  %v3063_v23 = vld [vmem:[#allocation6 + $0x240] ss:$16 sps:$4 sm:$0xff]  }
  0x40   :  { %1880 = vmatprep.subr.bf16.mxu1 %v3048_v13  ;;  %v3064_v24 = vld [vmem:[#allocation6 + $0x24] ss:$16 sps:$4 sm:$0xff]   ;;  %v3068_v26 = vld [vmem:[#allocation6 + $0x20] ss:$16 sps:$4 sm:$0xff]  }
  0x41   :  { %v3066_v25 = vld [vmem:[#allocation6 + $0x224] ss:$16 sps:$4 sm:$0xff]   ;;  %v3069_v27 = vld [vmem:[#allocation6 + $0x220] ss:$16 sps:$4 sm:$0xff]  }
  0x42   :  { %1838 = vmatpush1.bf16.msra.mxu0 %v3050_v14  ;;  %v3070_v28 = vld [vmem:[#allocation6 + $0x4] ss:$16 sps:$4 sm:$0xff]   ;;  %v3074_v30 = vld [vmem:[#allocation6] ss:$16 sps:$4 sm:$0xff]  }
  0x43   :  { %1881 = vmatpush1.bf16.msra.mxu1 %v3051_v15  ;;  %1839 = vmatprep.subr.bf16.mxu0 %v3052_v16  ;;  %v3072_v29 = vld [vmem:[#allocation6 + $0x204] ss:$16 sps:$4 sm:$0xff]   ;;  %v3075_v31 = vld [vmem:[#allocation6 + $0x200] ss:$16 sps:$4 sm:$0xff]  }
  0x44   :  { %1882 = vmatprep.subr.bf16.mxu1 %v3054_v17  ;;  %v3076_v32 = vld [vmem:[#allocation6 + $0x1e4] ss:$16 sps:$4 sm:$0xff]   ;;  %v3080_v34 = vld [vmem:[#allocation6 + $0x1e0] ss:$16 sps:$4 sm:$0xff]  }
  0x45   :  { %v3078_v33 = vld [vmem:[#allocation6 + $0x3e4] ss:$16 sps:$4 sm:$0xff]   ;;  %v3081_v35 = vld [vmem:[#allocation6 + $0x3e0] ss:$16 sps:$4 sm:$0xff]  }
  0x46   :  { %1840 = vmatpush1.bf16.msra.mxu0 %v3056_v18  ;;  %v3082_v36 = vld [vmem:[#allocation6 + $0x1c4] ss:$16 sps:$4 sm:$0xff]   ;;  %v3086_v38 = vld [vmem:[#allocation6 + $0x1c0] ss:$16 sps:$4 sm:$0xff]  }
  0x47   :  { %1883 = vmatpush1.bf16.msra.mxu1 %v3057_v19  ;;  %1841 = vmatprep.subr.bf16.mxu0 %v3058_v20  ;;  %v3084_v37 = vld [vmem:[#allocation6 + $0x3c4] ss:$16 sps:$4 sm:$0xff]   ;;  %v3087_v42 = vld [vmem:[#allocation6 + $0x3c0] ss:$16 sps:$4 sm:$0xff]  }
  0x48   :  { %1884 = vmatprep.subr.bf16.mxu1 %v3060_v21  ;;  %v3088_v43 = vld [vmem:[#allocation6 + $0x1a4] ss:$16 sps:$4 sm:$0xff]   ;;  %v3092_v45 = vld [vmem:[#allocation6 + $0x1a0] ss:$16 sps:$4 sm:$0xff]  }
  0x49   :  { %v3090_v44 = vld [vmem:[#allocation6 + $0x3a4] ss:$16 sps:$4 sm:$0xff]   ;;  %v3093_v46 = vld [vmem:[#allocation6 + $0x3a0] ss:$16 sps:$4 sm:$0xff]  }
  0x4a   :  { %1842 = vmatpush1.bf16.msra.mxu0 %v3062_v22  ;;  %v3094_v49 = vld [vmem:[#allocation6 + $0x184] ss:$16 sps:$4 sm:$0xff]   ;;  %v3098_v51 = vld [vmem:[#allocation6 + $0x180] ss:$16 sps:$4 sm:$0xff]  }
  0x4b   :  { %1885 = vmatpush1.bf16.msra.mxu1 %v3063_v23  ;;  %1843 = vmatprep.subr.bf16.mxu0 %v3064_v24  ;;  %v3096_v50 = vld [vmem:[#allocation6 + $0x384] ss:$16 sps:$4 sm:$0xff]   ;;  %v3099_v52 = vld [vmem:[#allocation6 + $0x380] ss:$16 sps:$4 sm:$0xff]  }
  0x4c   :  { %1886 = vmatprep.subr.bf16.mxu1 %v3066_v25  ;;  %v3100_v53 = vld [vmem:[#allocation6 + $0x164] ss:$16 sps:$4 sm:$0xff]   ;;  %v3124_v56 = vld [vmem:[#allocation3] ss:$16 sps:$4 sm:$0xff]  }
  0x4d   :  { %v3102_v54 = vld [vmem:[#allocation6 + $0x364] ss:$16 sps:$4 sm:$0xff]   ;;  %v3126_v57 = vld [vmem:[#allocation3 + $0x20] ss:$16 sps:$4 sm:$0xff]   ;;  %v137_v63 = vrot.slane %v3124_v56, %v3658_v55 }
  0x4e   :  { %1844 = vmatpush1.bf16.msra.mxu0 %v3068_v26  ;;  %v3104_v58 = vld [vmem:[#allocation6 + $0x160] ss:$16 sps:$4 sm:$0xff]   ;;  %v3132_v62 = vld [vmem:[#allocation3 + $0x4] ss:$16 sps:$4 sm:$0xff]   ;;  %v151_v0 = vrot.slane %v3126_v57, %v3658_v55 }
  0x4f   :  { %1887 = vmatpush1.bf16.msra.mxu1 %v3069_v27  ;;  %1845 = vmatprep.subr.bf16.mxu0 %v3070_v28  ;;  %v3105_v59 = vld [vmem:[#allocation6 + $0x360] ss:$16 sps:$4 sm:$0xff]   ;;  %v3133_v1 = vld [vmem:[#allocation3 + $0x24] ss:$16 sps:$4 sm:$0xff]   ;;  %v144_v7 = vrot.slane %v3132_v62, %v3658_v55 }
  0x50   :  { %1888 = vmatprep.subr.bf16.mxu1 %v3072_v29  ;;  %v3128_v60 = vld [vmem:[#allocation3 + $0x40] ss:$16 sps:$4 sm:$0xff]   ;;  %v3134_v2 = vld [vmem:[#allocation3 + $0x44] ss:$16 sps:$4 sm:$0xff]   ;;  %v160_v9 = vcombine.high %v137_v63, %v151_v0  ;;  %v158_v10 = vrot.slane %v3133_v1, %v3658_v55  ;;  %v159_v28 = vcombine.low %v137_v63, %v151_v0 }
  0x51   :  { %v3130_v61 = vld [vmem:[#allocation3 + $0x60] ss:$16 sps:$4 sm:$0xff]   ;;  %v3135_v3 = vld [vmem:[#allocation3 + $0x64] ss:$16 sps:$4 sm:$0xff]   ;;  %v209_v5 = vrot.slane %v3128_v60, %v3658_v55  ;;  %v216_v11 = vrot.slane %v3134_v2, %v3658_v55 }
  0x52   :  { %1846 = vmatpush1.bf16.msra.mxu0 %v3074_v30  ;;  %v3106_v4 = vld [vmem:[#allocation6 + $0x144] ss:$16 sps:$4 sm:$0xff]   ;;  %v223_v6 = vrot.slane %v3130_v61, %v3658_v55  ;;  %v230_v13 = vrot.slane %v3135_v3, %v3658_v55  ;;  %v3110_v14 = vld [vmem:[#allocation6 + $0x140] ss:$16 sps:$4 sm:$0xff]   ;;  %v162_v16 = vcombine.high %v144_v7, %v158_v10  ;;  %v161_v30 = vcombine.low %v144_v7, %v158_v10  ;;  %v3232_v7 = vld [vmem:[#allocation3 + $0x8] ss:$16 sps:$4 sm:$0xff]  }
  0x53   :  { %1889 = vmatpush1.bf16.msra.mxu1 %v3075_v31  ;;  %1847 = vmatprep.subr.bf16.mxu0 %v3076_v32  ;;  %v3108_v8 = vld [vmem:[#allocation6 + $0x344] ss:$16 sps:$4 sm:$0xff]   ;;  %v3111_v15 = vld [vmem:[#allocation6 + $0x340] ss:$16 sps:$4 sm:$0xff]  }
  0x54   :  { %1890 = vmatprep.subr.bf16.mxu1 %v3078_v33  ;;  %v232_v12 = vcombine.high %v209_v5, %v223_v6  ;;  %v3112_v17 = vld [vmem:[#allocation6 + $0x124] ss:$16 sps:$4 sm:$0xff]   ;;  %v234_v19 = vcombine.high %v216_v11, %v230_v13  ;;  %v3116_v22 = vld [vmem:[#allocation6 + $0x120] ss:$16 sps:$4 sm:$0xff]   ;;  %v231_v29 = vcombine.low %v209_v5, %v223_v6  ;;  %v233_v31 = vcombine.low %v216_v11, %v230_v13  ;;  %v3236_v11 = vld [vmem:[#allocation3 + $0x48] ss:$16 sps:$4 sm:$0xff]  }
  0x55   :  { %v3114_v20 = vld [vmem:[#allocation6 + $0x324] ss:$16 sps:$4 sm:$0xff]   ;;  %v3117_v23 = vld [vmem:[#allocation6 + $0x320] ss:$16 sps:$4 sm:$0xff]   ;;  %v3240_v13 = vld [vmem:[#allocation3 + $0xc] ss:$16 sps:$4 sm:$0xff]  }
  0x56   :  { %1848 = vmatpush2.bf16.msra.mxu0 %v3080_v34  ;;  %v3668_v18 = vpack.c.bf16 %v232_v12, %v160_v9  ;;  %v3671_v21 = vpack.c.bf16 %v234_v19, %v162_v16  ;;  %v3118_v24 = vld [vmem:[#allocation6 + $0x104] ss:$16 sps:$4 sm:$0xff]   ;;  %v3122_v26 = vld [vmem:[#allocation6 + $0x100] ss:$16 sps:$4 sm:$0xff]   ;;  %v3674_v34 = vpack.c.bf16 %v231_v29, %v159_v28  ;;  %v3238_v12 = vld [vmem:[#allocation3 + $0x68] ss:$16 sps:$4 sm:$0xff]  }
  0x57   :  { %1891 = vmatpush2.bf16.msra.mxu1 %v3081_v35  ;;  %1849 = vmatprep.subr.bf16.mxu0 %v3082_v36  ;;  %v3120_v25 = vld [vmem:[#allocation6 + $0x304] ss:$16 sps:$4 sm:$0xff]   ;;  %v3123_v27 = vld [vmem:[#allocation6 + $0x300] ss:$16 sps:$4 sm:$0xff]   ;;  %v3676_v35 = vpack.c.bf16 %v233_v31, %v161_v30  ;;  %v3241_v16 = vld [vmem:[#allocation3 + $0x2c] ss:$16 sps:$4 sm:$0xff]  }
  0x58   :  { %1892 = vmatprep.subr.bf16.mxu1 %v3084_v37  ;;  %1863 = vmatprep.mubr.bf16.mxu0 %v3668_v18  ;;  %v3138_v32 = vld [vmem:[#allocation6 + $0x4e4] ss:$16 sps:$4 sm:$0xff]   ;;  %v3136_v36 = vld [vmem:[#allocation6 + $0x4e0] ss:$16 sps:$4 sm:$0xff]   ;;  %v3243_v19 = vld [vmem:[#allocation3 + $0x6c] ss:$16 sps:$4 sm:$0xff]  }
  0x59   :  { %1906 = vmatprep.mubr.bf16.mxu1 %v3671_v21  ;;  %v3141_v33 = vld [vmem:[#allocation6 + $0x6e4] ss:$16 sps:$4 sm:$0xff]   ;;  %v3139_v37 = vld [vmem:[#allocation6 + $0x6e0] ss:$16 sps:$4 sm:$0xff]   ;;  %v3706_v30 = vrot.slane %v3243_v19, %v3658_v55  ;;  %v3259_v19 = vld [vmem:[#allocation6 + $0x2a8] ss:$16 sps:$4 sm:$0xff]  }
  0x5a   :  { %1850 = vmatpush2.bf16.msra.mxu0 %v3086_v38  ;;  %v3144_v38 = vld [vmem:[#allocation6 + $0x4c4] ss:$16 sps:$4 sm:$0xff]   ;;  %v3142_v40 = vld [vmem:[#allocation6 + $0x4c0] ss:$16 sps:$4 sm:$0xff]  }
  0x5b   :  { %1893 = vmatpush2.bf16.msra.mxu1 %v3087_v42  ;;  %1851 = vmatprep.subr.bf16.mxu0 %v3088_v43  ;;  %v3147_v39 = vld [vmem:[#allocation6 + $0x6c4] ss:$16 sps:$4 sm:$0xff]   ;;  %v3145_v42 = vld [vmem:[#allocation6 + $0x6c0] ss:$16 sps:$4 sm:$0xff]  }
  0x5c   :  { %1894 = vmatprep.subr.bf16.mxu1 %v3090_v44  ;;  %v3150_v43 = vld [vmem:[#allocation6 + $0x4a4] ss:$16 sps:$4 sm:$0xff]   ;;  %v3163_v56 = vld [vmem:[#allocation6 + $0x660] ss:$16 sps:$4 sm:$0xff]  }
  0x5d   :  { %v3153_v44 = vld [vmem:[#allocation6 + $0x6a4] ss:$16 sps:$4 sm:$0xff]   ;;  %v3169_v60 = vld [vmem:[#allocation6 + $0x640] ss:$16 sps:$4 sm:$0xff]  }
  0x5e   :  { %1852 = vmatpush2.bf16.msra.mxu0 %v3092_v45  ;;  %v3148_v45 = vld [vmem:[#allocation6 + $0x4a0] ss:$16 sps:$4 sm:$0xff]   ;;  %v3156_v47 = vld [vmem:[#allocation6 + $0x484] ss:$16 sps:$4 sm:$0xff]  }
  0x5f   :  { %1895 = vmatpush2.bf16.msra.mxu1 %v3093_v46  ;;  %1853 = vmatprep.subr.bf16.mxu0 %v3094_v49  ;;  %v3151_v46 = vld [vmem:[#allocation6 + $0x6a0] ss:$16 sps:$4 sm:$0xff]   ;;  %v3159_v49 = vld [vmem:[#allocation6 + $0x684] ss:$16 sps:$4 sm:$0xff]  }
  0x60   :  { %1896 = vmatprep.subr.bf16.mxu1 %v3096_v50  ;;  %v3154_v50 = vld [vmem:[#allocation6 + $0x480] ss:$16 sps:$4 sm:$0xff]   ;;  %v3168_v57 = vld [vmem:[#allocation6 + $0x444] ss:$16 sps:$4 sm:$0xff]  }
  0x61   :  { %v3174_v61 = vld [vmem:[#allocation6 + $0x424] ss:$16 sps:$4 sm:$0xff]   ;;  %v3172_v63 = vld [vmem:[#allocation6 + $0x420] ss:$16 sps:$4 sm:$0xff]  }
  0x62   :  { %1854 = vmatpush2.bf16.msra.mxu0 %v3098_v51  ;;  %v3157_v51 = vld [vmem:[#allocation6 + $0x680] ss:$16 sps:$4 sm:$0xff]   ;;  %v3177_v62 = vld [vmem:[#allocation6 + $0x624] ss:$16 sps:$4 sm:$0xff]  }
  0x63   :  { %1897 = vmatpush2.bf16.msra.mxu1 %v3099_v52  ;;  %1855 = vmatprep.subr.bf16.mxu0 %v3100_v53  ;;  %v3162_v52 = vld [vmem:[#allocation6 + $0x464] ss:$16 sps:$4 sm:$0xff]   ;;  %v3175_v0 = vld [vmem:[#allocation6 + $0x620] ss:$16 sps:$4 sm:$0xff]  }
  0x64   :  { %1898 = vmatprep.subr.bf16.mxu1 %v3102_v54  ;;  %v3165_v53 = vld [vmem:[#allocation6 + $0x664] ss:$16 sps:$4 sm:$0xff]   ;;  %v3160_v54 = vld [vmem:[#allocation6 + $0x460] ss:$16 sps:$4 sm:$0xff]  }
  0x65   :  { %v3180_v1 = vld [vmem:[#allocation6 + $0x404] ss:$16 sps:$4 sm:$0xff]   ;;  %v3178_v3 = vld [vmem:[#allocation6 + $0x400] ss:$16 sps:$4 sm:$0xff]  }
  0x66   :  { %1856 = vmatpush2.bf16.msra.mxu0 %v3104_v58  ;;  %v3171_v58 = vld [vmem:[#allocation6 + $0x644] ss:$16 sps:$4 sm:$0xff]   ;;  %v3184_v9 = vld [vmem:[#allocation6 + $0x5e0] ss:$16 sps:$4 sm:$0xff]  }
  0x67   :  { %1899 = vmatpush2.bf16.msra.mxu1 %v3105_v59  ;;  %1857 = vmatprep.subr.bf16.mxu0 %v3106_v4  ;;  %v3166_v59 = vld [vmem:[#allocation6 + $0x440] ss:$16 sps:$4 sm:$0xff]   ;;  %v3183_v2 = vld [vmem:[#allocation6 + $0x604] ss:$16 sps:$4 sm:$0xff]  }
  0x68   :  { %1900 = vmatprep.subr.bf16.mxu1 %v3108_v8  ;;  %v3181_v4 = vld [vmem:[#allocation6 + $0x600] ss:$16 sps:$4 sm:$0xff]   ;;  %v3186_v5 = vld [vmem:[#allocation6 + $0x5e4] ss:$16 sps:$4 sm:$0xff]   ;;  %v3234_v8 = vld [vmem:[#allocation3 + $0x28] ss:$16 sps:$4 sm:$0xff]  }
  0x69   :  { %v3189_v6 = vld [vmem:[#allocation6 + $0x7e4] ss:$16 sps:$4 sm:$0xff]   ;;  %v3187_v10 = vld [vmem:[#allocation6 + $0x7e0] ss:$16 sps:$4 sm:$0xff]  }
  0x6a   :  { %1858 = vmatpush2.bf16.msra.mxu0 %v3110_v14  ;;  %v3681_v14 = vrot.slane %v3232_v7, %v3658_v55  ;;  %v3190_v31 = vld [vmem:[#allocation6 + $0x5c0] ss:$16 sps:$4 sm:$0xff]  }
  0x6b   :  { %1901 = vmatpush2.bf16.msra.mxu1 %v3111_v15  ;;  %1859 = vmatprep.subr.bf16.mxu0 %v3112_v17  ;;  %v3684_v15 = vrot.slane %v3234_v8, %v3658_v55  ;;  %v3242_v17 = vld [vmem:[#allocation3 + $0x4c] ss:$16 sps:$4 sm:$0xff]  }
  0x6c   :  { %1902 = vmatprep.subr.bf16.mxu1 %v3114_v20  ;;  %v3192_v20 = vld [vmem:[#allocation6 + $0x5c4] ss:$16 sps:$4 sm:$0xff]   ;;  %v3701_v28 = vrot.slane %v3242_v17, %v3658_v55  ;;  %v3256_v17 = vld [vmem:[#allocation6 + $0xa8] ss:$16 sps:$4 sm:$0xff]  }
  0x6e   :  { %1860 = vmatpush2.bf16.msra.mxu0 %v3116_v22  ;;  %v3687_v22 = vrot.slane %v3236_v11, %v3658_v55  ;;  %v3252_v11 = vld [vmem:[#allocation6 + $0xcc] ss:$16 sps:$4 sm:$0xff]  }
  0x6f   :  { %1903 = vmatpush2.bf16.msra.mxu1 %v3117_v23  ;;  %1861 = vmatprep.subr.bf16.mxu0 %v3118_v24  ;;  %v3690_v23 = vrot.slane %v3238_v12, %v3658_v55  ;;  %v3693_v24 = vrot.slane %v3240_v13, %v3658_v55  ;;  %v3255_v12 = vld [vmem:[#allocation6 + $0x2cc] ss:$16 sps:$4 sm:$0xff]   ;;  %v3250_v13 = vld [vmem:[#allocation6 + $0xc8] ss:$16 sps:$4 sm:$0xff]  }
  0x70   :  { %1904 = vmatprep.subr.bf16.mxu1 %v3120_v25  ;;  %v3195_v25 = vld [vmem:[#allocation6 + $0x7c4] ss:$16 sps:$4 sm:$0xff]  }
  0x71   :  { %v268_v29 = vcombine.high %v3687_v22, %v3690_v23 }
  0x72   :  { %1862 = vmatpush2.bf16.msra.mxu0 %v3122_v26  ;;  %v196_v26 = vcombine.high %v3681_v14, %v3684_v15 }
  0x73   :  { %1905 = vmatpush2.bf16.msra.mxu1 %v3123_v27  ;;  %1917 = vmatprep.subr.bf16.mxu0 %v3138_v32  ;;  %v3698_v27 = vrot.slane %v3241_v16, %v3658_v55  ;;  %v3193_v32 = vld [vmem:[#allocation6 + $0x7c0] ss:$16 sps:$4 sm:$0xff]   ;;  %v3261_v16 = vld [vmem:[#allocation6 + $0x2ac] ss:$16 sps:$4 sm:$0xff]  }
  0x74   :  { %1960 = vmatprep.subr.bf16.mxu1 %v3141_v33 }
  0x75   :  { %1864 = vmatmul.mubr.bf16.vlgmr.msra.gmra.mxu0 %v3674_v34  ;;  %v198_v33 = vcombine.high %v3693_v24, %v3698_v27 }
  0x76   :  { %1907 = vmatmul.mubr.bf16.vlgmr.msra.gmra.mxu1 %v3676_v35  ;;  %1918 = vmatpush1.bf16.msra.mxu0 %v3136_v36  ;;  %v3198_v36 = vld [vmem:[#allocation6 + $0x5a4] ss:$16 sps:$4 sm:$0xff]  }
  0x77   :  { %1961 = vmatpush1.bf16.msra.mxu1 %v3139_v37  ;;  %1919 = vmatprep.subr.bf16.mxu0 %v3144_v38  ;;  %v3710_v37 = vpack.c.bf16 %v268_v29, %v196_v26  ;;  %v270_v38 = vcombine.high %v3701_v28, %v3706_v30  ;;  %v3273_v26 = vld [vmem:[#allocation6 + $0x26c] ss:$16 sps:$4 sm:$0xff]   ;;  %v3274_v29 = vld [vmem:[#allocation6 + $0x48] ss:$16 sps:$4 sm:$0xff]  }
  0x78   :  { %1962 = vmatprep.subr.bf16.mxu1 %v3147_v39  ;;  %v3201_v39 = vld [vmem:[#allocation6 + $0x7a4] ss:$16 sps:$4 sm:$0xff]  }
  0x79   :  { %1949 = vmatprep.mubr.bf16.mxu0 %v3710_v37  ;;  %v3715_v55 = vpack.c.bf16 %v270_v38, %v198_v33  ;;  %v3280_v33 = vld [vmem:[#allocation6 + $0x28] ss:$16 sps:$4 sm:$0xff]   ;;  %v3288_v38 = vld [vmem:[#allocation6 + $0xc] ss:$16 sps:$4 sm:$0xff]  }
  0x7a   :  { %1920 = vmatpush1.bf16.msra.mxu0 %v3142_v40  ;;  %v3196_v40 = vld [vmem:[#allocation6 + $0x5a0] ss:$16 sps:$4 sm:$0xff]  }
  0x7b   :  { %1963 = vmatpush1.bf16.msra.mxu1 %v3145_v42  ;;  %1921 = vmatprep.subr.bf16.mxu0 %v3150_v43  ;;  %v3199_v42 = vld [vmem:[#allocation6 + $0x7a0] ss:$16 sps:$4 sm:$0xff]   ;;  %v3204_v43 = vld [vmem:[#allocation6 + $0x584] ss:$16 sps:$4 sm:$0xff]  }
  0x7c   :  { %1964 = vmatprep.subr.bf16.mxu1 %v3153_v44  ;;  %v3207_v44 = vld [vmem:[#allocation6 + $0x784] ss:$16 sps:$4 sm:$0xff]   ;;  %1992 = vmatprep.mubr.bf16.mxu1 %v3715_v55 }
  0x7e   :  { %1922 = vmatpush1.bf16.msra.mxu0 %v3148_v45  ;;  %v3202_v45 = vld [vmem:[#allocation6 + $0x580] ss:$16 sps:$4 sm:$0xff]  }
  0x7f   :  { %1965 = vmatpush1.bf16.msra.mxu1 %v3151_v46  ;;  %1923 = vmatprep.subr.bf16.mxu0 %v3156_v47  ;;  %v3205_v46 = vld [vmem:[#allocation6 + $0x780] ss:$16 sps:$4 sm:$0xff]   ;;  %v3210_v47 = vld [vmem:[#allocation6 + $0x564] ss:$16 sps:$4 sm:$0xff]  }
  0x80   :  { %1966 = vmatprep.subr.bf16.mxu1 %v3159_v49  ;;  %v3213_v49 = vld [vmem:[#allocation6 + $0x764] ss:$16 sps:$4 sm:$0xff]  }
  0x82   :  { %1924 = vmatpush1.bf16.msra.mxu0 %v3154_v50  ;;  %v3208_v50 = vld [vmem:[#allocation6 + $0x560] ss:$16 sps:$4 sm:$0xff]  }
  0x83   :  { %1967 = vmatpush1.bf16.msra.mxu1 %v3157_v51  ;;  %1925 = vmatprep.subr.bf16.mxu0 %v3162_v52  ;;  %v3211_v51 = vld [vmem:[#allocation6 + $0x760] ss:$16 sps:$4 sm:$0xff]   ;;  %v3216_v52 = vld [vmem:[#allocation6 + $0x544] ss:$16 sps:$4 sm:$0xff]  }
  0x84   :  { %1968 = vmatprep.subr.bf16.mxu1 %v3165_v53  ;;  %v3219_v53 = vld [vmem:[#allocation6 + $0x744] ss:$16 sps:$4 sm:$0xff]  }
  0x86   :  { %1926 = vmatpush1.bf16.msra.mxu0 %v3160_v54  ;;  %v3214_v54 = vld [vmem:[#allocation6 + $0x540] ss:$16 sps:$4 sm:$0xff]  }
  0x87   :  { %1969 = vmatpush1.bf16.msra.mxu1 %v3163_v56  ;;  %1927 = vmatprep.subr.bf16.mxu0 %v3168_v57  ;;  %v3217_v56 = vld [vmem:[#allocation6 + $0x740] ss:$16 sps:$4 sm:$0xff]   ;;  %v3222_v57 = vld [vmem:[#allocation6 + $0x524] ss:$16 sps:$4 sm:$0xff]  }
  0x88   :  { %1970 = vmatprep.subr.bf16.mxu1 %v3171_v58  ;;  %v3225_v58 = vld [vmem:[#allocation6 + $0x724] ss:$16 sps:$4 sm:$0xff]  }
  0x8a   :  { %1928 = vmatpush1.bf16.msra.mxu0 %v3166_v59  ;;  %v3220_v59 = vld [vmem:[#allocation6 + $0x520] ss:$16 sps:$4 sm:$0xff]  }
  0x8b   :  { %1971 = vmatpush1.bf16.msra.mxu1 %v3169_v60  ;;  %1929 = vmatprep.subr.bf16.mxu0 %v3174_v61  ;;  %v3223_v60 = vld [vmem:[#allocation6 + $0x720] ss:$16 sps:$4 sm:$0xff]   ;;  %v3228_v61 = vld [vmem:[#allocation6 + $0x504] ss:$16 sps:$4 sm:$0xff]  }
  0x8c   :  { %1972 = vmatprep.subr.bf16.mxu1 %v3177_v62  ;;  %v3231_v62 = vld [vmem:[#allocation6 + $0x704] ss:$16 sps:$4 sm:$0xff]  }
  0x8e   :  { %1930 = vmatpush1.bf16.msra.mxu0 %v3172_v63  ;;  %v3226_v63 = vld [vmem:[#allocation6 + $0x500] ss:$16 sps:$4 sm:$0xff]  }
  0x8f   :  { %1973 = vmatpush1.bf16.msra.mxu1 %v3175_v0  ;;  %1931 = vmatprep.subr.bf16.mxu0 %v3180_v1  ;;  %v3229_v0 = vld [vmem:[#allocation6 + $0x700] ss:$16 sps:$4 sm:$0xff]   ;;  %v195_v1 = vcombine.low %v3681_v14, %v3684_v15  ;;  %v3253_v14 = vld [vmem:[#allocation6 + $0x2c8] ss:$16 sps:$4 sm:$0xff]   ;;  %v3258_v15 = vld [vmem:[#allocation6 + $0xac] ss:$16 sps:$4 sm:$0xff]  }
  0x90   :  { %1974 = vmatprep.subr.bf16.mxu1 %v3183_v2  ;;  %v267_v2 = vcombine.low %v3687_v22, %v3690_v23  ;;  %v3267_v22 = vld [vmem:[#allocation6 + $0x28c] ss:$16 sps:$4 sm:$0xff]   ;;  %v3262_v23 = vld [vmem:[#allocation6 + $0x88] ss:$16 sps:$4 sm:$0xff]  }
  0x92   :  { %1932 = vmatpush1.bf16.msra.mxu0 %v3178_v3  ;;  %v197_v3 = vcombine.low %v3693_v24, %v3698_v27  ;;  %v3726_v7 = vpack.c.bf16 %v267_v2, %v195_v1  ;;  %v3265_v24 = vld [vmem:[#allocation6 + $0x288] ss:$16 sps:$4 sm:$0xff]   ;;  %v3324_v1 = vld [vmem:[#allocation6 + $0x14c] ss:$16 sps:$4 sm:$0xff]  }
  0x93   :  { %1975 = vmatpush1.bf16.msra.mxu1 %v3181_v4  ;;  %1933 = vmatprep.subr.bf16.mxu0 %v3186_v5  ;;  %v269_v4 = vcombine.low %v3701_v28, %v3706_v30  ;;  %v3246_v5 = vld [vmem:[#allocation6 + $0xec] ss:$16 sps:$4 sm:$0xff]   ;;  %v3268_v27 = vld [vmem:[#allocation6 + $0x68] ss:$16 sps:$4 sm:$0xff]  }
  0x94   :  { %1976 = vmatprep.subr.bf16.mxu1 %v3189_v6  ;;  %v3249_v6 = vld [vmem:[#allocation6 + $0x2ec] ss:$16 sps:$4 sm:$0xff]   ;;  %v3277_v30 = vld [vmem:[#allocation6 + $0x248] ss:$16 sps:$4 sm:$0xff]  }
  0x95   :  { %v3728_v8 = vpack.c.bf16 %v269_v4, %v197_v3  ;;  %v3279_v28 = vld [vmem:[#allocation6 + $0x24c] ss:$16 sps:$4 sm:$0xff]   ;;  %v3322_v3 = vld [vmem:[#allocation6 + $0x148] ss:$16 sps:$4 sm:$0xff]  }
  0x96   :  { %1934 = vmatpush2.bf16.msra.mxu0 %v3184_v9  ;;  %v3244_v9 = vld [vmem:[#allocation6 + $0xe8] ss:$16 sps:$4 sm:$0xff]   ;;  %v3327_v2 = vld [vmem:[#allocation6 + $0x34c] ss:$16 sps:$4 sm:$0xff]  }
  0x97   :  { %1977 = vmatpush2.bf16.msra.mxu1 %v3187_v10  ;;  %1935 = vmatprep.subr.bf16.mxu0 %v3192_v20  ;;  %v3247_v10 = vld [vmem:[#allocation6 + $0x2e8] ss:$16 sps:$4 sm:$0xff]   ;;  %v3264_v20 = vld [vmem:[#allocation6 + $0x8c] ss:$16 sps:$4 sm:$0xff]  }
  0x98   :  { %1978 = vmatprep.subr.bf16.mxu1 %v3195_v25  ;;  %v3270_v25 = vld [vmem:[#allocation6 + $0x6c] ss:$16 sps:$4 sm:$0xff]   ;;  %v3325_v4 = vld [vmem:[#allocation6 + $0x348] ss:$16 sps:$4 sm:$0xff]  }
  0x9a   :  { %1936 = vmatpush2.bf16.msra.mxu0 %v3190_v31  ;;  %v3282_v31 = vld [vmem:[#allocation6 + $0x2c] ss:$16 sps:$4 sm:$0xff]  }
  0x9b   :  { %1979 = vmatpush2.bf16.msra.mxu1 %v3193_v32  ;;  %1937 = vmatprep.subr.bf16.mxu0 %v3198_v36  ;;  %v3285_v32 = vld [vmem:[#allocation6 + $0x22c] ss:$16 sps:$4 sm:$0xff]   ;;  %v3283_v36 = vld [vmem:[#allocation6 + $0x228] ss:$16 sps:$4 sm:$0xff]  }
  0x9c   :  { %1980 = vmatprep.subr.bf16.mxu1 %v3201_v39  ;;  %v3291_v39 = vld [vmem:[#allocation6 + $0x20c] ss:$16 sps:$4 sm:$0xff]  }
  0x9e   :  { %1938 = vmatpush2.bf16.msra.mxu0 %v3196_v40  ;;  %v3286_v40 = vld [vmem:[#allocation6 + $0x8] ss:$16 sps:$4 sm:$0xff]  }
  0x9f   :  { %1981 = vmatpush2.bf16.msra.mxu1 %v3199_v42  ;;  %1939 = vmatprep.subr.bf16.mxu0 %v3204_v43  ;;  %v3289_v42 = vld [vmem:[#allocation6 + $0x208] ss:$16 sps:$4 sm:$0xff]   ;;  %v3294_v43 = vld [vmem:[#allocation6 + $0x1ec] ss:$16 sps:$4 sm:$0xff]  }
  0xa0   :  { %1982 = vmatprep.subr.bf16.mxu1 %v3207_v44  ;;  %v3297_v44 = vld [vmem:[#allocation6 + $0x3ec] ss:$16 sps:$4 sm:$0xff]  }
  0xa2   :  { %1940 = vmatpush2.bf16.msra.mxu0 %v3202_v45  ;;  %v3292_v45 = vld [vmem:[#allocation6 + $0x1e8] ss:$16 sps:$4 sm:$0xff]  }
  0xa3   :  { %1983 = vmatpush2.bf16.msra.mxu1 %v3205_v46  ;;  %1941 = vmatprep.subr.bf16.mxu0 %v3210_v47  ;;  %v3295_v46 = vld [vmem:[#allocation6 + $0x3e8] ss:$16 sps:$4 sm:$0xff]   ;;  %v3300_v47 = vld [vmem:[#allocation6 + $0x1cc] ss:$16 sps:$4 sm:$0xff]  }
  0xa4   :  { %1984 = vmatprep.subr.bf16.mxu1 %v3213_v49  ;;  %v3303_v49 = vld [vmem:[#allocation6 + $0x3cc] ss:$16 sps:$4 sm:$0xff]  }
  0xa6   :  { %1942 = vmatpush2.bf16.msra.mxu0 %v3208_v50  ;;  %v3298_v50 = vld [vmem:[#allocation6 + $0x1c8] ss:$16 sps:$4 sm:$0xff]  }
  0xa7   :  { %1985 = vmatpush2.bf16.msra.mxu1 %v3211_v51  ;;  %1943 = vmatprep.subr.bf16.mxu0 %v3216_v52  ;;  %v3301_v51 = vld [vmem:[#allocation6 + $0x3c8] ss:$16 sps:$4 sm:$0xff]   ;;  %v3306_v52 = vld [vmem:[#allocation6 + $0x1ac] ss:$16 sps:$4 sm:$0xff]  }
  0xa8   :  { %1986 = vmatprep.subr.bf16.mxu1 %v3219_v53  ;;  %v3309_v53 = vld [vmem:[#allocation6 + $0x3ac] ss:$16 sps:$4 sm:$0xff]  }
  0xaa   :  { %1944 = vmatpush2.bf16.msra.mxu0 %v3214_v54  ;;  %v3304_v54 = vld [vmem:[#allocation6 + $0x1a8] ss:$16 sps:$4 sm:$0xff]  }
  0xab   :  { %1987 = vmatpush2.bf16.msra.mxu1 %v3217_v56  ;;  %1945 = vmatprep.subr.bf16.mxu0 %v3222_v57  ;;  %v3307_v56 = vld [vmem:[#allocation6 + $0x3a8] ss:$16 sps:$4 sm:$0xff]   ;;  %v3312_v57 = vld [vmem:[#allocation6 + $0x18c] ss:$16 sps:$4 sm:$0xff]  }
  0xac   :  { %1988 = vmatprep.subr.bf16.mxu1 %v3225_v58  ;;  %v3315_v58 = vld [vmem:[#allocation6 + $0x38c] ss:$16 sps:$4 sm:$0xff]  }
  0xae   :  { %1946 = vmatpush2.bf16.msra.mxu0 %v3220_v59  ;;  %v3310_v59 = vld [vmem:[#allocation6 + $0x188] ss:$16 sps:$4 sm:$0xff]  }
  0xaf   :  { %1989 = vmatpush2.bf16.msra.mxu1 %v3223_v60  ;;  %1947 = vmatprep.subr.bf16.mxu0 %v3228_v61  ;;  %v3313_v60 = vld [vmem:[#allocation6 + $0x388] ss:$16 sps:$4 sm:$0xff]   ;;  %v3318_v61 = vld [vmem:[#allocation6 + $0x16c] ss:$16 sps:$4 sm:$0xff]  }
  0xb0   :  { %1990 = vmatprep.subr.bf16.mxu1 %v3231_v62  ;;  %v3321_v62 = vld [vmem:[#allocation6 + $0x36c] ss:$16 sps:$4 sm:$0xff]  }
  0xb2   :  { %1948 = vmatpush2.bf16.msra.mxu0 %v3226_v63  ;;  %v3316_v63 = vld [vmem:[#allocation6 + $0x168] ss:$16 sps:$4 sm:$0xff]  }
  0xb3   :  { %1991 = vmatpush2.bf16.msra.mxu1 %v3229_v0  ;;  %2003 = vmatprep.subr.bf16.mxu0 %v3246_v5  ;;  %v3319_v0 = vld [vmem:[#allocation6 + $0x368] ss:$16 sps:$4 sm:$0xff]   ;;  %v3330_v5 = vld [vmem:[#allocation6 + $0x12c] ss:$16 sps:$4 sm:$0xff]  }
  0xb4   :  { %2046 = vmatprep.subr.bf16.mxu1 %v3249_v6  ;;  %v3333_v6 = vld [vmem:[#allocation6 + $0x32c] ss:$16 sps:$4 sm:$0xff]  }
  0xb5   :  { %1950 = vmatmul.mubr.bf16.vlgmr.msra.gmra.mxu0 %v3726_v7 }
  0xb6   :  { %1993 = vmatmul.mubr.bf16.vlgmr.msra.gmra.mxu1 %v3728_v8  ;;  %2004 = vmatpush1.bf16.msra.mxu0 %v3244_v9  ;;  %v3328_v9 = vld [vmem:[#allocation6 + $0x128] ss:$16 sps:$4 sm:$0xff]  }
  0xb7   :  { %2047 = vmatpush1.bf16.msra.mxu1 %v3247_v10  ;;  %2005 = vmatprep.subr.bf16.mxu0 %v3252_v11  ;;  %v3331_v10 = vld [vmem:[#allocation6 + $0x328] ss:$16 sps:$4 sm:$0xff]   ;;  %v3336_v11 = vld [vmem:[#allocation6 + $0x10c] ss:$16 sps:$4 sm:$0xff]  }
  0xb8   :  { %2048 = vmatprep.subr.bf16.mxu1 %v3255_v12  ;;  %2035 = vmatprep.mubr.bf16.mxu0 %v3668_v18  ;;  %v3271_v18 = vld [vmem:[#allocation6 + $0x268] ss:$16 sps:$4 sm:$0xff]   ;;  %v3339_v12 = vld [vmem:[#allocation6 + $0x30c] ss:$16 sps:$4 sm:$0xff]  }
  0xb9   :  { %2078 = vmatprep.mubr.bf16.mxu1 %v3671_v21  ;;  %v3276_v21 = vld [vmem:[#allocation6 + $0x4c] ss:$16 sps:$4 sm:$0xff]  }
  0xba   :  { %2006 = vmatpush1.bf16.msra.mxu0 %v3250_v13  ;;  %v3334_v13 = vld [vmem:[#allocation6 + $0x108] ss:$16 sps:$4 sm:$0xff]  }
  0xbb   :  { %2049 = vmatpush1.bf16.msra.mxu1 %v3253_v14  ;;  %2007 = vmatprep.subr.bf16.mxu0 %v3258_v15  ;;  %v3337_v14 = vld [vmem:[#allocation6 + $0x308] ss:$16 sps:$4 sm:$0xff]   ;;  %v3342_v15 = vld [vmem:[#allocation6 + $0x4ec] ss:$16 sps:$4 sm:$0xff]  }
  0xbc   :  { %2050 = vmatprep.subr.bf16.mxu1 %v3261_v16  ;;  %v3345_v16 = vld [vmem:[#allocation6 + $0x6ec] ss:$16 sps:$4 sm:$0xff]  }
  0xbe   :  { %2008 = vmatpush1.bf16.msra.mxu0 %v3256_v17  ;;  %v3340_v17 = vld [vmem:[#allocation6 + $0x4e8] ss:$16 sps:$4 sm:$0xff]  }
  0xbf   :  { %2051 = vmatpush1.bf16.msra.mxu1 %v3259_v19  ;;  %2009 = vmatprep.subr.bf16.mxu0 %v3264_v20  ;;  %v3343_v19 = vld [vmem:[#allocation6 + $0x6e8] ss:$16 sps:$4 sm:$0xff]   ;;  %v3348_v20 = vld [vmem:[#allocation6 + $0x4cc] ss:$16 sps:$4 sm:$0xff]  }
  0xc0   :  { %2052 = vmatprep.subr.bf16.mxu1 %v3267_v22  ;;  %v3351_v22 = vld [vmem:[#allocation6 + $0x6cc] ss:$16 sps:$4 sm:$0xff]  }
  0xc2   :  { %2010 = vmatpush1.bf16.msra.mxu0 %v3262_v23  ;;  %v3346_v23 = vld [vmem:[#allocation6 + $0x4c8] ss:$16 sps:$4 sm:$0xff]  }
  0xc3   :  { %2053 = vmatpush1.bf16.msra.mxu1 %v3265_v24  ;;  %2011 = vmatprep.subr.bf16.mxu0 %v3270_v25  ;;  %v3349_v24 = vld [vmem:[#allocation6 + $0x6c8] ss:$16 sps:$4 sm:$0xff]   ;;  %v3354_v25 = vld [vmem:[#allocation6 + $0x4ac] ss:$16 sps:$4 sm:$0xff]  }
  0xc4   :  { %2054 = vmatprep.subr.bf16.mxu1 %v3273_v26  ;;  %v3357_v26 = vld [vmem:[#allocation6 + $0x6ac] ss:$16 sps:$4 sm:$0xff]  }
  0xc6   :  { %2012 = vmatpush1.bf16.msra.mxu0 %v3268_v27  ;;  %v3352_v27 = vld [vmem:[#allocation6 + $0x4a8] ss:$16 sps:$4 sm:$0xff]  }
  0xc7   :  { %2055 = vmatpush1.bf16.msra.mxu1 %v3271_v18  ;;  %2013 = vmatprep.subr.bf16.mxu0 %v3276_v21  ;;  %v3355_v18 = vld [vmem:[#allocation6 + $0x6a8] ss:$16 sps:$4 sm:$0xff]   ;;  %v3360_v21 = vld [vmem:[#allocation6 + $0x48c] ss:$16 sps:$4 sm:$0xff]  }
  0xc8   :  { %2056 = vmatprep.subr.bf16.mxu1 %v3279_v28  ;;  %v3363_v28 = vld [vmem:[#allocation6 + $0x68c] ss:$16 sps:$4 sm:$0xff]  }
  0xca   :  { %2014 = vmatpush1.bf16.msra.mxu0 %v3274_v29  ;;  %v3366_v29 = vld [vmem:[#allocation6 + $0x46c] ss:$16 sps:$4 sm:$0xff]  }
  0xcb   :  { %2057 = vmatpush1.bf16.msra.mxu1 %v3277_v30  ;;  %2015 = vmatprep.subr.bf16.mxu0 %v3282_v31  ;;  %v3369_v30 = vld [vmem:[#allocation6 + $0x66c] ss:$16 sps:$4 sm:$0xff]   ;;  %v3364_v31 = vld [vmem:[#allocation6 + $0x468] ss:$16 sps:$4 sm:$0xff]  }
  0xcc   :  { %2058 = vmatprep.subr.bf16.mxu1 %v3285_v32  ;;  %v3375_v32 = vld [vmem:[#allocation6 + $0x64c] ss:$16 sps:$4 sm:$0xff]  }
  0xce   :  { %2016 = vmatpush1.bf16.msra.mxu0 %v3280_v33  ;;  %v3370_v33 = vld [vmem:[#allocation6 + $0x448] ss:$16 sps:$4 sm:$0xff]  }
  0xcf   :  { %2059 = vmatpush1.bf16.msra.mxu1 %v3283_v36  ;;  %2017 = vmatprep.subr.bf16.mxu0 %v3288_v38  ;;  %v3373_v36 = vld [vmem:[#allocation6 + $0x648] ss:$16 sps:$4 sm:$0xff]   ;;  %v3378_v38 = vld [vmem:[#allocation6 + $0x42c] ss:$16 sps:$4 sm:$0xff]  }
  0xd0   :  { %2060 = vmatprep.subr.bf16.mxu1 %v3291_v39  ;;  %v3381_v39 = vld [vmem:[#allocation6 + $0x62c] ss:$16 sps:$4 sm:$0xff]  }
  0xd2   :  { %2018 = vmatpush1.bf16.msra.mxu0 %v3286_v40  ;;  %v3376_v40 = vld [vmem:[#allocation6 + $0x428] ss:$16 sps:$4 sm:$0xff]  }
  0xd3   :  { %2061 = vmatpush1.bf16.msra.mxu1 %v3289_v42  ;;  %2019 = vmatprep.subr.bf16.mxu0 %v3294_v43  ;;  %v3379_v42 = vld [vmem:[#allocation6 + $0x628] ss:$16 sps:$4 sm:$0xff]   ;;  %v3384_v43 = vld [vmem:[#allocation6 + $0x40c] ss:$16 sps:$4 sm:$0xff]  }
  0xd4   :  { %2062 = vmatprep.subr.bf16.mxu1 %v3297_v44  ;;  %v3387_v44 = vld [vmem:[#allocation6 + $0x60c] ss:$16 sps:$4 sm:$0xff]  }
  0xd6   :  { %2020 = vmatpush2.bf16.msra.mxu0 %v3292_v45  ;;  %v3382_v45 = vld [vmem:[#allocation6 + $0x408] ss:$16 sps:$4 sm:$0xff]  }
  0xd7   :  { %2063 = vmatpush2.bf16.msra.mxu1 %v3295_v46  ;;  %2021 = vmatprep.subr.bf16.mxu0 %v3300_v47  ;;  %v3385_v46 = vld [vmem:[#allocation6 + $0x608] ss:$16 sps:$4 sm:$0xff]   ;;  %v3390_v47 = vld [vmem:[#allocation6 + $0x5ec] ss:$16 sps:$4 sm:$0xff]  }
  0xd8   :  { %2064 = vmatprep.subr.bf16.mxu1 %v3303_v49  ;;  %v3393_v49 = vld [vmem:[#allocation6 + $0x7ec] ss:$16 sps:$4 sm:$0xff]  }
  0xda   :  { %2022 = vmatpush2.bf16.msra.mxu0 %v3298_v50  ;;  %v3388_v50 = vld [vmem:[#allocation6 + $0x5e8] ss:$16 sps:$4 sm:$0xff]  }
  0xdb   :  { %2065 = vmatpush2.bf16.msra.mxu1 %v3301_v51  ;;  %2023 = vmatprep.subr.bf16.mxu0 %v3306_v52  ;;  %v3391_v51 = vld [vmem:[#allocation6 + $0x7e8] ss:$16 sps:$4 sm:$0xff]   ;;  %v3396_v52 = vld [vmem:[#allocation6 + $0x5cc] ss:$16 sps:$4 sm:$0xff]  }
  0xdc   :  { %2066 = vmatprep.subr.bf16.mxu1 %v3309_v53  ;;  %v3399_v53 = vld [vmem:[#allocation6 + $0x7cc] ss:$16 sps:$4 sm:$0xff]  }
  0xde   :  { %2024 = vmatpush2.bf16.msra.mxu0 %v3304_v54  ;;  %v3394_v54 = vld [vmem:[#allocation6 + $0x5c8] ss:$16 sps:$4 sm:$0xff]  }
  0xdf   :  { %2067 = vmatpush2.bf16.msra.mxu1 %v3307_v56  ;;  %2025 = vmatprep.subr.bf16.mxu0 %v3312_v57  ;;  %v3397_v56 = vld [vmem:[#allocation6 + $0x7c8] ss:$16 sps:$4 sm:$0xff]   ;;  %v3402_v57 = vld [vmem:[#allocation6 + $0x5ac] ss:$16 sps:$4 sm:$0xff]  }
  0xe0   :  { %2068 = vmatprep.subr.bf16.mxu1 %v3315_v58  ;;  %v3405_v58 = vld [vmem:[#allocation6 + $0x7ac] ss:$16 sps:$4 sm:$0xff]  }
  0xe2   :  { %2026 = vmatpush2.bf16.msra.mxu0 %v3310_v59  ;;  %v3400_v59 = vld [vmem:[#allocation6 + $0x5a8] ss:$16 sps:$4 sm:$0xff]  }
  0xe3   :  { %2069 = vmatpush2.bf16.msra.mxu1 %v3313_v60  ;;  %2027 = vmatprep.subr.bf16.mxu0 %v3318_v61  ;;  %v3403_v60 = vld [vmem:[#allocation6 + $0x7a8] ss:$16 sps:$4 sm:$0xff]   ;;  %v3408_v61 = vld [vmem:[#allocation6 + $0x58c] ss:$16 sps:$4 sm:$0xff]  }
  0xe4   :  { %2070 = vmatprep.subr.bf16.mxu1 %v3321_v62  ;;  %v3411_v62 = vld [vmem:[#allocation6 + $0x78c] ss:$16 sps:$4 sm:$0xff]  }
  0xe6   :  { %2028 = vmatpush2.bf16.msra.mxu0 %v3316_v63  ;;  %v3406_v63 = vld [vmem:[#allocation6 + $0x588] ss:$16 sps:$4 sm:$0xff]  }
  0xe7   :  { %2071 = vmatpush2.bf16.msra.mxu1 %v3319_v0  ;;  %2029 = vmatprep.subr.bf16.mxu0 %v3324_v1  ;;  %v3409_v0 = vld [vmem:[#allocation6 + $0x788] ss:$16 sps:$4 sm:$0xff]   ;;  %v3414_v1 = vld [vmem:[#allocation6 + $0x56c] ss:$16 sps:$4 sm:$0xff]  }
  0xe8   :  { %2072 = vmatprep.subr.bf16.mxu1 %v3327_v2  ;;  %v3417_v2 = vld [vmem:[#allocation6 + $0x76c] ss:$16 sps:$4 sm:$0xff]  }
  0xea   :  { %2030 = vmatpush2.bf16.msra.mxu0 %v3322_v3  ;;  %v3412_v3 = vld [vmem:[#allocation6 + $0x568] ss:$16 sps:$4 sm:$0xff]  }
  0xeb   :  { %2073 = vmatpush2.bf16.msra.mxu1 %v3325_v4  ;;  %2031 = vmatprep.subr.bf16.mxu0 %v3330_v5  ;;  %v3415_v4 = vld [vmem:[#allocation6 + $0x768] ss:$16 sps:$4 sm:$0xff]   ;;  %v3420_v5 = vld [vmem:[#allocation6 + $0x54c] ss:$16 sps:$4 sm:$0xff]  }
  0xec   :  { %2074 = vmatprep.subr.bf16.mxu1 %v3333_v6  ;;  %v3423_v6 = vld [vmem:[#allocation6 + $0x74c] ss:$16 sps:$4 sm:$0xff]  }
  0xee   :  { %2032 = vmatpush2.bf16.msra.mxu0 %v3328_v9  ;;  %v3418_v9 = vld [vmem:[#allocation6 + $0x548] ss:$16 sps:$4 sm:$0xff]  }
  0xef   :  { %2075 = vmatpush2.bf16.msra.mxu1 %v3331_v10  ;;  %2033 = vmatprep.subr.bf16.mxu0 %v3336_v11  ;;  %v3421_v10 = vld [vmem:[#allocation6 + $0x748] ss:$16 sps:$4 sm:$0xff]   ;;  %v3426_v11 = vld [vmem:[#allocation6 + $0x52c] ss:$16 sps:$4 sm:$0xff]  }
  0xf0   :  { %2076 = vmatprep.subr.bf16.mxu1 %v3339_v12  ;;  %v3429_v12 = vld [vmem:[#allocation6 + $0x72c] ss:$16 sps:$4 sm:$0xff]  }
  0xf2   :  { %2034 = vmatpush2.bf16.msra.mxu0 %v3334_v13  ;;  %v3424_v13 = vld [vmem:[#allocation6 + $0x528] ss:$16 sps:$4 sm:$0xff]  }
  0xf3   :  { %2077 = vmatpush2.bf16.msra.mxu1 %v3337_v14  ;;  %2089 = vmatprep.subr.bf16.mxu0 %v3342_v15  ;;  %v3427_v14 = vld [vmem:[#allocation6 + $0x728] ss:$16 sps:$4 sm:$0xff]   ;;  %v3432_v15 = vld [vmem:[#allocation6 + $0x50c] ss:$16 sps:$4 sm:$0xff]  }
  0xf4   :  { %2132 = vmatprep.subr.bf16.mxu1 %v3345_v16  ;;  %v3435_v16 = vld [vmem:[#allocation6 + $0x70c] ss:$16 sps:$4 sm:$0xff]  }
  0xf5   :  { %2036 = vmatmul.mubr.bf16.vlgmr.msra.gmra.mxu0 %v3674_v34  ;;  %v3358_v34 = vld [vmem:[#allocation6 + $0x488] ss:$16 sps:$4 sm:$0xff]  }
  0xf6   :  { %2079 = vmatmul.mubr.bf16.vlgmr.msra.gmra.mxu1 %v3676_v35  ;;  %2090 = vmatpush1.bf16.msra.mxu0 %v3340_v17  ;;  %v3361_v35 = vld [vmem:[#allocation6 + $0x688] ss:$16 sps:$4 sm:$0xff]  }
  0xf7   :  { %2133 = vmatpush1.bf16.msra.mxu1 %v3343_v19  ;;  %2091 = vmatprep.subr.bf16.mxu0 %v3348_v20  ;;  %v3430_v17 = vld [vmem:[#allocation6 + $0x508] ss:$16 sps:$4 sm:$0xff]   ;;  %v3436_v20 = vld [vmem:[#allocation9 + $0x78] sm:$0xff]  }
  0xf8   :  { %2134 = vmatprep.subr.bf16.mxu1 %v3351_v22  ;;  %2121 = vmatprep.mubr.bf16.mxu0 %v3710_v37  ;;  %v3367_v37 = vld [vmem:[#allocation6 + $0x668] ss:$16 sps:$4 sm:$0xff]   ;;  %v3437_v22 = vld [vmem:[#allocation9 + $0x38] sm:$0xff]  }
  0xf9   :  { %2164 = vmatprep.mubr.bf16.mxu1 %v3715_v55  ;;  %v3372_v55 = vld [vmem:[#allocation6 + $0x44c] ss:$16 sps:$4 sm:$0xff]   ;;  %v3433_v19 = vld [vmem:[#allocation6 + $0x708] ss:$16 sps:$4 sm:$0xff]  }
  0xfa   :  { %2092 = vmatpush1.bf16.msra.mxu0 %v3346_v23  ;;  %v3438_v23 = vld [vmem:[#allocation9 + $0x70] sm:$0xff]  }
  0xfb   :  { %2135 = vmatpush1.bf16.msra.mxu1 %v3349_v24  ;;  %2093 = vmatprep.subr.bf16.mxu0 %v3354_v25  ;;  %v3439_v24 = vld [vmem:[#allocation9 + $0x30] sm:$0xff]   ;;  %v3440_v25 = vld [vmem:[#allocation9 + $0x68] sm:$0xff]  }
  0xfc   :  { %2136 = vmatprep.subr.bf16.mxu1 %v3357_v26  ;;  %v3441_v26 = vld [vmem:[#allocation9 + $0x28] sm:$0xff]  }
  0xfe   :  { %2094 = vmatpush1.bf16.msra.mxu0 %v3352_v27  ;;  %v3442_v27 = vld [vmem:[#allocation9 + $0x60] sm:$0xff]  }
  0xff   :  { %2137 = vmatpush1.bf16.msra.mxu1 %v3355_v18  ;;  %2095 = vmatprep.subr.bf16.mxu0 %v3360_v21  ;;  %v3443_v18 = vld [vmem:[#allocation9 + $0x20] sm:$0xff]   ;;  %v3444_v21 = vld [vmem:[#allocation9 + $0x58] sm:$0xff]  }
 0x100   :  { %2138 = vmatprep.subr.bf16.mxu1 %v3363_v28  ;;  %v3445_v28 = vld [vmem:[#allocation9 + $0x18] sm:$0xff]  }
 0x102   :  { %2096 = vmatpush1.bf16.msra.mxu0 %v3358_v34  ;;  %v3446_v34 = vld [vmem:[#allocation9 + $0x50] sm:$0xff]  }
 0x103   :  { %2139 = vmatpush1.bf16.msra.mxu1 %v3361_v35  ;;  %2097 = vmatprep.subr.bf16.mxu0 %v3366_v29  ;;  %v3449_v35 = vld [vmem:[#allocation9 + $0x8] sm:$0xff]   ;;  %v3450_v29 = vld [vmem:[#allocation9 + $0x40] sm:$0xff]  }
 0x104   :  { %2140 = vmatprep.subr.bf16.mxu1 %v3369_v30  ;;  %v3451_v30 = vld [vmem:[#allocation9] sm:$0xff]  }
 0x106   :  { %2098 = vmatpush1.bf16.msra.mxu0 %v3364_v31 }
 0x107   :  { %2141 = vmatpush1.bf16.msra.mxu1 %v3367_v37  ;;  %2099 = vmatprep.subr.bf16.mxu0 %v3372_v55 }
 0x108   :  { %2142 = vmatprep.subr.bf16.mxu1 %v3375_v32 }
 0x10a   :  { %2100 = vmatpush1.bf16.msra.mxu0 %v3370_v33 }
 0x10b   :  { %2143 = vmatpush1.bf16.msra.mxu1 %v3373_v36  ;;  %2101 = vmatprep.subr.bf16.mxu0 %v3378_v38  ;;  %v2206_v38 = vsub.s32 0, %v3655_v48 }
 0x10c   :  { %2144 = vmatprep.subr.bf16.mxu1 %v3381_v39 }
 0x10e   :  { %2102 = vmatpush1.bf16.msra.mxu0 %v3376_v40 }
 0x10f   :  { %2145 = vmatpush1.bf16.msra.mxu1 %v3379_v42  ;;  %2103 = vmatprep.subr.bf16.mxu0 %v3384_v43  ;;  %v3741_v42 = vld [vmem:[#allocation8] sm:$0xf] }
 0x110   :  { %2146 = vmatprep.subr.bf16.mxu1 %v3387_v44  ;;  %v2210_v44 = vsub.s32 1, %v3655_v48 }
 0x112   :  { %2104 = vmatpush1.bf16.msra.mxu0 %v3382_v45 }
 0x113   :  { %2147 = vmatpush1.bf16.msra.mxu1 %v3385_v46  ;;  %2105 = vmatprep.subr.bf16.mxu0 %v3390_v47 }
 0x114   :  { %2148 = vmatprep.subr.bf16.mxu1 %v3393_v49 }
 0x116   :  { %2106 = vmatpush2.bf16.msra.mxu0 %v3388_v50  ;;  %v2207_v50 = vrot.slane %v3741_v42, %v2206_v38 }
 0x117   :  { %2149 = vmatpush2.bf16.msra.mxu1 %v3391_v51  ;;  %2107 = vmatprep.subr.bf16.mxu0 %v3396_v52 }
 0x118   :  { %2150 = vmatprep.subr.bf16.mxu1 %v3399_v53 }
 0x11a   :  { %2108 = vmatpush2.bf16.msra.mxu0 %v3394_v54 }
 0x11b   :  { %2151 = vmatpush2.bf16.msra.mxu1 %v3397_v56  ;;  %2109 = vmatprep.subr.bf16.mxu0 %v3402_v57  ;;  %v2211_v57 = vrot.slane %v3741_v42, %v2210_v44 }
 0x11c   :  { %2152 = vmatprep.subr.bf16.mxu1 %v3405_v58 }
 0x11e   :  { %2110 = vmatpush2.bf16.msra.mxu0 %v3400_v59  ;;  %v3452_v59 = vld [vmem:[#allocation9 + $0xf8] sm:$0xff]  }
 0x11f   :  { %2153 = vmatpush2.bf16.msra.mxu1 %v3403_v60  ;;  %2111 = vmatprep.subr.bf16.mxu0 %v3408_v61 }
 0x120   :  { %2154 = vmatprep.subr.bf16.mxu1 %v3411_v62 }
 0x122   :  { %2112 = vmatpush2.bf16.msra.mxu0 %v3406_v63 }
 0x123   :  { %2155 = vmatpush2.bf16.msra.mxu1 %v3409_v0  ;;  %2113 = vmatprep.subr.bf16.mxu0 %v3414_v1  ;;  %v3453_v0 = vld [vmem:[#allocation9 + $0xb8] sm:$0xff]  }
 0x124   :  { %2156 = vmatprep.subr.bf16.mxu1 %v3417_v2 }
 0x126   :  { %2114 = vmatpush2.bf16.msra.mxu0 %v3412_v3 }
 0x127   :  { %2157 = vmatpush2.bf16.msra.mxu1 %v3415_v4  ;;  %2115 = vmatprep.subr.bf16.mxu0 %v3420_v5 }
 0x128   :  { %2158 = vmatprep.subr.bf16.mxu1 %v3423_v6 }
 0x12a   :  { %2116 = vmatpush2.bf16.msra.mxu0 %v3418_v9  ;;  %v3454_v9 = vld [vmem:[#allocation9 + $0xf0] sm:$0xff]  }
 0x12b   :  { %2159 = vmatpush2.bf16.msra.mxu1 %v3421_v10  ;;  %2117 = vmatprep.subr.bf16.mxu0 %v3426_v11 }
 0x12c   :  { %2160 = vmatprep.subr.bf16.mxu1 %v3429_v12 }
 0x12e   :  { %2118 = vmatpush2.bf16.msra.mxu0 %v3424_v13 }
 0x12f   :  { %2161 = vmatpush2.bf16.msra.mxu1 %v3427_v14  ;;  %2119 = vmatprep.subr.bf16.mxu0 %v3432_v15  ;;  %v3455_v14 = vld [vmem:[#allocation9 + $0xb0] sm:$0xff]  }
 0x130   :  { %2162 = vmatprep.subr.bf16.mxu1 %v3435_v16 }
 0x132   :  { %2120 = vmatpush2.bf16.msra.mxu0 %v3430_v17 }
 0x133   :  { %2163 = vmatpush2.bf16.msra.mxu1 %v3433_v19  ;;  %2972 = vmatprep.subr.bf16.mxu0 %v3436_v20  ;;  %v3456_v20 = vld [vmem:[#allocation9 + $0xe8] sm:$0xff]  }
 0x134   :  { %2994 = vmatprep.subr.bf16.mxu1 %v3452_v59  ;;  %v2218_v59 = vsub.s32 3, %v3655_v48 }
 0x135   :  { %2122 = vmatmul.mubr.bf16.vlgmr.msra.gmra.mxu0 %v3726_v7  ;;  %v3447_v7 = vld [vmem:[#allocation9 + $0x10] sm:$0xff]   ;;  %v1865_v31 = vpop.f32.mrf.mxu0 }
 0x136   :  { %2165 = vmatmul.mubr.bf16.vlgmr.msra.gmra.mxu1 %v3728_v8  ;;  %2973 = vmatpush3.bf16.msra.mxu0 %v3437_v22  ;;  %v3448_v8 = vld [vmem:[#allocation9 + $0x48] sm:$0xff]   ;;  %v1908_v37 = vpop.f32.mrf.mxu1 }
 0x137   :  { %2974 = vmatprep.subr.bf16.mxu0 %v3438_v23  ;;  %v1867_v55 = vpop.f32.mrf.mxu0  ;;  %v1909_v43 = vadd.f32 %v1908_v37, %v1865_v31  ;;  %2995 = vmatpush3.bf16.msra.mxu1 %v3453_v0  ;;  %v3457_v23 = vld [vmem:[#allocation9 + $0xa8] sm:$0xff]  }
 0x138   :  { %v1910_v32 = vpop.f32.mrf.mxu1  ;;  %2996 = vmatprep.subr.bf16.mxu1 %v3454_v9  ;;  %v3465_v31 = vld [vmem:[#allocation9 + $0x88] sm:$0xff]  }
 0x139   :  { %v1869_v33 = vpop.f32.mrf.mxu0  ;;  %v1911_v47 = vadd.f32 %v1910_v32, %v1867_v55 }
 0x13a   :  { %2975 = vmatpush3.bf16.msra.mxu0 %v3439_v24  ;;  %v1912_v36 = vpop.f32.mrf.mxu1 }
 0x13b   :  { %2976 = vmatprep.subr.bf16.mxu0 %v3440_v25  ;;  %v1871_v39 = vpop.f32.mrf.mxu0  ;;  %v1913_v53 = vadd.f32 %v1912_v36, %v1869_v33  ;;  %2997 = vmatpush3.bf16.msra.mxu1 %v3455_v14  ;;  %v3466_v33 = vld [vmem:[#allocation9 + $0xc0] sm:$0xff]  }
 0x13c   :  { %v1914_v40 = vpop.f32.mrf.mxu1  ;;  %2998 = vmatprep.subr.bf16.mxu1 %v3456_v20  ;;  %v3467_v36 = vld [vmem:[#allocation9 + $0x80] sm:$0xff]  }
 0x13d   :  { %v1915_v1 = vadd.f32 %v1914_v40, %v1871_v39 }
 0x13e   :  { %2977 = vmatpush3.bf16.msra.mxu0 %v3441_v26  ;;  %v3458_v26 = vld [vmem:[#allocation9 + $0xe0] sm:$0xff]  }
 0x13f   :  { %2978 = vmatprep.subr.bf16.mxu0 %v3442_v27  ;;  %2999 = vmatpush3.bf16.msra.mxu1 %v3457_v23  ;;  %v3459_v27 = vld [vmem:[#allocation9 + $0xa0] sm:$0xff]  }
 0x140   :  { %3000 = vmatprep.subr.bf16.mxu1 %v3458_v26 }
 0x142   :  { %2979 = vmatpush3.bf16.msra.mxu0 %v3443_v18  ;;  %v3460_v18 = vld [vmem:[#allocation9 + $0xd8] sm:$0xff]  }
 0x143   :  { %2980 = vmatprep.subr.bf16.mxu0 %v3444_v21  ;;  %3001 = vmatpush3.bf16.msra.mxu1 %v3459_v27  ;;  %v3461_v21 = vld [vmem:[#allocation9 + $0x98] sm:$0xff]  }
 0x144   :  { %3002 = vmatprep.subr.bf16.mxu1 %v3460_v18 }
 0x146   :  { %2981 = vmatpush3.bf16.msra.mxu0 %v3445_v28  ;;  %v3462_v28 = vld [vmem:[#allocation9 + $0xd0] sm:$0xff]  }
 0x147   :  { %2982 = vmatprep.subr.bf16.mxu0 %v3446_v34  ;;  %3003 = vmatpush3.bf16.msra.mxu1 %v3461_v21  ;;  %v3463_v34 = vld [vmem:[#allocation9 + $0x90] sm:$0xff]  }
 0x148   :  { %3004 = vmatprep.subr.bf16.mxu1 %v3462_v28 }
 0x14a   :  { %2983 = vmatpush3.bf16.msra.mxu0 %v3447_v7 }
 0x14b   :  { %2984 = vmatprep.subr.bf16.mxu0 %v3448_v8  ;;  %3005 = vmatpush3.bf16.msra.mxu1 %v3463_v34 }
 0x14e   :  { %2985 = vmatpush3.bf16.msra.mxu0 %v3449_v35 }
 0x14f   :  { %2986 = vmatprep.subr.bf16.mxu0 %v3450_v29  ;;  %v3464_v29 = vld [vmem:[#allocation9 + $0xc8] sm:$0xff]  }
 0x150   :  { %3006 = vmatprep.subr.bf16.mxu1 %v3464_v29 }
 0x151   :  { %3007 = vmatpush3.bf16.msra.mxu1 %v3465_v31 }
 0x152   :  { %2987 = vmatpush3.bf16.msra.mxu0 %v3451_v30  ;;  %3008 = vmatprep.subr.bf16.mxu1 %v3466_v33 }
 0x155   :  { %3009 = vmatpush3.bf16.msra.mxu1 %v3467_v36 }
 0x175   :  { %v1951_v45 = vpop.f32.mrf.mxu0 }
 0x176   :  { %v1994_v46 = vpop.f32.mrf.mxu1  ;;  %v1952_v49 = vadd.f32 %v1951_v45, %v1909_v43 }
 0x177   :  { %v1953_v51 = vpop.f32.mrf.mxu0 }
 0x178   :  { %v1996_v52 = vpop.f32.mrf.mxu1  ;;  %v1995_v54 = vadd.f32 %v1994_v46, %v1952_v49  ;;  %v1954_v56 = vadd.f32 %v1953_v51, %v1911_v47 }
 0x179   :  { %v1955_v58 = vpop.f32.mrf.mxu0 }
 0x17a   :  { %v3746_v60 = vadd.f32 %v2207_v50, %v1995_v54  ;;  %v1997_v61 = vadd.f32 %v1996_v52, %v1954_v56  ;;  %v1956_v62 = vadd.f32 %v1955_v58, %v1913_v53  ;;  %v1998_v63 = vpop.f32.mrf.mxu1  ;;  %v2214_v54 = vsub.s32 2, %v3655_v48 }
 0x17b   :  { %v1957_v2 = vpop.f32.mrf.mxu0 }
 0x17c   :  { %v2240_v3 = vmin.f32 %v3746_v60, 0.0  ;;  %v2225_v4 = vadd.f32 %v2211_v57, %v1997_v61  ;;  %v1999_v5 = vadd.f32 %v1998_v63, %v1956_v62  ;;  %v1958_v6 = vadd.f32 %v1957_v2, %v1915_v1  ;;  %v2000_v13 = vpop.f32.mrf.mxu1 }
 0x17d   :  { %vm2232_vm3 = vcmp.gt.f32.partialorder %v3746_v60, 0.0  ;;  %v2215_v0 = vrot.slane %v3741_v42, %v2214_v54 }
 0x17e   :  { %v2248_v10 = vmul.f32 1.442695, %v2240_v3  ;;  %v2241_v11 = vmin.f32 %v2225_v4, 0.0  ;;  %v2228_v12 = vadd.f32 %v2207_v50, %v1999_v5  ;;  %v2001_v15 = vadd.f32 %v2000_v13, %v1958_v6 }
 0x17f   :  { %vm2233_vm1 = vcmp.gt.f32.partialorder %v2225_v4, 0.0  ;;  %v2219_v6 = vrot.slane %v3741_v42, %v2218_v59 }
 0x180   :  { %v2250_v16 = vmul.f32 1.442695, %v2241_v11  ;;  %v2244_v17 = vmin.f32 %v2228_v12, 0.0  ;;  %v2229_v19 = vadd.f32 %v2211_v57, %v2001_v15  ;;  %3468 = vpow2.f32 %v2248_v10 }
 0x181   :  { %vm2236_vm0 = vcmp.gt.f32.partialorder %v2228_v12, 0.0 }
 0x182   :  { %v2256_v22 = vmul.f32 1.442695, %v2244_v17  ;;  %3470 = vpow2.f32 %v2250_v16  ;;  %v2245_v24 = vmin.f32 %v2229_v19, 0.0  ;;  %vm2237_vm2 = vcmp.gt.f32.partialorder %v2229_v19, 0.0 }
 0x184   :  { %3472 = vpow2.f32 %v2256_v22  ;;  %v2258_v25 = vmul.f32 1.442695, %v2245_v24 }
 0x186   :  { %3474 = vpow2.f32 %v2258_v25 }
 0x18d   :  { %v3469_v7 = vpop.eup %3468 }
 0x18e   :  { %v2931_v32 = vadd.f32 -1.0, %v3469_v7 }
 0x18f   :  { %v3471_v8 = vpop.eup %3470 }
 0x190   :  { %v2932_v37 = vadd.f32 -1.0, %v3471_v8  ;;  %v2272_v44 = vsel %vm2232_vm3, %v3746_v60, %v2931_v32 }
 0x191   :  { %v3473_v35 = vpop.eup %3472 }
 0x192   :  { %v2935_v30 = vadd.f32 -1.0, %v3473_v35  ;;  %v2273_v40 = vsel %vm2233_vm1, %v2225_v4, %v2932_v37 }
 0x193   :  { %v3475_v55 = vpop.eup %3474 }
 0x194   :  { %v2936_v38 = vadd.f32 -1.0, %v3475_v55  ;;  %v2276_v39 = vsel %vm2236_vm0, %v2228_v12, %v2935_v30 }
 0x195   :  { %v2280_v46 = vpack.c.bf16 %v2276_v39, %v2272_v44 }
 0x196   :  { %v2277_v43 = vsel %vm2237_vm2, %v2229_v19, %v2936_v38 }
 0x197   :  { %v2281_v45 = vpack.c.bf16 %v2277_v43, %v2273_v40 }
 0x199   :  { %2579 = vmatprep.mubr.bf16.mxu0 %v2281_v45 }
 0x19a   :  { %2580 = vmatmul.mubr.bf16.vlgmr.msra.gmra.mxu0 %v2280_v46  ;;  %v2939_v46 = vld [vmem:[%s3770_s4] ss:$0 sm:$0xff] }
 0x1b5   :  { %v2037_v47 = vpop.f32.mrf.mxu0 }
 0x1b6   :  { %v2080_v49 = vpop.f32.mrf.mxu1 }
 0x1b7   :  { %v2039_v50 = vpop.f32.mrf.mxu0  ;;  %v2081_v58 = vadd.f32 %v2080_v49, %v2037_v47 }
 0x1b8   :  { %v2082_v51 = vpop.f32.mrf.mxu1 }
 0x1b9   :  { %v2041_v52 = vpop.f32.mrf.mxu0  ;;  %v2083_v62 = vadd.f32 %v2082_v51, %v2039_v50  ;;  %v2630_v50 = vand.u32 127, %v134_v41 }
 0x1ba   :  { %v2084_v53 = vpop.f32.mrf.mxu1 }
 0x1bb   :  { %v2043_v56 = vpop.f32.mrf.mxu0  ;;  %v2085_v3 = vadd.f32 %v2084_v53, %v2041_v52  ;;  %vm2631_vm8 = vcmp.lt.s32.totalorder %v2630_v50, 8 }
 0x1bc   :  { %v2086_v57 = vpop.f32.mrf.mxu1 }
 0x1bd   :  { %v2087_v14 = vadd.f32 %v2086_v57, %v2043_v56 }
 0x1f5   :  { %v2123_v61 = vpop.f32.mrf.mxu0 }
 0x1f6   :  { %v2166_v60 = vpop.f32.mrf.mxu1  ;;  %v2124_v63 = vadd.f32 %v2123_v61, %v2081_v58 }
 0x1f7   :  { %v2125_v1 = vpop.f32.mrf.mxu0 }
 0x1f8   :  { %v2168_v2 = vpop.f32.mrf.mxu1  ;;  %v2167_v4 = vadd.f32 %v2166_v60, %v2124_v63  ;;  %v2126_v5 = vadd.f32 %v2125_v1, %v2083_v62 }
 0x1f9   :  { %v2127_v9 = vpop.f32.mrf.mxu0 }
 0x1fa   :  { %v2226_v10 = vadd.f32 %v2215_v0, %v2167_v4  ;;  %v2169_v11 = vadd.f32 %v2168_v2, %v2126_v5  ;;  %v2128_v12 = vadd.f32 %v2127_v9, %v2085_v3  ;;  %v2170_v13 = vpop.f32.mrf.mxu1 }
 0x1fb   :  { %v2129_v48 = vpop.f32.mrf.mxu0 }
 0x1fc   :  { %v2242_v15 = vmin.f32 %v2226_v10, 0.0  ;;  %v2227_v16 = vadd.f32 %v2219_v6, %v2169_v11  ;;  %v2171_v17 = vadd.f32 %v2170_v13, %v2128_v12  ;;  %v2130_v19 = vadd.f32 %v2129_v48, %v2087_v14  ;;  %v2172_v24 = vpop.f32.mrf.mxu1 }
 0x1fd   :  { %vm2234_vm7 = vcmp.gt.f32.partialorder %v2226_v10, 0.0 }
 0x1fe   :  { %v2252_v20 = vmul.f32 1.442695, %v2242_v15  ;;  %v2243_v22 = vmin.f32 %v2227_v16, 0.0  ;;  %v2230_v23 = vadd.f32 %v2215_v0, %v2171_v17  ;;  %v2173_v25 = vadd.f32 %v2172_v24, %v2130_v19 }
 0x1ff   :  { %vm2235_vm5 = vcmp.gt.f32.partialorder %v2227_v16, 0.0 }
 0x200   :  { %v2254_v26 = vmul.f32 1.442695, %v2243_v22  ;;  %v2246_v27 = vmin.f32 %v2230_v23, 0.0  ;;  %v2231_v18 = vadd.f32 %v2219_v6, %v2173_v25  ;;  %3476 = vpow2.f32 %v2252_v20 }
 0x201   :  { %vm2238_vm4 = vcmp.gt.f32.partialorder %v2230_v23, 0.0 }
 0x202   :  { %v2260_v42 = vmul.f32 1.442695, %v2246_v27  ;;  %3478 = vpow2.f32 %v2254_v26  ;;  %v2247_v21 = vmin.f32 %v2231_v18, 0.0  ;;  %vm2239_vm6 = vcmp.gt.f32.partialorder %v2231_v18, 0.0 }
 0x204   :  { %3480 = vpow2.f32 %v2260_v42  ;;  %v2262_v28 = vmul.f32 1.442695, %v2247_v21 }
 0x206   :  { %3482 = vpow2.f32 %v2262_v28 }
 0x20d   :  { %v3477_v34 = vpop.eup %3476 }
 0x20e   :  { %v2933_v31 = vadd.f32 -1.0, %v3477_v34 }
 0x20f   :  { %v3479_v7 = vpop.eup %3478 }
 0x210   :  { %v2934_v29 = vadd.f32 -1.0, %v3479_v7  ;;  %v2274_v36 = vsel %vm2234_vm7, %v2226_v10, %v2933_v31 }
 0x211   :  { %v3481_v8 = vpop.eup %3480 }
 0x212   :  { %v2937_v35 = vadd.f32 -1.0, %v3481_v8  ;;  %v2275_v32 = vsel %vm2235_vm5, %v2227_v16, %v2934_v29 }
 0x213   :  { %v3483_v30 = vpop.eup %3482 }
 0x214   :  { %v2938_v37 = vadd.f32 -1.0, %v3483_v30  ;;  %v2278_v55 = vsel %vm2238_vm4, %v2230_v23, %v2937_v35 }
 0x215   :  { %v2282_v39 = vpack.c.bf16 %v2278_v55, %v2274_v36 }
 0x216   :  { %v2279_v33 = vsel %vm2239_vm6, %v2231_v18, %v2938_v37 }
 0x217   :  { %v2283_v38 = vpack.c.bf16 %v2279_v33, %v2275_v32 }
 0x219   :  { %2620 = vmatprep.mubr.bf16.mxu1 %v2283_v38 }
 0x21a   :  { %2621 = vmatmul.mubr.bf16.vlgmr.msra.gmra.mxu1 %v2282_v39 }
 0x25a   :  { %v2988_v40 = vpop.f32.mrf.mxu0 }
 0x25c   :  { %v2989_v43 = vpop.f32.mrf.mxu0 }
 0x25d   :  { %v2990_v45 = vadd.f32 %v2989_v43, %v2988_v40 }
 0x25e   :  { %v2991_v44 = vpop.f32.mrf.mxu0 }
 0x25f   :  { %v2582_v52 = vadd.f32 %v2990_v45, %v2939_v46 }
 0x260   :  { %v2992_v47 = vpop.f32.mrf.mxu0 }
 0x261   :  { %v2993_v53 = vadd.f32 %v2992_v47, %v2991_v44 }
 0x263   :  { %v2585_v59 = vadd.f32 %v2993_v53, %v2939_v46 }
 0x2da   :  { %v3010_v49 = vpop.f32.mrf.mxu1 }
 0x2dc   :  { %v3011_v51 = vpop.f32.mrf.mxu1 }
 0x2dd   :  { %v3012_v54 = vadd.f32 %v3011_v51, %v3010_v49 }
 0x2de   :  { %v3013_v56 = vpop.f32.mrf.mxu1 }
 0x2df   :  { %v2623_v57 = vadd.f32 %v3012_v54, %v2582_v52 }
 0x2e0   :  { %v3014_v58 = vpop.f32.mrf.mxu1 }
 0x2e1   :  { %v3015_v61 = vadd.f32 %v3014_v58, %v3013_v56  ;;  %v2632_v60 = vsel %vm2631_vm8, %v2623_v57, -inf }
 0x2e2   :  { %2634 = vmax.xlane.f32.xlu0 %v2632_v60 }
 0x2e3   :  { %v2626_v62 = vadd.f32 %v3015_v61, %v2585_v59 }
 0x2e5   :  { %v2633_v63 = vsel %vm2631_vm8, %v2626_v62, -inf }
 0x2e6   :  { %2636 = vmax.xlane.f32.xlu0 %v2633_v63 }
 0x36b   :  { %v2635_v0 = vpop.xlane.xlu0 %2634 }
 0x36c   :  { %v2638_v1 = vsub.f32 %v2632_v60, %v2635_v0 }
 0x36e   :  { %v2640_v41 = vmul.f32 1.442695, %v2638_v1 }
 0x36f   :  { %v2637_v2 = vpop.xlane.xlu0 %2636 }
 0x370   :  { %3484 = vpow2.f32 %v2640_v41  ;;  %v2639_v3 = vsub.f32 %v2633_v63, %v2637_v2 }
 0x372   :  { %v2642_v4 = vmul.f32 1.442695, %v2639_v3 }
 0x374   :  { %3486 = vpow2.f32 %v2642_v4 }
 0x37d   :  { %v3485_v5 = vpop.eup %3484 }
 0x37e   :  { %2644 = vadd.xlane.f32.xlu1 %v3485_v5 }
 0x381   :  { %v3487_v6 = vpop.eup %3486 }
 0x382   :  { %2646 = vadd.xlane.f32.xlu1 %v3487_v6 }
 0x407   :  { %v2645_v9 = vpop.xlane.xlu1 %2644 }
 0x408   :  { %3488 = vrcp.f32 %v2645_v9 }
 0x40b   :  { %v2647_v10 = vpop.xlane.xlu1 %2646 }
 0x40c   :  { %3490 = vrcp.f32 %v2647_v10 }
 0x415   :  { %v3489_v11 = vpop.eup %3488 }
 0x416   :  { %v2649_v12 = vmul.f32 %v3489_v11, %v3485_v5 }
 0x418   :  { %v2652_v13 = vsel %vm2631_vm8, %v2649_v12, %v2623_v57 }
 0x419   :  { %v3491_v14 = vpop.eup %3490  ;;  %2654 = vst [vmem:[#allocation11] sm:$0xff] %v2652_v13 }
 0x41a   :  { %v2651_v48 = vmul.f32 %v3491_v14, %v3487_v6 }
 0x41c   :  { %v2653_v15 = vsel %vm2631_vm8, %v2651_v48, %v2626_v62 }
 0x41d   :  { %2655 = vst [vmem:[#allocation11 + $0x8] sm:$0xff] %v2653_v15 }
 0x41e   :  { %2660 = vsyncadd [#allocation5], 224  ;;  %s3609_s4 = smov [#allocation11]  }
 0x41f   :  { %s2661_s16 = sshll.u32 %s3609_s4, 4  ;;  %s2662_s16 = int_to_ptr.vmem [resolvable:$true] %s2661_s16 }
 0x420   :  { %s3572_s17 = scalar_lea.vmem %s2662_s16, 32  ;;  %s3576_s18 = scalar_lea.vmem %s2662_s16, 256 }
 0x421   :  { %p3573_p6 = scmp.ne.s32.totalorder %s2662_s16, %s3572_s17  ;;  %p3577_p7 = scmp.lt.s32.totalorder %s2662_s16, %s2662_s16 }
 0x422   :  { %p3578_p8 = scmp.lt.s32.totalorder %s3576_s18, %s3572_s17 }
 0x424   :  { %p3579_p9 = por %p3578_p8, %p3577_p7 }
 0x426   :  { %p3580_p10 = pnand %p3579_p9, %p3573_p6 }
 0x428   :  { %3583 = shalt.err (!%p3580_p10)
}
 0x429   :  { %s3610_s19 = smov 32   ;;  %s3611_s20 = smov 2  }
 0x42a   :  { %2667 = dma.vmem_to_hbm [thread:$0]  %s2662_s16, 32, %s3771_s5, [#allocation5], %s3610_s19, %s3610_s19, %s3611_s20  }
 0x42b   :  { %3598 = dma.done.wait [#allocation5], 256  }
 0x42c   :  { %3599 = vsyncadd [#allocation5], 4294967040 }
 0x42d   :  { %2671 = vsyncpa [#allocation4], 1 }
 0x42e   :  { %2672 = vsyncpa [#allocation7], 1 }
 0x42f   :  { %2673 = vsyncpa [#allocation10], 1 }
 0x430   :  { %2674 = vsyncpa [#allocation5], 1 }

// kernel: tpu_custom_call.1
= control target key start
LH: loop header
LB: loop body
LE: loop exit
PB: predicated region body
PF: predicated region fallthrough
CT: control target
= control target key end

     0   :  { %10 = vsyncpa [#allocation4], 0  ;;  %s3766_s0 = inlined_call_operand.hbm [shape: f32[2,1024], index: 0, kind: input, shape index: {}]   ;;  %s3767_s1 = inlined_call_operand.hbm [shape: bf16[1024,512], index: 1, kind: input, shape index: {}]   ;;  %s3768_s2 = inlined_call_operand.hbm [shape: f32[1,512], index: 2, kind: input, shape index: {}]   ;;  %s3769_s3 = inlined_call_operand.hbm [shape: bf16[512,128], index: 3, kind: input, shape index: {}]   ;;  %s3770_s4 = inlined_call_operand.vmem [shape: f32[1,128], index: 4, kind: input, shape index: {}]   ;;  %s3771_s5 = inlined_call_operand.hbm [shape: f32[2,128], index: 5, kind: output, shape index: {}]  }
   0x1   :  { %11 = vsyncpa [#allocation7], 0 }
   0x2   :  { %12 = vsyncpa [#allocation10], 0 }
   0x3   :  { %13 = vsyncpa [#allocation5], 0 }
   0x4   :  { %18 = vsyncadd [#allocation4], 1792  ;;  %s3600_s18 = smov [#allocation6]   ;;  %s3601_s20 = smov [#allocation3]  }
   0x5   :  { %s31_s19 = sshll.u32 %s3600_s18, 4  ;;  %s19_s21 = sshll.u32 %s3601_s20, 4  ;;  %s32_s19 = int_to_ptr.vmem [resolvable:$true] %s31_s19  ;;  %s20_s21 = int_to_ptr.vmem [resolvable:$true] %s19_s21 }
   0x6   :  { %s3500_s22 = scalar_lea.vmem %s32_s19, 32768  ;;  %p3505_p1 = scmp.lt.s32.totalorder %s32_s19, %s32_s19 }
   0x7   :  { %p3501_p0 = scmp.ne.s32.totalorder %s32_s19, %s3500_s22  ;;  %p3506_p2 = scmp.lt.s32.totalorder %s3500_s22, %s3500_s22 }
   0x9   :  { %p3507_p3 = por %p3506_p2, %p3505_p1 }
   0xb   :  { %p3508_p4 = pnand %p3507_p3, %p3501_p0 }
   0xd   :  { %3511 = shalt.err (!%p3508_p4)
}
   0xe   :  { %s3602_s23 = smov 256   ;;  %s3603_s24 = smov 16  }
   0xf   :  { %37 = dma.hbm_to_vmem [thread:$0]  %s3767_s1, 32768, %s32_s19, [#allocation7], %s3602_s23, %s3602_s23, %s3603_s24  }
  0x10   :  { %s3520_s27 = scalar_lea.vmem %s20_s21, 256  ;;  %s3524_s28 = scalar_lea.vmem %s20_s21, 2048 }
  0x11   :  { %p3521_p5 = scmp.ne.s32.totalorder %s20_s21, %s3520_s27  ;;  %p3525_p6 = scmp.lt.s32.totalorder %s20_s21, %s20_s21 }
  0x12   :  { %p3526_p7 = scmp.lt.s32.totalorder %s3524_s28, %s3520_s27 }
  0x14   :  { %p3527_p8 = por %p3526_p7, %p3525_p6 }
  0x16   :  { %p3528_p9 = pnand %p3527_p8, %p3521_p5 }
  0x18   :  { %3531 = shalt.err (!%p3528_p9)
}
  0x19   :  { %25 = dma.hbm_to_vmem [thread:$0]  %s3766_s0, 256, %s20_s21, [#allocation4], %s3602_s23, %s3602_s23, %s3603_s24  }
  0x1a   :  { %s3604_s6 = smov [#allocation8]   ;;  %s3605_s8 = smov [#allocation9]  }
  0x1b   :  { %s44_s7 = sshll.u32 %s3604_s6, 4  ;;  %s53_s9 = sshll.u32 %s3605_s8, 4  ;;  %s45_s7 = int_to_ptr.vmem [resolvable:$true] %s44_s7  ;;  %s54_s9 = int_to_ptr.vmem [resolvable:$true] %s53_s9 }
  0x1c   :  { %s3540_s10 = scalar_lea.vmem %s45_s7, 64  ;;  %p3545_p11 = scmp.lt.s32.totalorder %s45_s7, %s45_s7 }
  0x1d   :  { %p3541_p10 = scmp.ne.s32.totalorder %s45_s7, %s3540_s10  ;;  %p3546_p12 = scmp.lt.s32.totalorder %s3540_s10, %s3540_s10 }
  0x1f   :  { %p3547_p13 = por %p3546_p12, %p3545_p11 }
  0x21   :  { %p3548_p0 = pnand %p3547_p13, %p3541_p10 }
  0x23   :  { %3551 = shalt.err (!%p3548_p0)
}
  0x24   :  { %47 = dma.hbm_to_vmem [thread:$0]  %s3768_s2, 64, %s45_s7, [#allocation7]  }
  0x25   :  { %s3560_s12 = scalar_lea.vmem %s54_s9, 4096  ;;  %p3565_p2 = scmp.lt.s32.totalorder %s54_s9, %s54_s9 }
  0x26   :  { %p3561_p1 = scmp.ne.s32.totalorder %s54_s9, %s3560_s12  ;;  %p3566_p3 = scmp.lt.s32.totalorder %s3560_s12, %s3560_s12 }
  0x28   :  { %p3567_p4 = por %p3566_p3, %p3565_p2 }
  0x2a   :  { %p3568_p5 = pnand %p3567_p4, %p3561_p1 }
  0x2c   :  { %3571 = shalt.err (!%p3568_p5)
}
  0x2d   :  { %s3606_s0 = smov 64   ;;  %s3607_s13 = smov 4  }
  0x2e   :  { %59 = dma.hbm_to_vmem [thread:$0]  %s3769_s3, 4096, %s54_s9, [#allocation10], %s3606_s0, %s3606_s0, %s3607_s13  }
  0x2f   :  { %3592 = dma.done.wait [#allocation4], 2048  }
  0x30   :  { %3593 = vsyncadd [#allocation4], 4294965248 }
  0x31   :  { %3594 = dma.done.wait [#allocation7], 32832  }
  0x32   :  { %3595 = vsyncadd [#allocation7], 4294934464 }
  0x33   :  { %3596 = dma.done.wait [#allocation10], 4096  }
  0x34   :  { %3597 = vsyncadd [#allocation10], 4294963200  ;;  %v3028_v0 = vld [vmem:[#allocation6 + $0xe4] ss:$16 sps:$4 sm:$0xff]   ;;  %v3032_v2 = vld [vmem:[#allocation6 + $0xe0] ss:$16 sps:$4 sm:$0xff]   ;;  %v134_v41 = vlaneseq }
  0x35   :  { %v3030_v1 = vld [vmem:[#allocation6 + $0x2e4] ss:$16 sps:$4 sm:$0xff]   ;;  %1831 = vmatprep.subr.bf16.mxu0 %v3028_v0  ;;  %v3033_v3 = vld [vmem:[#allocation6 + $0x2e0] ss:$16 sps:$4 sm:$0xff]   ;;  %v3608_v39 = vmov 1983009808  }
  0x36   :  { %1874 = vmatprep.subr.bf16.mxu1 %v3030_v1  ;;  %v3034_v4 = vld [vmem:[#allocation6 + $0xc4] ss:$16 sps:$4 sm:$0xff]   ;;  %1832 = vmatpush1.bf16.msra.mxu0 %v3032_v2  ;;  %v3038_v6 = vld [vmem:[#allocation6 + $0xc0] ss:$16 sps:$4 sm:$0xff]   ;;  %v132_v40 = vunpack.c.l.s4 %v3608_v39  ;;  %v3655_v48 = vshrl.u32 %v134_v41, 7 }
  0x37   :  { %1875 = vmatpush1.bf16.msra.mxu1 %v3033_v3  ;;  %v3036_v5 = vld [vmem:[#allocation6 + $0x2c4] ss:$16 sps:$4 sm:$0xff]   ;;  %1833 = vmatprep.subr.bf16.mxu0 %v3034_v4  ;;  %v3039_v7 = vld [vmem:[#allocation6 + $0x2c0] ss:$16 sps:$4 sm:$0xff]  }
  0x38   :  { %1876 = vmatprep.subr.bf16.mxu1 %v3036_v5  ;;  %v3040_v8 = vld [vmem:[#allocation6 + $0xa4] ss:$16 sps:$4 sm:$0xff]   ;;  %v3044_v10 = vld [vmem:[#allocation6 + $0xa0] ss:$16 sps:$4 sm:$0xff]   ;;  %v133_v47 = vunpack.c.0.s8 %v132_v40 }
  0x39   :  { %v3042_v9 = vld [vmem:[#allocation6 + $0x2a4] ss:$16 sps:$4 sm:$0xff]   ;;  %v3045_v11 = vld [vmem:[#allocation6 + $0x2a0] ss:$16 sps:$4 sm:$0xff]  }
  0x3a   :  { %1834 = vmatpush1.bf16.msra.mxu0 %v3038_v6  ;;  %v3046_v12 = vld [vmem:[#allocation6 + $0x84] ss:$16 sps:$4 sm:$0xff]   ;;  %v3050_v14 = vld [vmem:[#allocation6 + $0x80] ss:$16 sps:$4 sm:$0xff]   ;;  %v3658_v55 = vsub.s32 %v133_v47, %v3655_v48 }
  0x3b   :  { %1877 = vmatpush1.bf16.msra.mxu1 %v3039_v7  ;;  %1835 = vmatprep.subr.bf16.mxu0 %v3040_v8  ;;  %v3048_v13 = vld [vmem:[#allocation6 + $0x284] ss:$16 sps:$4 sm:$0xff]   ;;  %v3051_v15 = vld [vmem:[#allocation6 + $0x280] ss:$16 sps:$4 sm:$0xff]  }
  0x3c   :  { %1878 = vmatprep.subr.bf16.mxu1 %v3042_v9  ;;  %v3052_v16 = vld [vmem:[#allocation6 + $0x64] ss:$16 sps:$4 sm:$0xff]   ;;  %v3056_v18 = vld [vmem:[#allocation6 + $0x60] ss:$16 sps:$4 sm:$0xff]  }
  0x3d   :  { %v3054_v17 = vld [vmem:[#allocation6 + $0x264] ss:$16 sps:$4 sm:$0xff]   ;;  %v3057_v19 = vld [vmem:[#allocation6 + $0x260] ss:$16 sps:$4 sm:$0xff]  }
  0x3e   :  { %1836 = vmatpush1.bf16.msra.mxu0 %v3044_v10  ;;  %v3058_v20 = vld [vmem:[#allocation6 + $0x44] ss:$16 sps:$4 sm:$0xff]   ;;  %v3062_v22 = vld [vmem:[#allocation6 + $0x40] ss:$16 sps:$4 sm:$0xff]  }
  0x3f   :  { %1879 = vmatpush1.bf16.msra.mxu1 %v3045_v11  ;;  %1837 = vmatprep.subr.bf16.mxu0 %v3046_v12  ;;  %v3060_v21 = vld [vmem:[#allocation6 + $0x244] ss:$16 sps:$4 sm:$0xff]   ;;  %v3063_v23 = vld [vmem:[#allocation6 + $0x240] ss:$16 sps:$4 sm:$0xff]  }
  0x40   :  { %1880 = vmatprep.subr.bf16.mxu1 %v3048_v13  ;;  %v3064_v24 = vld [vmem:[#allocation6 + $0x24] ss:$16 sps:$4 sm:$0xff]   ;;  %v3068_v26 = vld [vmem:[#allocation6 + $0x20] ss:$16 sps:$4 sm:$0xff]  }
  0x41   :  { %v3066_v25 = vld [vmem:[#allocation6 + $0x224] ss:$16 sps:$4 sm:$0xff]   ;;  %v3069_v27 = vld [vmem:[#allocation6 + $0x220] ss:$16 sps:$4 sm:$0xff]  }
  0x42   :  { %1838 = vmatpush1.bf16.msra.mxu0 %v3050_v14  ;;  %v3070_v28 = vld [vmem:[#allocation6 + $0x4] ss:$16 sps:$4 sm:$0xff]   ;;  %v3074_v30 = vld [vmem:[#allocation6] ss:$16 sps:$4 sm:$0xff]  }
  0x43   :  { %1881 = vmatpush1.bf16.msra.mxu1 %v3051_v15  ;;  %1839 = vmatprep.subr.bf16.mxu0 %v3052_v16  ;;  %v3072_v29 = vld [vmem:[#allocation6 + $0x204] ss:$16 sps:$4 sm:$0xff]   ;;  %v3075_v31 = vld [vmem:[#allocation6 + $0x200] ss:$16 sps:$4 sm:$0xff]  }
  0x44   :  { %1882 = vmatprep.subr.bf16.mxu1 %v3054_v17  ;;  %v3076_v32 = vld [vmem:[#allocation6 + $0x1e4] ss:$16 sps:$4 sm:$0xff]   ;;  %v3080_v34 = vld [vmem:[#allocation6 + $0x1e0] ss:$16 sps:$4 sm:$0xff]  }
  0x45   :  { %v3078_v33 = vld [vmem:[#allocation6 + $0x3e4] ss:$16 sps:$4 sm:$0xff]   ;;  %v3081_v35 = vld [vmem:[#allocation6 + $0x3e0] ss:$16 sps:$4 sm:$0xff]  }
  0x46   :  { %1840 = vmatpush1.bf16.msra.mxu0 %v3056_v18  ;;  %v3082_v36 = vld [vmem:[#allocation6 + $0x1c4] ss:$16 sps:$4 sm:$0xff]   ;;  %v3086_v38 = vld [vmem:[#allocation6 + $0x1c0] ss:$16 sps:$4 sm:$0xff]  }
  0x47   :  { %1883 = vmatpush1.bf16.msra.mxu1 %v3057_v19  ;;  %1841 = vmatprep.subr.bf16.mxu0 %v3058_v20  ;;  %v3084_v37 = vld [vmem:[#allocation6 + $0x3c4] ss:$16 sps:$4 sm:$0xff]   ;;  %v3087_v42 = vld [vmem:[#allocation6 + $0x3c0] ss:$16 sps:$4 sm:$0xff]  }
  0x48   :  { %1884 = vmatprep.subr.bf16.mxu1 %v3060_v21  ;;  %v3088_v43 = vld [vmem:[#allocation6 + $0x1a4] ss:$16 sps:$4 sm:$0xff]   ;;  %v3092_v45 = vld [vmem:[#allocation6 + $0x1a0] ss:$16 sps:$4 sm:$0xff]  }
  0x49   :  { %v3090_v44 = vld [vmem:[#allocation6 + $0x3a4] ss:$16 sps:$4 sm:$0xff]   ;;  %v3093_v46 = vld [vmem:[#allocation6 + $0x3a0] ss:$16 sps:$4 sm:$0xff]  }
  0x4a   :  { %1842 = vmatpush1.bf16.msra.mxu0 %v3062_v22  ;;  %v3094_v49 = vld [vmem:[#allocation6 + $0x184] ss:$16 sps:$4 sm:$0xff]   ;;  %v3098_v51 = vld [vmem:[#allocation6 + $0x180] ss:$16 sps:$4 sm:$0xff]  }
  0x4b   :  { %1885 = vmatpush1.bf16.msra.mxu1 %v3063_v23  ;;  %1843 = vmatprep.subr.bf16.mxu0 %v3064_v24  ;;  %v3096_v50 = vld [vmem:[#allocation6 + $0x384] ss:$16 sps:$4 sm:$0xff]   ;;  %v3099_v52 = vld [vmem:[#allocation6 + $0x380] ss:$16 sps:$4 sm:$0xff]  }
  0x4c   :  { %1886 = vmatprep.subr.bf16.mxu1 %v3066_v25  ;;  %v3100_v53 = vld [vmem:[#allocation6 + $0x164] ss:$16 sps:$4 sm:$0xff]   ;;  %v3124_v56 = vld [vmem:[#allocation3] ss:$16 sps:$4 sm:$0xff]  }
  0x4d   :  { %v3102_v54 = vld [vmem:[#allocation6 + $0x364] ss:$16 sps:$4 sm:$0xff]   ;;  %v3126_v57 = vld [vmem:[#allocation3 + $0x20] ss:$16 sps:$4 sm:$0xff]   ;;  %v137_v63 = vrot.slane %v3124_v56, %v3658_v55 }
  0x4e   :  { %1844 = vmatpush1.bf16.msra.mxu0 %v3068_v26  ;;  %v3104_v58 = vld [vmem:[#allocation6 + $0x160] ss:$16 sps:$4 sm:$0xff]   ;;  %v3132_v62 = vld [vmem:[#allocation3 + $0x4] ss:$16 sps:$4 sm:$0xff]   ;;  %v151_v0 = vrot.slane %v3126_v57, %v3658_v55 }
  0x4f   :  { %1887 = vmatpush1.bf16.msra.mxu1 %v3069_v27  ;;  %1845 = vmatprep.subr.bf16.mxu0 %v3070_v28  ;;  %v3105_v59 = vld [vmem:[#allocation6 + $0x360] ss:$16 sps:$4 sm:$0xff]   ;;  %v3133_v1 = vld [vmem:[#allocation3 + $0x24] ss:$16 sps:$4 sm:$0xff]   ;;  %v144_v7 = vrot.slane %v3132_v62, %v3658_v55 }
  0x50   :  { %1888 = vmatprep.subr.bf16.mxu1 %v3072_v29  ;;  %v3128_v60 = vld [vmem:[#allocation3 + $0x40] ss:$16 sps:$4 sm:$0xff]   ;;  %v3134_v2 = vld [vmem:[#allocation3 + $0x44] ss:$16 sps:$4 sm:$0xff]   ;;  %v160_v9 = vcombine.high %v137_v63, %v151_v0  ;;  %v158_v10 = vrot.slane %v3133_v1, %v3658_v55  ;;  %v159_v28 = vcombine.low %v137_v63, %v151_v0 }
  0x51   :  { %v3130_v61 = vld [vmem:[#allocation3 + $0x60] ss:$16 sps:$4 sm:$0xff]   ;;  %v3135_v3 = vld [vmem:[#allocation3 + $0x64] ss:$16 sps:$4 sm:$0xff]   ;;  %v209_v5 = vrot.slane %v3128_v60, %v3658_v55  ;;  %v216_v11 = vrot.slane %v3134_v2, %v3658_v55 }
  0x52   :  { %1846 = vmatpush1.bf16.msra.mxu0 %v3074_v30  ;;  %v3106_v4 = vld [vmem:[#allocation6 + $0x144] ss:$16 sps:$4 sm:$0xff]   ;;  %v223_v6 = vrot.slane %v3130_v61, %v3658_v55  ;;  %v230_v13 = vrot.slane %v3135_v3, %v3658_v55  ;;  %v3110_v14 = vld [vmem:[#allocation6 + $0x140] ss:$16 sps:$4 sm:$0xff]   ;;  %v162_v16 = vcombine.high %v144_v7, %v158_v10  ;;  %v161_v30 = vcombine.low %v144_v7, %v158_v10  ;;  %v3232_v7 = vld [vmem:[#allocation3 + $0x8] ss:$16 sps:$4 sm:$0xff]  }
  0x53   :  { %1889 = vmatpush1.bf16.msra.mxu1 %v3075_v31  ;;  %1847 = vmatprep.subr.bf16.mxu0 %v3076_v32  ;;  %v3108_v8 = vld [vmem:[#allocation6 + $0x344] ss:$16 sps:$4 sm:$0xff]   ;;  %v3111_v15 = vld [vmem:[#allocation6 + $0x340] ss:$16 sps:$4 sm:$0xff]  }
  0x54   :  { %1890 = vmatprep.subr.bf16.mxu1 %v3078_v33  ;;  %v232_v12 = vcombine.high %v209_v5, %v223_v6  ;;  %v3112_v17 = vld [vmem:[#allocation6 + $0x124] ss:$16 sps:$4 sm:$0xff]   ;;  %v234_v19 = vcombine.high %v216_v11, %v230_v13  ;;  %v3116_v22 = vld [vmem:[#allocation6 + $0x120] ss:$16 sps:$4 sm:$0xff]   ;;  %v231_v29 = vcombine.low %v209_v5, %v223_v6  ;;  %v233_v31 = vcombine.low %v216_v11, %v230_v13  ;;  %v3236_v11 = vld [vmem:[#allocation3 + $0x48] ss:$16 sps:$4 sm:$0xff]  }
  0x55   :  { %v3114_v20 = vld [vmem:[#allocation6 + $0x324] ss:$16 sps:$4 sm:$0xff]   ;;  %v3117_v23 = vld [vmem:[#allocation6 + $0x320] ss:$16 sps:$4 sm:$0xff]   ;;  %v3240_v13 = vld [vmem:[#allocation3 + $0xc] ss:$16 sps:$4 sm:$0xff]  }
  0x56   :  { %1848 = vmatpush2.bf16.msra.mxu0 %v3080_v34  ;;  %v3668_v18 = vpack.c.bf16 %v232_v12, %v160_v9  ;;  %v3671_v21 = vpack.c.bf16 %v234_v19, %v162_v16  ;;  %v3118_v24 = vld [vmem:[#allocation6 + $0x104] ss:$16 sps:$4 sm:$0xff]   ;;  %v3122_v26 = vld [vmem:[#allocation6 + $0x100] ss:$16 sps:$4 sm:$0xff]   ;;  %v3674_v34 = vpack.c.bf16 %v231_v29, %v159_v28  ;;  %v3238_v12 = vld [vmem:[#allocation3 + $0x68] ss:$16 sps:$4 sm:$0xff]  }
  0x57   :  { %1891 = vmatpush2.bf16.msra.mxu1 %v3081_v35  ;;  %1849 = vmatprep.subr.bf16.mxu0 %v3082_v36  ;;  %v3120_v25 = vld [vmem:[#allocation6 + $0x304] ss:$16 sps:$4 sm:$0xff]   ;;  %v3123_v27 = vld [vmem:[#allocation6 + $0x300] ss:$16 sps:$4 sm:$0xff]   ;;  %v3676_v35 = vpack.c.bf16 %v233_v31, %v161_v30  ;;  %v3241_v16 = vld [vmem:[#allocation3 + $0x2c] ss:$16 sps:$4 sm:$0xff]  }
  0x58   :  { %1892 = vmatprep.subr.bf16.mxu1 %v3084_v37  ;;  %1863 = vmatprep.mubr.bf16.mxu0 %v3668_v18  ;;  %v3138_v32 = vld [vmem:[#allocation6 + $0x4e4] ss:$16 sps:$4 sm:$0xff]   ;;  %v3136_v36 = vld [vmem:[#allocation6 + $0x4e0] ss:$16 sps:$4 sm:$0xff]   ;;  %v3243_v19 = vld [vmem:[#allocation3 + $0x6c] ss:$16 sps:$4 sm:$0xff]  }
  0x59   :  { %1906 = vmatprep.mubr.bf16.mxu1 %v3671_v21  ;;  %v3141_v33 = vld [vmem:[#allocation6 + $0x6e4] ss:$16 sps:$4 sm:$0xff]   ;;  %v3139_v37 = vld [vmem:[#allocation6 + $0x6e0] ss:$16 sps:$4 sm:$0xff]   ;;  %v3706_v30 = vrot.slane %v3243_v19, %v3658_v55  ;;  %v3259_v19 = vld [vmem:[#allocation6 + $0x2a8] ss:$16 sps:$4 sm:$0xff]  }
  0x5a   :  { %1850 = vmatpush2.bf16.msra.mxu0 %v3086_v38  ;;  %v3144_v38 = vld [vmem:[#allocation6 + $0x4c4] ss:$16 sps:$4 sm:$0xff]   ;;  %v3142_v40 = vld [vmem:[#allocation6 + $0x4c0] ss:$16 sps:$4 sm:$0xff]  }
  0x5b   :  { %1893 = vmatpush2.bf16.msra.mxu1 %v3087_v42  ;;  %1851 = vmatprep.subr.bf16.mxu0 %v3088_v43  ;;  %v3147_v39 = vld [vmem:[#allocation6 + $0x6c4] ss:$16 sps:$4 sm:$0xff]   ;;  %v3145_v42 = vld [vmem:[#allocation6 + $0x6c0] ss:$16 sps:$4 sm:$0xff]  }
  0x5c   :  { %1894 = vmatprep.subr.bf16.mxu1 %v3090_v44  ;;  %v3150_v43 = vld [vmem:[#allocation6 + $0x4a4] ss:$16 sps:$4 sm:$0xff]   ;;  %v3163_v56 = vld [vmem:[#allocation6 + $0x660] ss:$16 sps:$4 sm:$0xff]  }
  0x5d   :  { %v3153_v44 = vld [vmem:[#allocation6 + $0x6a4] ss:$16 sps:$4 sm:$0xff]   ;;  %v3169_v60 = vld [vmem:[#allocation6 + $0x640] ss:$16 sps:$4 sm:$0xff]  }
  0x5e   :  { %1852 = vmatpush2.bf16.msra.mxu0 %v3092_v45  ;;  %v3148_v45 = vld [vmem:[#allocation6 + $0x4a0] ss:$16 sps:$4 sm:$0xff]   ;;  %v3156_v47 = vld [vmem:[#allocation6 + $0x484] ss:$16 sps:$4 sm:$0xff]  }
  0x5f   :  { %1895 = vmatpush2.bf16.msra.mxu1 %v3093_v46  ;;  %1853 = vmatprep.subr.bf16.mxu0 %v3094_v49  ;;  %v3151_v46 = vld [vmem:[#allocation6 + $0x6a0] ss:$16 sps:$4 sm:$0xff]   ;;  %v3159_v49 = vld [vmem:[#allocation6 + $0x684] ss:$16 sps:$4 sm:$0xff]  }
  0x60   :  { %1896 = vmatprep.subr.bf16.mxu1 %v3096_v50  ;;  %v3154_v50 = vld [vmem:[#allocation6 + $0x480] ss:$16 sps:$4 sm:$0xff]   ;;  %v3168_v57 = vld [vmem:[#allocation6 + $0x444] ss:$16 sps:$4 sm:$0xff]  }
  0x61   :  { %v3174_v61 = vld [vmem:[#allocation6 + $0x424] ss:$16 sps:$4 sm:$0xff]   ;;  %v3172_v63 = vld [vmem:[#allocation6 + $0x420] ss:$16 sps:$4 sm:$0xff]  }
  0x62   :  { %1854 = vmatpush2.bf16.msra.mxu0 %v3098_v51  ;;  %v3157_v51 = vld [vmem:[#allocation6 + $0x680] ss:$16 sps:$4 sm:$0xff]   ;;  %v3177_v62 = vld [vmem:[#allocation6 + $0x624] ss:$16 sps:$4 sm:$0xff]  }
  0x63   :  { %1897 = vmatpush2.bf16.msra.mxu1 %v3099_v52  ;;  %1855 = vmatprep.subr.bf16.mxu0 %v3100_v53  ;;  %v3162_v52 = vld [vmem:[#allocation6 + $0x464] ss:$16 sps:$4 sm:$0xff]   ;;  %v3175_v0 = vld [vmem:[#allocation6 + $0x620] ss:$16 sps:$4 sm:$0xff]  }
  0x64   :  { %1898 = vmatprep.subr.bf16.mxu1 %v3102_v54  ;;  %v3165_v53 = vld [vmem:[#allocation6 + $0x664] ss:$16 sps:$4 sm:$0xff]   ;;  %v3160_v54 = vld [vmem:[#allocation6 + $0x460] ss:$16 sps:$4 sm:$0xff]  }
  0x65   :  { %v3180_v1 = vld [vmem:[#allocation6 + $0x404] ss:$16 sps:$4 sm:$0xff]   ;;  %v3178_v3 = vld [vmem:[#allocation6 + $0x400] ss:$16 sps:$4 sm:$0xff]  }
  0x66   :  { %1856 = vmatpush2.bf16.msra.mxu0 %v3104_v58  ;;  %v3171_v58 = vld [vmem:[#allocation6 + $0x644] ss:$16 sps:$4 sm:$0xff]   ;;  %v3184_v9 = vld [vmem:[#allocation6 + $0x5e0] ss:$16 sps:$4 sm:$0xff]  }
  0x67   :  { %1899 = vmatpush2.bf16.msra.mxu1 %v3105_v59  ;;  %1857 = vmatprep.subr.bf16.mxu0 %v3106_v4  ;;  %v3166_v59 = vld [vmem:[#allocation6 + $0x440] ss:$16 sps:$4 sm:$0xff]   ;;  %v3183_v2 = vld [vmem:[#allocation6 + $0x604] ss:$16 sps:$4 sm:$0xff]  }
  0x68   :  { %1900 = vmatprep.subr.bf16.mxu1 %v3108_v8  ;;  %v3181_v4 = vld [vmem:[#allocation6 + $0x600] ss:$16 sps:$4 sm:$0xff]   ;;  %v3186_v5 = vld [vmem:[#allocation6 + $0x5e4] ss:$16 sps:$4 sm:$0xff]   ;;  %v3234_v8 = vld [vmem:[#allocation3 + $0x28] ss:$16 sps:$4 sm:$0xff]  }
  0x69   :  { %v3189_v6 = vld [vmem:[#allocation6 + $0x7e4] ss:$16 sps:$4 sm:$0xff]   ;;  %v3187_v10 = vld [vmem:[#allocation6 + $0x7e0] ss:$16 sps:$4 sm:$0xff]  }
  0x6a   :  { %1858 = vmatpush2.bf16.msra.mxu0 %v3110_v14  ;;  %v3681_v14 = vrot.slane %v3232_v7, %v3658_v55  ;;  %v3190_v31 = vld [vmem:[#allocation6 + $0x5c0] ss:$16 sps:$4 sm:$0xff]  }
  0x6b   :  { %1901 = vmatpush2.bf16.msra.mxu1 %v3111_v15  ;;  %1859 = vmatprep.subr.bf16.mxu0 %v3112_v17  ;;  %v3684_v15 = vrot.slane %v3234_v8, %v3658_v55  ;;  %v3242_v17 = vld [vmem:[#allocation3 + $0x4c] ss:$16 sps:$4 sm:$0xff]  }
  0x6c   :  { %1902 = vmatprep.subr.bf16.mxu1 %v3114_v20  ;;  %v3192_v20 = vld [vmem:[#allocation6 + $0x5c4] ss:$16 sps:$4 sm:$0xff]   ;;  %v3701_v28 = vrot.slane %v3242_v17, %v3658_v55  ;;  %v3256_v17 = vld [vmem:[#allocation6 + $0xa8] ss:$16 sps:$4 sm:$0xff]  }
  0x6e   :  { %1860 = vmatpush2.bf16.msra.mxu0 %v3116_v22  ;;  %v3687_v22 = vrot.slane %v3236_v11, %v3658_v55  ;;  %v3252_v11 = vld [vmem:[#allocation6 + $0xcc] ss:$16 sps:$4 sm:$0xff]  }
  0x6f   :  { %1903 = vmatpush2.bf16.msra.mxu1 %v3117_v23  ;;  %1861 = vmatprep.subr.bf16.mxu0 %v3118_v24  ;;  %v3690_v23 = vrot.slane %v3238_v12, %v3658_v55  ;;  %v3693_v24 = vrot.slane %v3240_v13, %v3658_v55  ;;  %v3255_v12 = vld [vmem:[#allocation6 + $0x2cc] ss:$16 sps:$4 sm:$0xff]   ;;  %v3250_v13 = vld [vmem:[#allocation6 + $0xc8] ss:$16 sps:$4 sm:$0xff]  }
  0x70   :  { %1904 = vmatprep.subr.bf16.mxu1 %v3120_v25  ;;  %v3195_v25 = vld [vmem:[#allocation6 + $0x7c4] ss:$16 sps:$4 sm:$0xff]  }
  0x71   :  { %v268_v29 = vcombine.high %v3687_v22, %v3690_v23 }
  0x72   :  { %1862 = vmatpush2.bf16.msra.mxu0 %v3122_v26  ;;  %v196_v26 = vcombine.high %v3681_v14, %v3684_v15 }
  0x73   :  { %1905 = vmatpush2.bf16.msra.mxu1 %v3123_v27  ;;  %1917 = vmatprep.subr.bf16.mxu0 %v3138_v32  ;;  %v3698_v27 = vrot.slane %v3241_v16, %v3658_v55  ;;  %v3193_v32 = vld [vmem:[#allocation6 + $0x7c0] ss:$16 sps:$4 sm:$0xff]   ;;  %v3261_v16 = vld [vmem:[#allocation6 + $0x2ac] ss:$16 sps:$4 sm:$0xff]  }
  0x74   :  { %1960 = vmatprep.subr.bf16.mxu1 %v3141_v33 }
  0x75   :  { %1864 = vmatmul.mubr.bf16.vlgmr.msra.gmra.mxu0 %v3674_v34  ;;  %v198_v33 = vcombine.high %v3693_v24, %v3698_v27 }
  0x76   :  { %1907 = vmatmul.mubr.bf16.vlgmr.msra.gmra.mxu1 %v3676_v35  ;;  %1918 = vmatpush1.bf16.msra.mxu0 %v3136_v36  ;;  %v3198_v36 = vld [vmem:[#allocation6 + $0x5a4] ss:$16 sps:$4 sm:$0xff]  }
  0x77   :  { %1961 = vmatpush1.bf16.msra.mxu1 %v3139_v37  ;;  %1919 = vmatprep.subr.bf16.mxu0 %v3144_v38  ;;  %v3710_v37 = vpack.c.bf16 %v268_v29, %v196_v26  ;;  %v270_v38 = vcombine.high %v3701_v28, %v3706_v30  ;;  %v3273_v26 = vld [vmem:[#allocation6 + $0x26c] ss:$16 sps:$4 sm:$0xff]   ;;  %v3274_v29 = vld [vmem:[#allocation6 + $0x48] ss:$16 sps:$4 sm:$0xff]  }
  0x78   :  { %1962 = vmatprep.subr.bf16.mxu1 %v3147_v39  ;;  %v3201_v39 = vld [vmem:[#allocation6 + $0x7a4] ss:$16 sps:$4 sm:$0xff]  }
  0x79   :  { %1949 = vmatprep.mubr.bf16.mxu0 %v3710_v37  ;;  %v3715_v55 = vpack.c.bf16 %v270_v38, %v198_v33  ;;  %v3280_v33 = vld [vmem:[#allocation6 + $0x28] ss:$16 sps:$4 sm:$0xff]   ;;  %v3288_v38 = vld [vmem:[#allocation6 + $0xc] ss:$16 sps:$4 sm:$0xff]  }
  0x7a   :  { %1920 = vmatpush1.bf16.msra.mxu0 %v3142_v40  ;;  %v3196_v40 = vld [vmem:[#allocation6 + $0x5a0] ss:$16 sps:$4 sm:$0xff]  }
  0x7b   :  { %1963 = vmatpush1.bf16.msra.mxu1 %v3145_v42  ;;  %1921 = vmatprep.subr.bf16.mxu0 %v3150_v43  ;;  %v3199_v42 = vld [vmem:[#allocation6 + $0x7a0] ss:$16 sps:$4 sm:$0xff]   ;;  %v3204_v43 = vld [vmem:[#allocation6 + $0x584] ss:$16 sps:$4 sm:$0xff]  }
  0x7c   :  { %1964 = vmatprep.subr.bf16.mxu1 %v3153_v44  ;;  %v3207_v44 = vld [vmem:[#allocation6 + $0x784] ss:$16 sps:$4 sm:$0xff]   ;;  %1992 = vmatprep.mubr.bf16.mxu1 %v3715_v55 }
  0x7e   :  { %1922 = vmatpush1.bf16.msra.mxu0 %v3148_v45  ;;  %v3202_v45 = vld [vmem:[#allocation6 + $0x580] ss:$16 sps:$4 sm:$0xff]  }
  0x7f   :  { %1965 = vmatpush1.bf16.msra.mxu1 %v3151_v46  ;;  %1923 = vmatprep.subr.bf16.mxu0 %v3156_v47  ;;  %v3205_v46 = vld [vmem:[#allocation6 + $0x780] ss:$16 sps:$4 sm:$0xff]   ;;  %v3210_v47 = vld [vmem:[#allocation6 + $0x564] ss:$16 sps:$4 sm:$0xff]  }
  0x80   :  { %1966 = vmatprep.subr.bf16.mxu1 %v3159_v49  ;;  %v3213_v49 = vld [vmem:[#allocation6 + $0x764] ss:$16 sps:$4 sm:$0xff]  }
  0x82   :  { %1924 = vmatpush1.bf16.msra.mxu0 %v3154_v50  ;;  %v3208_v50 = vld [vmem:[#allocation6 + $0x560] ss:$16 sps:$4 sm:$0xff]  }
  0x83   :  { %1967 = vmatpush1.bf16.msra.mxu1 %v3157_v51  ;;  %1925 = vmatprep.subr.bf16.mxu0 %v3162_v52  ;;  %v3211_v51 = vld [vmem:[#allocation6 + $0x760] ss:$16 sps:$4 sm:$0xff]   ;;  %v3216_v52 = vld [vmem:[#allocation6 + $0x544] ss:$16 sps:$4 sm:$0xff]  }
  0x84   :  { %1968 = vmatprep.subr.bf16.mxu1 %v3165_v53  ;;  %v3219_v53 = vld [vmem:[#allocation6 + $0x744] ss:$16 sps:$4 sm:$0xff]  }
  0x86   :  { %1926 = vmatpush1.bf16.msra.mxu0 %v3160_v54  ;;  %v3214_v54 = vld [vmem:[#allocation6 + $0x540] ss:$16 sps:$4 sm:$0xff]  }
  0x87   :  { %1969 = vmatpush1.bf16.msra.mxu1 %v3163_v56  ;;  %1927 = vmatprep.subr.bf16.mxu0 %v3168_v57  ;;  %v3217_v56 = vld [vmem:[#allocation6 + $0x740] ss:$16 sps:$4 sm:$0xff]   ;;  %v3222_v57 = vld [vmem:[#allocation6 + $0x524] ss:$16 sps:$4 sm:$0xff]  }
  0x88   :  { %1970 = vmatprep.subr.bf16.mxu1 %v3171_v58  ;;  %v3225_v58 = vld [vmem:[#allocation6 + $0x724] ss:$16 sps:$4 sm:$0xff]  }
  0x8a   :  { %1928 = vmatpush1.bf16.msra.mxu0 %v3166_v59  ;;  %v3220_v59 = vld [vmem:[#allocation6 + $0x520] ss:$16 sps:$4 sm:$0xff]  }
  0x8b   :  { %1971 = vmatpush1.bf16.msra.mxu1 %v3169_v60  ;;  %1929 = vmatprep.subr.bf16.mxu0 %v3174_v61  ;;  %v3223_v60 = vld [vmem:[#allocation6 + $0x720] ss:$16 sps:$4 sm:$0xff]   ;;  %v3228_v61 = vld [vmem:[#allocation6 + $0x504] ss:$16 sps:$4 sm:$0xff]  }
  0x8c   :  { %1972 = vmatprep.subr.bf16.mxu1 %v3177_v62  ;;  %v3231_v62 = vld [vmem:[#allocation6 + $0x704] ss:$16 sps:$4 sm:$0xff]  }
  0x8e   :  { %1930 = vmatpush1.bf16.msra.mxu0 %v3172_v63  ;;  %v3226_v63 = vld [vmem:[#allocation6 + $0x500] ss:$16 sps:$4 sm:$0xff]  }
  0x8f   :  { %1973 = vmatpush1.bf16.msra.mxu1 %v3175_v0  ;;  %1931 = vmatprep.subr.bf16.mxu0 %v3180_v1  ;;  %v3229_v0 = vld [vmem:[#allocation6 + $0x700] ss:$16 sps:$4 sm:$0xff]   ;;  %v195_v1 = vcombine.low %v3681_v14, %v3684_v15  ;;  %v3253_v14 = vld [vmem:[#allocation6 + $0x2c8] ss:$16 sps:$4 sm:$0xff]   ;;  %v3258_v15 = vld [vmem:[#allocation6 + $0xac] ss:$16 sps:$4 sm:$0xff]  }
  0x90   :  { %1974 = vmatprep.subr.bf16.mxu1 %v3183_v2  ;;  %v267_v2 = vcombine.low %v3687_v22, %v3690_v23  ;;  %v3267_v22 = vld [vmem:[#allocation6 + $0x28c] ss:$16 sps:$4 sm:$0xff]   ;;  %v3262_v23 = vld [vmem:[#allocation6 + $0x88] ss:$16 sps:$4 sm:$0xff]  }
  0x92   :  { %1932 = vmatpush1.bf16.msra.mxu0 %v3178_v3  ;;  %v197_v3 = vcombine.low %v3693_v24, %v3698_v27  ;;  %v3726_v7 = vpack.c.bf16 %v267_v2, %v195_v1  ;;  %v3265_v24 = vld [vmem:[#allocation6 + $0x288] ss:$16 sps:$4 sm:$0xff]   ;;  %v3324_v1 = vld [vmem:[#allocation6 + $0x14c] ss:$16 sps:$4 sm:$0xff]  }
  0x93   :  { %1975 = vmatpush1.bf16.msra.mxu1 %v3181_v4  ;;  %1933 = vmatprep.subr.bf16.mxu0 %v3186_v5  ;;  %v269_v4 = vcombine.low %v3701_v28, %v3706_v30  ;;  %v3246_v5 = vld [vmem:[#allocation6 + $0xec] ss:$16 sps:$4 sm:$0xff]   ;;  %v3268_v27 = vld [vmem:[#allocation6 + $0x68] ss:$16 sps:$4 sm:$0xff]  }
  0x94   :  { %1976 = vmatprep.subr.bf16.mxu1 %v3189_v6  ;;  %v3249_v6 = vld [vmem:[#allocation6 + $0x2ec] ss:$16 sps:$4 sm:$0xff]   ;;  %v3277_v30 = vld [vmem:[#allocation6 + $0x248] ss:$16 sps:$4 sm:$0xff]  }
  0x95   :  { %v3728_v8 = vpack.c.bf16 %v269_v4, %v197_v3  ;;  %v3279_v28 = vld [vmem:[#allocation6 + $0x24c] ss:$16 sps:$4 sm:$0xff]   ;;  %v3322_v3 = vld [vmem:[#allocation6 + $0x148] ss:$16 sps:$4 sm:$0xff]  }
  0x96   :  { %1934 = vmatpush2.bf16.msra.mxu0 %v3184_v9  ;;  %v3244_v9 = vld [vmem:[#allocation6 + $0xe8] ss:$16 sps:$4 sm:$0xff]   ;;  %v3327_v2 = vld [vmem:[#allocation6 + $0x34c] ss:$16 sps:$4 sm:$0xff]  }
  0x97   :  { %1977 = vmatpush2.bf16.msra.mxu1 %v3187_v10  ;;  %1935 = vmatprep.subr.bf16.mxu0 %v3192_v20  ;;  %v3247_v10 = vld [vmem:[#allocation6 + $0x2e8] ss:$16 sps:$4 sm:$0xff]   ;;  %v3264_v20 = vld [vmem:[#allocation6 + $0x8c] ss:$16 sps:$4 sm:$0xff]  }
  0x98   :  { %1978 = vmatprep.subr.bf16.mxu1 %v3195_v25  ;;  %v3270_v25 = vld [vmem:[#allocation6 + $0x6c] ss:$16 sps:$4 sm:$0xff]   ;;  %v3325_v4 = vld [vmem:[#allocation6 + $0x348] ss:$16 sps:$4 sm:$0xff]  }
  0x9a   :  { %1936 = vmatpush2.bf16.msra.mxu0 %v3190_v31  ;;  %v3282_v31 = vld [vmem:[#allocation6 + $0x2c] ss:$16 sps:$4 sm:$0xff]  }
  0x9b   :  { %1979 = vmatpush2.bf16.msra.mxu1 %v3193_v32  ;;  %1937 = vmatprep.subr.bf16.mxu0 %v3198_v36  ;;  %v3285_v32 = vld [vmem:[#allocation6 + $0x22c] ss:$16 sps:$4 sm:$0xff]   ;;  %v3283_v36 = vld [vmem:[#allocation6 + $0x228] ss:$16 sps:$4 sm:$0xff]  }
  0x9c   :  { %1980 = vmatprep.subr.bf16.mxu1 %v3201_v39  ;;  %v3291_v39 = vld [vmem:[#allocation6 + $0x20c] ss:$16 sps:$4 sm:$0xff]  }
  0x9e   :  { %1938 = vmatpush2.bf16.msra.mxu0 %v3196_v40  ;;  %v3286_v40 = vld [vmem:[#allocation6 + $0x8] ss:$16 sps:$4 sm:$0xff]  }
  0x9f   :  { %1981 = vmatpush2.bf16.msra.mxu1 %v3199_v42  ;;  %1939 = vmatprep.subr.bf16.mxu0 %v3204_v43  ;;  %v3289_v42 = vld [vmem:[#allocation6 + $0x208] ss:$16 sps:$4 sm:$0xff]   ;;  %v3294_v43 = vld [vmem:[#allocation6 + $0x1ec] ss:$16 sps:$4 sm:$0xff]  }
  0xa0   :  { %1982 = vmatprep.subr.bf16.mxu1 %v3207_v44  ;;  %v3297_v44 = vld [vmem:[#allocation6 + $0x3ec] ss:$16 sps:$4 sm:$0xff]  }
  0xa2   :  { %1940 = vmatpush2.bf16.msra.mxu0 %v3202_v45  ;;  %v3292_v45 = vld [vmem:[#allocation6 + $0x1e8] ss:$16 sps:$4 sm:$0xff]  }
  0xa3   :  { %1983 = vmatpush2.bf16.msra.mxu1 %v3205_v46  ;;  %1941 = vmatprep.subr.bf16.mxu0 %v3210_v47  ;;  %v3295_v46 = vld [vmem:[#allocation6 + $0x3e8] ss:$16 sps:$4 sm:$0xff]   ;;  %v3300_v47 = vld [vmem:[#allocation6 + $0x1cc] ss:$16 sps:$4 sm:$0xff]  }
  0xa4   :  { %1984 = vmatprep.subr.bf16.mxu1 %v3213_v49  ;;  %v3303_v49 = vld [vmem:[#allocation6 + $0x3cc] ss:$16 sps:$4 sm:$0xff]  }
  0xa6   :  { %1942 = vmatpush2.bf16.msra.mxu0 %v3208_v50  ;;  %v3298_v50 = vld [vmem:[#allocation6 + $0x1c8] ss:$16 sps:$4 sm:$0xff]  }
  0xa7   :  { %1985 = vmatpush2.bf16.msra.mxu1 %v3211_v51  ;;  %1943 = vmatprep.subr.bf16.mxu0 %v3216_v52  ;;  %v3301_v51 = vld [vmem:[#allocation6 + $0x3c8] ss:$16 sps:$4 sm:$0xff]   ;;  %v3306_v52 = vld [vmem:[#allocation6 + $0x1ac] ss:$16 sps:$4 sm:$0xff]  }
  0xa8   :  { %1986 = vmatprep.subr.bf16.mxu1 %v3219_v53  ;;  %v3309_v53 = vld [vmem:[#allocation6 + $0x3ac] ss:$16 sps:$4 sm:$0xff]  }
  0xaa   :  { %1944 = vmatpush2.bf16.msra.mxu0 %v3214_v54  ;;  %v3304_v54 = vld [vmem:[#allocation6 + $0x1a8] ss:$16 sps:$4 sm:$0xff]  }
  0xab   :  { %1987 = vmatpush2.bf16.msra.mxu1 %v3217_v56  ;;  %1945 = vmatprep.subr.bf16.mxu0 %v3222_v57  ;;  %v3307_v56 = vld [vmem:[#allocation6 + $0x3a8] ss:$16 sps:$4 sm:$0xff]   ;;  %v3312_v57 = vld [vmem:[#allocation6 + $0x18c] ss:$16 sps:$4 sm:$0xff]  }
  0xac   :  { %1988 = vmatprep.subr.bf16.mxu1 %v3225_v58  ;;  %v3315_v58 = vld [vmem:[#allocation6 + $0x38c] ss:$16 sps:$4 sm:$0xff]  }
  0xae   :  { %1946 = vmatpush2.bf16.msra.mxu0 %v3220_v59  ;;  %v3310_v59 = vld [vmem:[#allocation6 + $0x188] ss:$16 sps:$4 sm:$0xff]  }
  0xaf   :  { %1989 = vmatpush2.bf16.msra.mxu1 %v3223_v60  ;;  %1947 = vmatprep.subr.bf16.mxu0 %v3228_v61  ;;  %v3313_v60 = vld [vmem:[#allocation6 + $0x388] ss:$16 sps:$4 sm:$0xff]   ;;  %v3318_v61 = vld [vmem:[#allocation6 + $0x16c] ss:$16 sps:$4 sm:$0xff]  }
  0xb0   :  { %1990 = vmatprep.subr.bf16.mxu1 %v3231_v62  ;;  %v3321_v62 = vld [vmem:[#allocation6 + $0x36c] ss:$16 sps:$4 sm:$0xff]  }
  0xb2   :  { %1948 = vmatpush2.bf16.msra.mxu0 %v3226_v63  ;;  %v3316_v63 = vld [vmem:[#allocation6 + $0x168] ss:$16 sps:$4 sm:$0xff]  }
  0xb3   :  { %1991 = vmatpush2.bf16.msra.mxu1 %v3229_v0  ;;  %2003 = vmatprep.subr.bf16.mxu0 %v3246_v5  ;;  %v3319_v0 = vld [vmem:[#allocation6 + $0x368] ss:$16 sps:$4 sm:$0xff]   ;;  %v3330_v5 = vld [vmem:[#allocation6 + $0x12c] ss:$16 sps:$4 sm:$0xff]  }
  0xb4   :  { %2046 = vmatprep.subr.bf16.mxu1 %v3249_v6  ;;  %v3333_v6 = vld [vmem:[#allocation6 + $0x32c] ss:$16 sps:$4 sm:$0xff]  }
  0xb5   :  { %1950 = vmatmul.mubr.bf16.vlgmr.msra.gmra.mxu0 %v3726_v7 }
  0xb6   :  { %1993 = vmatmul.mubr.bf16.vlgmr.msra.gmra.mxu1 %v3728_v8  ;;  %2004 = vmatpush1.bf16.msra.mxu0 %v3244_v9  ;;  %v3328_v9 = vld [vmem:[#allocation6 + $0x128] ss:$16 sps:$4 sm:$0xff]  }
  0xb7   :  { %2047 = vmatpush1.bf16.msra.mxu1 %v3247_v10  ;;  %2005 = vmatprep.subr.bf16.mxu0 %v3252_v11  ;;  %v3331_v10 = vld [vmem:[#allocation6 + $0x328] ss:$16 sps:$4 sm:$0xff]   ;;  %v3336_v11 = vld [vmem:[#allocation6 + $0x10c] ss:$16 sps:$4 sm:$0xff]  }
  0xb8   :  { %2048 = vmatprep.subr.bf16.mxu1 %v3255_v12  ;;  %2035 = vmatprep.mubr.bf16.mxu0 %v3668_v18  ;;  %v3271_v18 = vld [vmem:[#allocation6 + $0x268] ss:$16 sps:$4 sm:$0xff]   ;;  %v3339_v12 = vld [vmem:[#allocation6 + $0x30c] ss:$16 sps:$4 sm:$0xff]  }
  0xb9   :  { %2078 = vmatprep.mubr.bf16.mxu1 %v3671_v21  ;;  %v3276_v21 = vld [vmem:[#allocation6 + $0x4c] ss:$16 sps:$4 sm:$0xff]  }
  0xba   :  { %2006 = vmatpush1.bf16.msra.mxu0 %v3250_v13  ;;  %v3334_v13 = vld [vmem:[#allocation6 + $0x108] ss:$16 sps:$4 sm:$0xff]  }
  0xbb   :  { %2049 = vmatpush1.bf16.msra.mxu1 %v3253_v14  ;;  %2007 = vmatprep.subr.bf16.mxu0 %v3258_v15  ;;  %v3337_v14 = vld [vmem:[#allocation6 + $0x308] ss:$16 sps:$4 sm:$0xff]   ;;  %v3342_v15 = vld [vmem:[#allocation6 + $0x4ec] ss:$16 sps:$4 sm:$0xff]  }
  0xbc   :  { %2050 = vmatprep.subr.bf16.mxu1 %v3261_v16  ;;  %v3345_v16 = vld [vmem:[#allocation6 + $0x6ec] ss:$16 sps:$4 sm:$0xff]  }
  0xbe   :  { %2008 = vmatpush1.bf16.msra.mxu0 %v3256_v17  ;;  %v3340_v17 = vld [vmem:[#allocation6 + $0x4e8] ss:$16 sps:$4 sm:$0xff]  }
  0xbf   :  { %2051 = vmatpush1.bf16.msra.mxu1 %v3259_v19  ;;  %2009 = vmatprep.subr.bf16.mxu0 %v3264_v20  ;;  %v3343_v19 = vld [vmem:[#allocation6 + $0x6e8] ss:$16 sps:$4 sm:$0xff]   ;;  %v3348_v20 = vld [vmem:[#allocation6 + $0x4cc] ss:$16 sps:$4 sm:$0xff]  }
  0xc0   :  { %2052 = vmatprep.subr.bf16.mxu1 %v3267_v22  ;;  %v3351_v22 = vld [vmem:[#allocation6 + $0x6cc] ss:$16 sps:$4 sm:$0xff]  }
  0xc2   :  { %2010 = vmatpush1.bf16.msra.mxu0 %v3262_v23  ;;  %v3346_v23 = vld [vmem:[#allocation6 + $0x4c8] ss:$16 sps:$4 sm:$0xff]  }
  0xc3   :  { %2053 = vmatpush1.bf16.msra.mxu1 %v3265_v24  ;;  %2011 = vmatprep.subr.bf16.mxu0 %v3270_v25  ;;  %v3349_v24 = vld [vmem:[#allocation6 + $0x6c8] ss:$16 sps:$4 sm:$0xff]   ;;  %v3354_v25 = vld [vmem:[#allocation6 + $0x4ac] ss:$16 sps:$4 sm:$0xff]  }
  0xc4   :  { %2054 = vmatprep.subr.bf16.mxu1 %v3273_v26  ;;  %v3357_v26 = vld [vmem:[#allocation6 + $0x6ac] ss:$16 sps:$4 sm:$0xff]  }
  0xc6   :  { %2012 = vmatpush1.bf16.msra.mxu0 %v3268_v27  ;;  %v3352_v27 = vld [vmem:[#allocation6 + $0x4a8] ss:$16 sps:$4 sm:$0xff]  }
  0xc7   :  { %2055 = vmatpush1.bf16.msra.mxu1 %v3271_v18  ;;  %2013 = vmatprep.subr.bf16.mxu0 %v3276_v21  ;;  %v3355_v18 = vld [vmem:[#allocation6 + $0x6a8] ss:$16 sps:$4 sm:$0xff]   ;;  %v3360_v21 = vld [vmem:[#allocation6 + $0x48c] ss:$16 sps:$4 sm:$0xff]  }
  0xc8   :  { %2056 = vmatprep.subr.bf16.mxu1 %v3279_v28  ;;  %v3363_v28 = vld [vmem:[#allocation6 + $0x68c] ss:$16 sps:$4 sm:$0xff]  }
  0xca   :  { %2014 = vmatpush1.bf16.msra.mxu0 %v3274_v29  ;;  %v3366_v29 = vld [vmem:[#allocation6 + $0x46c] ss:$16 sps:$4 sm:$0xff]  }
  0xcb   :  { %2057 = vmatpush1.bf16.msra.mxu1 %v3277_v30  ;;  %2015 = vmatprep.subr.bf16.mxu0 %v3282_v31  ;;  %v3369_v30 = vld [vmem:[#allocation6 + $0x66c] ss:$16 sps:$4 sm:$0xff]   ;;  %v3364_v31 = vld [vmem:[#allocation6 + $0x468] ss:$16 sps:$4 sm:$0xff]  }
  0xcc   :  { %2058 = vmatprep.subr.bf16.mxu1 %v3285_v32  ;;  %v3375_v32 = vld [vmem:[#allocation6 + $0x64c] ss:$16 sps:$4 sm:$0xff]  }
  0xce   :  { %2016 = vmatpush1.bf16.msra.mxu0 %v3280_v33  ;;  %v3370_v33 = vld [vmem:[#allocation6 + $0x448] ss:$16 sps:$4 sm:$0xff]  }
  0xcf   :  { %2059 = vmatpush1.bf16.msra.mxu1 %v3283_v36  ;;  %2017 = vmatprep.subr.bf16.mxu0 %v3288_v38  ;;  %v3373_v36 = vld [vmem:[#allocation6 + $0x648] ss:$16 sps:$4 sm:$0xff]   ;;  %v3378_v38 = vld [vmem:[#allocation6 + $0x42c] ss:$16 sps:$4 sm:$0xff]  }
  0xd0   :  { %2060 = vmatprep.subr.bf16.mxu1 %v3291_v39  ;;  %v3381_v39 = vld [vmem:[#allocation6 + $0x62c] ss:$16 sps:$4 sm:$0xff]  }
  0xd2   :  { %2018 = vmatpush1.bf16.msra.mxu0 %v3286_v40  ;;  %v3376_v40 = vld [vmem:[#allocation6 + $0x428] ss:$16 sps:$4 sm:$0xff]  }
  0xd3   :  { %2061 = vmatpush1.bf16.msra.mxu1 %v3289_v42  ;;  %2019 = vmatprep.subr.bf16.mxu0 %v3294_v43  ;;  %v3379_v42 = vld [vmem:[#allocation6 + $0x628] ss:$16 sps:$4 sm:$0xff]   ;;  %v3384_v43 = vld [vmem:[#allocation6 + $0x40c] ss:$16 sps:$4 sm:$0xff]  }
  0xd4   :  { %2062 = vmatprep.subr.bf16.mxu1 %v3297_v44  ;;  %v3387_v44 = vld [vmem:[#allocation6 + $0x60c] ss:$16 sps:$4 sm:$0xff]  }
  0xd6   :  { %2020 = vmatpush2.bf16.msra.mxu0 %v3292_v45  ;;  %v3382_v45 = vld [vmem:[#allocation6 + $0x408] ss:$16 sps:$4 sm:$0xff]  }
  0xd7   :  { %2063 = vmatpush2.bf16.msra.mxu1 %v3295_v46  ;;  %2021 = vmatprep.subr.bf16.mxu0 %v3300_v47  ;;  %v3385_v46 = vld [vmem:[#allocation6 + $0x608] ss:$16 sps:$4 sm:$0xff]   ;;  %v3390_v47 = vld [vmem:[#allocation6 + $0x5ec] ss:$16 sps:$4 sm:$0xff]  }
  0xd8   :  { %2064 = vmatprep.subr.bf16.mxu1 %v3303_v49  ;;  %v3393_v49 = vld [vmem:[#allocation6 + $0x7ec] ss:$16 sps:$4 sm:$0xff]  }
  0xda   :  { %2022 = vmatpush2.bf16.msra.mxu0 %v3298_v50  ;;  %v3388_v50 = vld [vmem:[#allocation6 + $0x5e8] ss:$16 sps:$4 sm:$0xff]  }
  0xdb   :  { %2065 = vmatpush2.bf16.msra.mxu1 %v3301_v51  ;;  %2023 = vmatprep.subr.bf16.mxu0 %v3306_v52  ;;  %v3391_v51 = vld [vmem:[#allocation6 + $0x7e8] ss:$16 sps:$4 sm:$0xff]   ;;  %v3396_v52 = vld [vmem:[#allocation6 + $0x5cc] ss:$16 sps:$4 sm:$0xff]  }
  0xdc   :  { %2066 = vmatprep.subr.bf16.mxu1 %v3309_v53  ;;  %v3399_v53 = vld [vmem:[#allocation6 + $0x7cc] ss:$16 sps:$4 sm:$0xff]  }
  0xde   :  { %2024 = vmatpush2.bf16.msra.mxu0 %v3304_v54  ;;  %v3394_v54 = vld [vmem:[#allocation6 + $0x5c8] ss:$16 sps:$4 sm:$0xff]  }
  0xdf   :  { %2067 = vmatpush2.bf16.msra.mxu1 %v3307_v56  ;;  %2025 = vmatprep.subr.bf16.mxu0 %v3312_v57  ;;  %v3397_v56 = vld [vmem:[#allocation6 + $0x7c8] ss:$16 sps:$4 sm:$0xff]   ;;  %v3402_v57 = vld [vmem:[#allocation6 + $0x5ac] ss:$16 sps:$4 sm:$0xff]  }
  0xe0   :  { %2068 = vmatprep.subr.bf16.mxu1 %v3315_v58  ;;  %v3405_v58 = vld [vmem:[#allocation6 + $0x7ac] ss:$16 sps:$4 sm:$0xff]  }
  0xe2   :  { %2026 = vmatpush2.bf16.msra.mxu0 %v3310_v59  ;;  %v3400_v59 = vld [vmem:[#allocation6 + $0x5a8] ss:$16 sps:$4 sm:$0xff]  }
  0xe3   :  { %2069 = vmatpush2.bf16.msra.mxu1 %v3313_v60  ;;  %2027 = vmatprep.subr.bf16.mxu0 %v3318_v61  ;;  %v3403_v60 = vld [vmem:[#allocation6 + $0x7a8] ss:$16 sps:$4 sm:$0xff]   ;;  %v3408_v61 = vld [vmem:[#allocation6 + $0x58c] ss:$16 sps:$4 sm:$0xff]  }
  0xe4   :  { %2070 = vmatprep.subr.bf16.mxu1 %v3321_v62  ;;  %v3411_v62 = vld [vmem:[#allocation6 + $0x78c] ss:$16 sps:$4 sm:$0xff]  }
  0xe6   :  { %2028 = vmatpush2.bf16.msra.mxu0 %v3316_v63  ;;  %v3406_v63 = vld [vmem:[#allocation6 + $0x588] ss:$16 sps:$4 sm:$0xff]  }
  0xe7   :  { %2071 = vmatpush2.bf16.msra.mxu1 %v3319_v0  ;;  %2029 = vmatprep.subr.bf16.mxu0 %v3324_v1  ;;  %v3409_v0 = vld [vmem:[#allocation6 + $0x788] ss:$16 sps:$4 sm:$0xff]   ;;  %v3414_v1 = vld [vmem:[#allocation6 + $0x56c] ss:$16 sps:$4 sm:$0xff]  }
  0xe8   :  { %2072 = vmatprep.subr.bf16.mxu1 %v3327_v2  ;;  %v3417_v2 = vld [vmem:[#allocation6 + $0x76c] ss:$16 sps:$4 sm:$0xff]  }
  0xea   :  { %2030 = vmatpush2.bf16.msra.mxu0 %v3322_v3  ;;  %v3412_v3 = vld [vmem:[#allocation6 + $0x568] ss:$16 sps:$4 sm:$0xff]  }
  0xeb   :  { %2073 = vmatpush2.bf16.msra.mxu1 %v3325_v4  ;;  %2031 = vmatprep.subr.bf16.mxu0 %v3330_v5  ;;  %v3415_v4 = vld [vmem:[#allocation6 + $0x768] ss:$16 sps:$4 sm:$0xff]   ;;  %v3420_v5 = vld [vmem:[#allocation6 + $0x54c] ss:$16 sps:$4 sm:$0xff]  }
  0xec   :  { %2074 = vmatprep.subr.bf16.mxu1 %v3333_v6  ;;  %v3423_v6 = vld [vmem:[#allocation6 + $0x74c] ss:$16 sps:$4 sm:$0xff]  }
  0xee   :  { %2032 = vmatpush2.bf16.msra.mxu0 %v3328_v9  ;;  %v3418_v9 = vld [vmem:[#allocation6 + $0x548] ss:$16 sps:$4 sm:$0xff]  }
  0xef   :  { %2075 = vmatpush2.bf16.msra.mxu1 %v3331_v10  ;;  %2033 = vmatprep.subr.bf16.mxu0 %v3336_v11  ;;  %v3421_v10 = vld [vmem:[#allocation6 + $0x748] ss:$16 sps:$4 sm:$0xff]   ;;  %v3426_v11 = vld [vmem:[#allocation6 + $0x52c] ss:$16 sps:$4 sm:$0xff]  }
  0xf0   :  { %2076 = vmatprep.subr.bf16.mxu1 %v3339_v12  ;;  %v3429_v12 = vld [vmem:[#allocation6 + $0x72c] ss:$16 sps:$4 sm:$0xff]  }
  0xf2   :  { %2034 = vmatpush2.bf16.msra.mxu0 %v3334_v13  ;;  %v3424_v13 = vld [vmem:[#allocation6 + $0x528] ss:$16 sps:$4 sm:$0xff]  }
  0xf3   :  { %2077 = vmatpush2.bf16.msra.mxu1 %v3337_v14  ;;  %2089 = vmatprep.subr.bf16.mxu0 %v3342_v15  ;;  %v3427_v14 = vld [vmem:[#allocation6 + $0x728] ss:$16 sps:$4 sm:$0xff]   ;;  %v3432_v15 = vld [vmem:[#allocation6 + $0x50c] ss:$16 sps:$4 sm:$0xff]  }
  0xf4   :  { %2132 = vmatprep.subr.bf16.mxu1 %v3345_v16  ;;  %v3435_v16 = vld [vmem:[#allocation6 + $0x70c] ss:$16 sps:$4 sm:$0xff]  }
  0xf5   :  { %2036 = vmatmul.mubr.bf16.vlgmr.msra.gmra.mxu0 %v3674_v34  ;;  %v3358_v34 = vld [vmem:[#allocation6 + $0x488] ss:$16 sps:$4 sm:$0xff]  }
  0xf6   :  { %2079 = vmatmul.mubr.bf16.vlgmr.msra.gmra.mxu1 %v3676_v35  ;;  %2090 = vmatpush1.bf16.msra.mxu0 %v3340_v17  ;;  %v3361_v35 = vld [vmem:[#allocation6 + $0x688] ss:$16 sps:$4 sm:$0xff]  }
  0xf7   :  { %2133 = vmatpush1.bf16.msra.mxu1 %v3343_v19  ;;  %2091 = vmatprep.subr.bf16.mxu0 %v3348_v20  ;;  %v3430_v17 = vld [vmem:[#allocation6 + $0x508] ss:$16 sps:$4 sm:$0xff]   ;;  %v3436_v20 = vld [vmem:[#allocation9 + $0x78] sm:$0xff]  }
  0xf8   :  { %2134 = vmatprep.subr.bf16.mxu1 %v3351_v22  ;;  %2121 = vmatprep.mubr.bf16.mxu0 %v3710_v37  ;;  %v3367_v37 = vld [vmem:[#allocation6 + $0x668] ss:$16 sps:$4 sm:$0xff]   ;;  %v3437_v22 = vld [vmem:[#allocation9 + $0x38] sm:$0xff]  }
  0xf9   :  { %2164 = vmatprep.mubr.bf16.mxu1 %v3715_v55  ;;  %v3372_v55 = vld [vmem:[#allocation6 + $0x44c] ss:$16 sps:$4 sm:$0xff]   ;;  %v3433_v19 = vld [vmem:[#allocation6 + $0x708] ss:$16 sps:$4 sm:$0xff]  }
  0xfa   :  { %2092 = vmatpush1.bf16.msra.mxu0 %v3346_v23  ;;  %v3438_v23 = vld [vmem:[#allocation9 + $0x70] sm:$0xff]  }
  0xfb   :  { %2135 = vmatpush1.bf16.msra.mxu1 %v3349_v24  ;;  %2093 = vmatprep.subr.bf16.mxu0 %v3354_v25  ;;  %v3439_v24 = vld [vmem:[#allocation9 + $0x30] sm:$0xff]   ;;  %v3440_v25 = vld [vmem:[#allocation9 + $0x68] sm:$0xff]  }
  0xfc   :  { %2136 = vmatprep.subr.bf16.mxu1 %v3357_v26  ;;  %v3441_v26 = vld [vmem:[#allocation9 + $0x28] sm:$0xff]  }
  0xfe   :  { %2094 = vmatpush1.bf16.msra.mxu0 %v3352_v27  ;;  %v3442_v27 = vld [vmem:[#allocation9 + $0x60] sm:$0xff]  }
  0xff   :  { %2137 = vmatpush1.bf16.msra.mxu1 %v3355_v18  ;;  %2095 = vmatprep.subr.bf16.mxu0 %v3360_v21  ;;  %v3443_v18 = vld [vmem:[#allocation9 + $0x20] sm:$0xff]   ;;  %v3444_v21 = vld [vmem:[#allocation9 + $0x58] sm:$0xff]  }
 0x100   :  { %2138 = vmatprep.subr.bf16.mxu1 %v3363_v28  ;;  %v3445_v28 = vld [vmem:[#allocation9 + $0x18] sm:$0xff]  }
 0x102   :  { %2096 = vmatpush1.bf16.msra.mxu0 %v3358_v34  ;;  %v3446_v34 = vld [vmem:[#allocation9 + $0x50] sm:$0xff]  }
 0x103   :  { %2139 = vmatpush1.bf16.msra.mxu1 %v3361_v35  ;;  %2097 = vmatprep.subr.bf16.mxu0 %v3366_v29  ;;  %v3449_v35 = vld [vmem:[#allocation9 + $0x8] sm:$0xff]   ;;  %v3450_v29 = vld [vmem:[#allocation9 + $0x40] sm:$0xff]  }
 0x104   :  { %2140 = vmatprep.subr.bf16.mxu1 %v3369_v30  ;;  %v3451_v30 = vld [vmem:[#allocation9] sm:$0xff]  }
 0x106   :  { %2098 = vmatpush1.bf16.msra.mxu0 %v3364_v31 }
 0x107   :  { %2141 = vmatpush1.bf16.msra.mxu1 %v3367_v37  ;;  %2099 = vmatprep.subr.bf16.mxu0 %v3372_v55 }
 0x108   :  { %2142 = vmatprep.subr.bf16.mxu1 %v3375_v32 }
 0x10a   :  { %2100 = vmatpush1.bf16.msra.mxu0 %v3370_v33 }
 0x10b   :  { %2143 = vmatpush1.bf16.msra.mxu1 %v3373_v36  ;;  %2101 = vmatprep.subr.bf16.mxu0 %v3378_v38  ;;  %v2206_v38 = vsub.s32 0, %v3655_v48 }
 0x10c   :  { %2144 = vmatprep.subr.bf16.mxu1 %v3381_v39 }
 0x10e   :  { %2102 = vmatpush1.bf16.msra.mxu0 %v3376_v40 }
 0x10f   :  { %2145 = vmatpush1.bf16.msra.mxu1 %v3379_v42  ;;  %2103 = vmatprep.subr.bf16.mxu0 %v3384_v43  ;;  %v3741_v42 = vld [vmem:[#allocation8] sm:$0xf] }
 0x110   :  { %2146 = vmatprep.subr.bf16.mxu1 %v3387_v44  ;;  %v2210_v44 = vsub.s32 1, %v3655_v48 }
 0x112   :  { %2104 = vmatpush1.bf16.msra.mxu0 %v3382_v45 }
 0x113   :  { %2147 = vmatpush1.bf16.msra.mxu1 %v3385_v46  ;;  %2105 = vmatprep.subr.bf16.mxu0 %v3390_v47 }
 0x114   :  { %2148 = vmatprep.subr.bf16.mxu1 %v3393_v49 }
 0x116   :  { %2106 = vmatpush2.bf16.msra.mxu0 %v3388_v50  ;;  %v2207_v50 = vrot.slane %v3741_v42, %v2206_v38 }
 0x117   :  { %2149 = vmatpush2.bf16.msra.mxu1 %v3391_v51  ;;  %2107 = vmatprep.subr.bf16.mxu0 %v3396_v52 }
 0x118   :  { %2150 = vmatprep.subr.bf16.mxu1 %v3399_v53 }
 0x11a   :  { %2108 = vmatpush2.bf16.msra.mxu0 %v3394_v54 }
 0x11b   :  { %2151 = vmatpush2.bf16.msra.mxu1 %v3397_v56  ;;  %2109 = vmatprep.subr.bf16.mxu0 %v3402_v57  ;;  %v2211_v57 = vrot.slane %v3741_v42, %v2210_v44 }
 0x11c   :  { %2152 = vmatprep.subr.bf16.mxu1 %v3405_v58 }
 0x11e   :  { %2110 = vmatpush2.bf16.msra.mxu0 %v3400_v59  ;;  %v3452_v59 = vld [vmem:[#allocation9 + $0xf8] sm:$0xff]  }
 0x11f   :  { %2153 = vmatpush2.bf16.msra.mxu1 %v3403_v60  ;;  %2111 = vmatprep.subr.bf16.mxu0 %v3408_v61 }
 0x120   :  { %2154 = vmatprep.subr.bf16.mxu1 %v3411_v62 }
 0x122   :  { %2112 = vmatpush2.bf16.msra.mxu0 %v3406_v63 }
 0x123   :  { %2155 = vmatpush2.bf16.msra.mxu1 %v3409_v0  ;;  %2113 = vmatprep.subr.bf16.mxu0 %v3414_v1  ;;  %v3453_v0 = vld [vmem:[#allocation9 + $0xb8] sm:$0xff]  }
 0x124   :  { %2156 = vmatprep.subr.bf16.mxu1 %v3417_v2 }
 0x126   :  { %2114 = vmatpush2.bf16.msra.mxu0 %v3412_v3 }
 0x127   :  { %2157 = vmatpush2.bf16.msra.mxu1 %v3415_v4  ;;  %2115 = vmatprep.subr.bf16.mxu0 %v3420_v5 }
 0x128   :  { %2158 = vmatprep.subr.bf16.mxu1 %v3423_v6 }
 0x12a   :  { %2116 = vmatpush2.bf16.msra.mxu0 %v3418_v9  ;;  %v3454_v9 = vld [vmem:[#allocation9 + $0xf0] sm:$0xff]  }
 0x12b   :  { %2159 = vmatpush2.bf16.msra.mxu1 %v3421_v10  ;;  %2117 = vmatprep.subr.bf16.mxu0 %v3426_v11 }
 0x12c   :  { %2160 = vmatprep.subr.bf16.mxu1 %v3429_v12 }
 0x12e   :  { %2118 = vmatpush2.bf16.msra.mxu0 %v3424_v13 }
 0x12f   :  { %2161 = vmatpush2.bf16.msra.mxu1 %v3427_v14  ;;  %2119 = vmatprep.subr.bf16.mxu0 %v3432_v15  ;;  %v3455_v14 = vld [vmem:[#allocation9 + $0xb0] sm:$0xff]  }
 0x130   :  { %2162 = vmatprep.subr.bf16.mxu1 %v3435_v16 }
 0x132   :  { %2120 = vmatpush2.bf16.msra.mxu0 %v3430_v17 }
 0x133   :  { %2163 = vmatpush2.bf16.msra.mxu1 %v3433_v19  ;;  %2972 = vmatprep.subr.bf16.mxu0 %v3436_v20  ;;  %v3456_v20 = vld [vmem:[#allocation9 + $0xe8] sm:$0xff]  }
 0x134   :  { %2994 = vmatprep.subr.bf16.mxu1 %v3452_v59  ;;  %v2218_v59 = vsub.s32 3, %v3655_v48 }
 0x135   :  { %2122 = vmatmul.mubr.bf16.vlgmr.msra.gmra.mxu0 %v3726_v7  ;;  %v3447_v7 = vld [vmem:[#allocation9 + $0x10] sm:$0xff]   ;;  %v1865_v31 = vpop.f32.mrf.mxu0 }
 0x136   :  { %2165 = vmatmul.mubr.bf16.vlgmr.msra.gmra.mxu1 %v3728_v8  ;;  %2973 = vmatpush3.bf16.msra.mxu0 %v3437_v22  ;;  %v3448_v8 = vld [vmem:[#allocation9 + $0x48] sm:$0xff]   ;;  %v1908_v37 = vpop.f32.mrf.mxu1 }
 0x137   :  { %2974 = vmatprep.subr.bf16.mxu0 %v3438_v23  ;;  %v1867_v55 = vpop.f32.mrf.mxu0  ;;  %v1909_v43 = vadd.f32 %v1908_v37, %v1865_v31  ;;  %2995 = vmatpush3.bf16.msra.mxu1 %v3453_v0  ;;  %v3457_v23 = vld [vmem:[#allocation9 + $0xa8] sm:$0xff]  }
 0x138   :  { %v1910_v32 = vpop.f32.mrf.mxu1  ;;  %2996 = vmatprep.subr.bf16.mxu1 %v3454_v9  ;;  %v3465_v31 = vld [vmem:[#allocation9 + $0x88] sm:$0xff]  }
 0x139   :  { %v1869_v33 = vpop.f32.mrf.mxu0  ;;  %v1911_v47 = vadd.f32 %v1910_v32, %v1867_v55 }
 0x13a   :  { %2975 = vmatpush3.bf16.msra.mxu0 %v3439_v24  ;;  %v1912_v36 = vpop.f32.mrf.mxu1 }
 0x13b   :  { %2976 = vmatprep.subr.bf16.mxu0 %v3440_v25  ;;  %v1871_v39 = vpop.f32.mrf.mxu0  ;;  %v1913_v53 = vadd.f32 %v1912_v36, %v1869_v33  ;;  %2997 = vmatpush3.bf16.msra.mxu1 %v3455_v14  ;;  %v3466_v33 = vld [vmem:[#allocation9 + $0xc0] sm:$0xff]  }
 0x13c   :  { %v1914_v40 = vpop.f32.mrf.mxu1  ;;  %2998 = vmatprep.subr.bf16.mxu1 %v3456_v20  ;;  %v3467_v36 = vld [vmem:[#allocation9 + $0x80] sm:$0xff]  }
 0x13d   :  { %v1915_v1 = vadd.f32 %v1914_v40, %v1871_v39 }
 0x13e   :  { %2977 = vmatpush3.bf16.msra.mxu0 %v3441_v26  ;;  %v3458_v26 = vld [vmem:[#allocation9 + $0xe0] sm:$0xff]  }
 0x13f   :  { %2978 = vmatprep.subr.bf16.mxu0 %v3442_v27  ;;  %2999 = vmatpush3.bf16.msra.mxu1 %v3457_v23  ;;  %v3459_v27 = vld [vmem:[#allocation9 + $0xa0] sm:$0xff]  }
 0x140   :  { %3000 = vmatprep.subr.bf16.mxu1 %v3458_v26 }
 0x142   :  { %2979 = vmatpush3.bf16.msra.mxu0 %v3443_v18  ;;  %v3460_v18 = vld [vmem:[#allocation9 + $0xd8] sm:$0xff]  }
 0x143   :  { %2980 = vmatprep.subr.bf16.mxu0 %v3444_v21  ;;  %3001 = vmatpush3.bf16.msra.mxu1 %v3459_v27  ;;  %v3461_v21 = vld [vmem:[#allocation9 + $0x98] sm:$0xff]  }
 0x144   :  { %3002 = vmatprep.subr.bf16.mxu1 %v3460_v18 }
 0x146   :  { %2981 = vmatpush3.bf16.msra.mxu0 %v3445_v28  ;;  %v3462_v28 = vld [vmem:[#allocation9 + $0xd0] sm:$0xff]  }
 0x147   :  { %2982 = vmatprep.subr.bf16.mxu0 %v3446_v34  ;;  %3003 = vmatpush3.bf16.msra.mxu1 %v3461_v21  ;;  %v3463_v34 = vld [vmem:[#allocation9 + $0x90] sm:$0xff]  }
 0x148   :  { %3004 = vmatprep.subr.bf16.mxu1 %v3462_v28 }
 0x14a   :  { %2983 = vmatpush3.bf16.msra.mxu0 %v3447_v7 }
 0x14b   :  { %2984 = vmatprep.subr.bf16.mxu0 %v3448_v8  ;;  %3005 = vmatpush3.bf16.msra.mxu1 %v3463_v34 }
 0x14e   :  { %2985 = vmatpush3.bf16.msra.mxu0 %v3449_v35 }
 0x14f   :  { %2986 = vmatprep.subr.bf16.mxu0 %v3450_v29  ;;  %v3464_v29 = vld [vmem:[#allocation9 + $0xc8] sm:$0xff]  }
 0x150   :  { %3006 = vmatprep.subr.bf16.mxu1 %v3464_v29 }
 0x151   :  { %3007 = vmatpush3.bf16.msra.mxu1 %v3465_v31 }
 0x152   :  { %2987 = vmatpush3.bf16.msra.mxu0 %v3451_v30  ;;  %3008 = vmatprep.subr.bf16.mxu1 %v3466_v33 }
 0x155   :  { %3009 = vmatpush3.bf16.msra.mxu1 %v3467_v36 }
 0x175   :  { %v1951_v45 = vpop.f32.mrf.mxu0 }
 0x176   :  { %v1994_v46 = vpop.f32.mrf.mxu1  ;;  %v1952_v49 = vadd.f32 %v1951_v45, %v1909_v43 }
 0x177   :  { %v1953_v51 = vpop.f32.mrf.mxu0 }
 0x178   :  { %v1996_v52 = vpop.f32.mrf.mxu1  ;;  %v1995_v54 = vadd.f32 %v1994_v46, %v1952_v49  ;;  %v1954_v56 = vadd.f32 %v1953_v51, %v1911_v47 }
 0x179   :  { %v1955_v58 = vpop.f32.mrf.mxu0 }
 0x17a   :  { %v3746_v60 = vadd.f32 %v2207_v50, %v1995_v54  ;;  %v1997_v61 = vadd.f32 %v1996_v52, %v1954_v56  ;;  %v1956_v62 = vadd.f32 %v1955_v58, %v1913_v53  ;;  %v1998_v63 = vpop.f32.mrf.mxu1  ;;  %v2214_v54 = vsub.s32 2, %v3655_v48 }
 0x17b   :  { %v1957_v2 = vpop.f32.mrf.mxu0 }
 0x17c   :  { %v2240_v3 = vmin.f32 %v3746_v60, 0.0  ;;  %v2225_v4 = vadd.f32 %v2211_v57, %v1997_v61  ;;  %v1999_v5 = vadd.f32 %v1998_v63, %v1956_v62  ;;  %v1958_v6 = vadd.f32 %v1957_v2, %v1915_v1  ;;  %v2000_v13 = vpop.f32.mrf.mxu1 }
 0x17d   :  { %vm2232_vm3 = vcmp.gt.f32.partialorder %v3746_v60, 0.0  ;;  %v2215_v0 = vrot.slane %v3741_v42, %v2214_v54 }
 0x17e   :  { %v2248_v10 = vmul.f32 1.442695, %v2240_v3  ;;  %v2241_v11 = vmin.f32 %v2225_v4, 0.0  ;;  %v2228_v12 = vadd.f32 %v2207_v50, %v1999_v5  ;;  %v2001_v15 = vadd.f32 %v2000_v13, %v1958_v6 }
 0x17f   :  { %vm2233_vm1 = vcmp.gt.f32.partialorder %v2225_v4, 0.0  ;;  %v2219_v6 = vrot.slane %v3741_v42, %v2218_v59 }
 0x180   :  { %v2250_v16 = vmul.f32 1.442695, %v2241_v11  ;;  %v2244_v17 = vmin.f32 %v2228_v12, 0.0  ;;  %v2229_v19 = vadd.f32 %v2211_v57, %v2001_v15  ;;  %3468 = vpow2.f32 %v2248_v10 }
 0x181   :  { %vm2236_vm0 = vcmp.gt.f32.partialorder %v2228_v12, 0.0 }
 0x182   :  { %v2256_v22 = vmul.f32 1.442695, %v2244_v17  ;;  %3470 = vpow2.f32 %v2250_v16  ;;  %v2245_v24 = vmin.f32 %v2229_v19, 0.0  ;;  %vm2237_vm2 = vcmp.gt.f32.partialorder %v2229_v19, 0.0 }
 0x184   :  { %3472 = vpow2.f32 %v2256_v22  ;;  %v2258_v25 = vmul.f32 1.442695, %v2245_v24 }
 0x186   :  { %3474 = vpow2.f32 %v2258_v25 }
 0x18d   :  { %v3469_v7 = vpop.eup %3468 }
 0x18e   :  { %v2931_v32 = vadd.f32 -1.0, %v3469_v7 }
 0x18f   :  { %v3471_v8 = vpop.eup %3470 }
 0x190   :  { %v2932_v37 = vadd.f32 -1.0, %v3471_v8  ;;  %v2272_v44 = vsel %vm2232_vm3, %v3746_v60, %v2931_v32 }
 0x191   :  { %v3473_v35 = vpop.eup %3472 }
 0x192   :  { %v2935_v30 = vadd.f32 -1.0, %v3473_v35  ;;  %v2273_v40 = vsel %vm2233_vm1, %v2225_v4, %v2932_v37 }
 0x193   :  { %v3475_v55 = vpop.eup %3474 }
 0x194   :  { %v2936_v38 = vadd.f32 -1.0, %v3475_v55  ;;  %v2276_v39 = vsel %vm2236_vm0, %v2228_v12, %v2935_v30 }
 0x195   :  { %v2280_v46 = vpack.c.bf16 %v2276_v39, %v2272_v44 }
 0x196   :  { %v2277_v43 = vsel %vm2237_vm2, %v2229_v19, %v2936_v38 }
 0x197   :  { %v2281_v45 = vpack.c.bf16 %v2277_v43, %v2273_v40 }
 0x199   :  { %2579 = vmatprep.mubr.bf16.mxu0 %v2281_v45 }
 0x19a   :  { %2580 = vmatmul.mubr.bf16.vlgmr.msra.gmra.mxu0 %v2280_v46  ;;  %v2939_v46 = vld [vmem:[%s3770_s4] ss:$0 sm:$0xff] }
 0x1b5   :  { %v2037_v47 = vpop.f32.mrf.mxu0 }
 0x1b6   :  { %v2080_v49 = vpop.f32.mrf.mxu1 }
 0x1b7   :  { %v2039_v50 = vpop.f32.mrf.mxu0  ;;  %v2081_v58 = vadd.f32 %v2080_v49, %v2037_v47 }
 0x1b8   :  { %v2082_v51 = vpop.f32.mrf.mxu1 }
 0x1b9   :  { %v2041_v52 = vpop.f32.mrf.mxu0  ;;  %v2083_v62 = vadd.f32 %v2082_v51, %v2039_v50  ;;  %v2630_v50 = vand.u32 127, %v134_v41 }
 0x1ba   :  { %v2084_v53 = vpop.f32.mrf.mxu1 }
 0x1bb   :  { %v2043_v56 = vpop.f32.mrf.mxu0  ;;  %v2085_v3 = vadd.f32 %v2084_v53, %v2041_v52  ;;  %vm2631_vm8 = vcmp.lt.s32.totalorder %v2630_v50, 8 }
 0x1bc   :  { %v2086_v57 = vpop.f32.mrf.mxu1 }
 0x1bd   :  { %v2087_v14 = vadd.f32 %v2086_v57, %v2043_v56 }
 0x1f5   :  { %v2123_v61 = vpop.f32.mrf.mxu0 }
 0x1f6   :  { %v2166_v60 = vpop.f32.mrf.mxu1  ;;  %v2124_v63 = vadd.f32 %v2123_v61, %v2081_v58 }
 0x1f7   :  { %v2125_v1 = vpop.f32.mrf.mxu0 }
 0x1f8   :  { %v2168_v2 = vpop.f32.mrf.mxu1  ;;  %v2167_v4 = vadd.f32 %v2166_v60, %v2124_v63  ;;  %v2126_v5 = vadd.f32 %v2125_v1, %v2083_v62 }
 0x1f9   :  { %v2127_v9 = vpop.f32.mrf.mxu0 }
 0x1fa   :  { %v2226_v10 = vadd.f32 %v2215_v0, %v2167_v4  ;;  %v2169_v11 = vadd.f32 %v2168_v2, %v2126_v5  ;;  %v2128_v12 = vadd.f32 %v2127_v9, %v2085_v3  ;;  %v2170_v13 = vpop.f32.mrf.mxu1 }
 0x1fb   :  { %v2129_v48 = vpop.f32.mrf.mxu0 }
 0x1fc   :  { %v2242_v15 = vmin.f32 %v2226_v10, 0.0  ;;  %v2227_v16 = vadd.f32 %v2219_v6, %v2169_v11  ;;  %v2171_v17 = vadd.f32 %v2170_v13, %v2128_v12  ;;  %v2130_v19 = vadd.f32 %v2129_v48, %v2087_v14  ;;  %v2172_v24 = vpop.f32.mrf.mxu1 }
 0x1fd   :  { %vm2234_vm7 = vcmp.gt.f32.partialorder %v2226_v10, 0.0 }
 0x1fe   :  { %v2252_v20 = vmul.f32 1.442695, %v2242_v15  ;;  %v2243_v22 = vmin.f32 %v2227_v16, 0.0  ;;  %v2230_v23 = vadd.f32 %v2215_v0, %v2171_v17  ;;  %v2173_v25 = vadd.f32 %v2172_v24, %v2130_v19 }
 0x1ff   :  { %vm2235_vm5 = vcmp.gt.f32.partialorder %v2227_v16, 0.0 }
 0x200   :  { %v2254_v26 = vmul.f32 1.442695, %v2243_v22  ;;  %v2246_v27 = vmin.f32 %v2230_v23, 0.0  ;;  %v2231_v18 = vadd.f32 %v2219_v6, %v2173_v25  ;;  %3476 = vpow2.f32 %v2252_v20 }
 0x201   :  { %vm2238_vm4 = vcmp.gt.f32.partialorder %v2230_v23, 0.0 }
 0x202   :  { %v2260_v42 = vmul.f32 1.442695, %v2246_v27  ;;  %3478 = vpow2.f32 %v2254_v26  ;;  %v2247_v21 = vmin.f32 %v2231_v18, 0.0  ;;  %vm2239_vm6 = vcmp.gt.f32.partialorder %v2231_v18, 0.0 }
 0x204   :  { %3480 = vpow2.f32 %v2260_v42  ;;  %v2262_v28 = vmul.f32 1.442695, %v2247_v21 }
 0x206   :  { %3482 = vpow2.f32 %v2262_v28 }
 0x20d   :  { %v3477_v34 = vpop.eup %3476 }
 0x20e   :  { %v2933_v31 = vadd.f32 -1.0, %v3477_v34 }
 0x20f   :  { %v3479_v7 = vpop.eup %3478 }
 0x210   :  { %v2934_v29 = vadd.f32 -1.0, %v3479_v7  ;;  %v2274_v36 = vsel %vm2234_vm7, %v2226_v10, %v2933_v31 }
 0x211   :  { %v3481_v8 = vpop.eup %3480 }
 0x212   :  { %v2937_v35 = vadd.f32 -1.0, %v3481_v8  ;;  %v2275_v32 = vsel %vm2235_vm5, %v2227_v16, %v2934_v29 }
 0x213   :  { %v3483_v30 = vpop.eup %3482 }
 0x214   :  { %v2938_v37 = vadd.f32 -1.0, %v3483_v30  ;;  %v2278_v55 = vsel %vm2238_vm4, %v2230_v23, %v2937_v35 }
 0x215   :  { %v2282_v39 = vpack.c.bf16 %v2278_v55, %v2274_v36 }
 0x216   :  { %v2279_v33 = vsel %vm2239_vm6, %v2231_v18, %v2938_v37 }
 0x217   :  { %v2283_v38 = vpack.c.bf16 %v2279_v33, %v2275_v32 }
 0x219   :  { %2620 = vmatprep.mubr.bf16.mxu1 %v2283_v38 }
 0x21a   :  { %2621 = vmatmul.mubr.bf16.vlgmr.msra.gmra.mxu1 %v2282_v39 }
 0x25a   :  { %v2988_v40 = vpop.f32.mrf.mxu0 }
 0x25c   :  { %v2989_v43 = vpop.f32.mrf.mxu0 }
 0x25d   :  { %v2990_v45 = vadd.f32 %v2989_v43, %v2988_v40 }
 0x25e   :  { %v2991_v44 = vpop.f32.mrf.mxu0 }
 0x25f   :  { %v2582_v52 = vadd.f32 %v2990_v45, %v2939_v46 }
 0x260   :  { %v2992_v47 = vpop.f32.mrf.mxu0 }
 0x261   :  { %v2993_v53 = vadd.f32 %v2992_v47, %v2991_v44 }
 0x263   :  { %v2585_v59 = vadd.f32 %v2993_v53, %v2939_v46 }
 0x2da   :  { %v3010_v49 = vpop.f32.mrf.mxu1 }
 0x2dc   :  { %v3011_v51 = vpop.f32.mrf.mxu1 }
 0x2dd   :  { %v3012_v54 = vadd.f32 %v3011_v51, %v3010_v49 }
 0x2de   :  { %v3013_v56 = vpop.f32.mrf.mxu1 }
 0x2df   :  { %v2623_v57 = vadd.f32 %v3012_v54, %v2582_v52 }
 0x2e0   :  { %v3014_v58 = vpop.f32.mrf.mxu1 }
 0x2e1   :  { %v3015_v61 = vadd.f32 %v3014_v58, %v3013_v56  ;;  %v2632_v60 = vsel %vm2631_vm8, %v2623_v57, -inf }
 0x2e2   :  { %2634 = vmax.xlane.f32.xlu0 %v2632_v60 }
 0x2e3   :  { %v2626_v62 = vadd.f32 %v3015_v61, %v2585_v59 }
 0x2e5   :  { %v2633_v63 = vsel %vm2631_vm8, %v2626_v62, -inf }
 0x2e6   :  { %2636 = vmax.xlane.f32.xlu0 %v2633_v63 }
 0x36b   :  { %v2635_v0 = vpop.xlane.xlu0 %2634 }
 0x36c   :  { %v2638_v1 = vsub.f32 %v2632_v60, %v2635_v0 }
 0x36e   :  { %v2640_v41 = vmul.f32 1.442695, %v2638_v1 }
 0x36f   :  { %v2637_v2 = vpop.xlane.xlu0 %2636 }
 0x370   :  { %3484 = vpow2.f32 %v2640_v41  ;;  %v2639_v3 = vsub.f32 %v2633_v63, %v2637_v2 }
 0x372   :  { %v2642_v4 = vmul.f32 1.442695, %v2639_v3 }
 0x374   :  { %3486 = vpow2.f32 %v2642_v4 }
 0x37d   :  { %v3485_v5 = vpop.eup %3484 }
 0x37e   :  { %2644 = vadd.xlane.f32.xlu1 %v3485_v5 }
 0x381   :  { %v3487_v6 = vpop.eup %3486 }
 0x382   :  { %2646 = vadd.xlane.f32.xlu1 %v3487_v6 }
 0x407   :  { %v2645_v9 = vpop.xlane.xlu1 %2644 }
 0x408   :  { %3488 = vrcp.f32 %v2645_v9 }
 0x40b   :  { %v2647_v10 = vpop.xlane.xlu1 %2646 }
 0x40c   :  { %3490 = vrcp.f32 %v2647_v10 }
 0x415   :  { %v3489_v11 = vpop.eup %3488 }
 0x416   :  { %v2649_v12 = vmul.f32 %v3489_v11, %v3485_v5 }
 0x418   :  { %v2652_v13 = vsel %vm2631_vm8, %v2649_v12, %v2623_v57 }
 0x419   :  { %v3491_v14 = vpop.eup %3490  ;;  %2654 = vst [vmem:[#allocation11] sm:$0xff] %v2652_v13 }
 0x41a   :  { %v2651_v48 = vmul.f32 %v3491_v14, %v3487_v6 }
 0x41c   :  { %v2653_v15 = vsel %vm2631_vm8, %v2651_v48, %v2626_v62 }
 0x41d   :  { %2655 = vst [vmem:[#allocation11 + $0x8] sm:$0xff] %v2653_v15 }
 0x41e   :  { %2660 = vsyncadd [#allocation5], 224  ;;  %s3609_s4 = smov [#allocation11]  }
 0x41f   :  { %s2661_s16 = sshll.u32 %s3609_s4, 4  ;;  %s2662_s16 = int_to_ptr.vmem [resolvable:$true] %s2661_s16 }
 0x420   :  { %s3572_s17 = scalar_lea.vmem %s2662_s16, 32  ;;  %s3576_s18 = scalar_lea.vmem %s2662_s16, 256 }
 0x421   :  { %p3573_p6 = scmp.ne.s32.totalorder %s2662_s16, %s3572_s17  ;;  %p3577_p7 = scmp.lt.s32.totalorder %s2662_s16, %s2662_s16 }
 0x422   :  { %p3578_p8 = scmp.lt.s32.totalorder %s3576_s18, %s3572_s17 }
 0x424   :  { %p3579_p9 = por %p3578_p8, %p3577_p7 }
 0x426   :  { %p3580_p10 = pnand %p3579_p9, %p3573_p6 }
 0x428   :  { %3583 = shalt.err (!%p3580_p10)
}
 0x429   :  { %s3610_s19 = smov 32   ;;  %s3611_s20 = smov 2  }
 0x42a   :  { %2667 = dma.vmem_to_hbm [thread:$0]  %s2662_s16, 32, %s3771_s5, [#allocation5], %s3610_s19, %s3610_s19, %s3611_s20  }
 0x42b   :  { %3598 = dma.done.wait [#allocation5], 256  }
 0x42c   :  { %3599 = vsyncadd [#allocation5], 4294967040 }
 0x42d   :  { %2671 = vsyncpa [#allocation4], 1 }
 0x42e   :  { %2672 = vsyncpa [#allocation7], 1 }
 0x42f   :  { %2673 = vsyncpa [#allocation10], 1 }
 0x430   :  { %2674 = vsyncpa [#allocation5], 1 }

</bundles_post_ra>
